<compile_context>
chip_gen: v5e
topology: v5e:2x2
jax: 0.10.0
libtpu: 0.0.40
codegen_flags: <defaults>
</compile_context>

<pallas_src>
import functools
import math

import jax
import jax.numpy as jnp
from jax.experimental import pallas as pl
from jax.experimental.pallas import tpu as pltpu


# ----------------------------- config ----------------------------------------------
class Config:
    num_embeddings = 50
    embedding_dim = 32
    hidden_dim = 32
    num_layers = 2
    da = 16
    r = 4


# ------------------- fused 2-layer bi-LSTM + attention-score kernel -----------------
def _bilstm_att_kernel(x_ref, xf_ref,
                       wf1_ref, wr1_ref, whh1_ref, b1_ref,
                       wf2_ref, wr2_ref, whh2_ref, b2_ref,
                       w1t_ref, w2t_ref,
                       y_ref, a_ref,
                       xg_sc, h1_sc, h1f_sc, h_sc, c_sc):
    # x_ref / xf_ref : (L*Npad, Din)        flattened time-major input and its time flip
    # wf*/wr*        : (Din, 8H)            input->gate weights (fwd cols / rev cols)
    # whh*           : (2H, 8H)             block-diagonal recurrent weights
    # b*             : (1, 8H)              b_ih + b_hh, both directions interleaved
    # w1t / w2t      : (2H, da) / (da, r)   attention head
    # y_ref          : (L*Npad, 2H)         bi-LSTM output  [h_fwd | h_rev]
    # a_ref          : (L*Npad, r)          softmax(w2(tanh(w1(H))))  (row-wise)
    # xg_sc          : (L*Npad, 8H)         hoisted input-gate projections
    # h1_sc / h1f_sc : (L*Npad, 2H)         layer-1 output and its time flip
    # h_sc / c_sc    : (Npad, 2H)           recurrent state [fwd | rev]
    n_pad, h2 = h_sc.shape
    h1 = h2 // 2
    ln = x_ref.shape[0]
    seq = ln // n_pad

    def run_layer(inp_ref, inpflip_ref, wf_ref, wr_ref, whh_ref, b_ref,
                  out_ref, outflip_ref):
        # Hoisted input projection for every timestep (one wide MXU pass per weight).
        # Because inpflip is the time-reversed input, row-block t of xg_sc is already
        # aligned for loop step t: fwd columns come from inp[t], rev columns from
        # inp[L-1-t].
        xg_sc[...] = (jnp.dot(inp_ref[...], wf_ref[...],
                              preferred_element_type=jnp.float32)
                      + jnp.dot(inpflip_ref[...], wr_ref[...],
                                preferred_element_type=jnp.float32)
                      + b_ref[...])
        h_sc[...] = jnp.zeros_like(h_sc)
        c_sc[...] = jnp.zeros_like(c_sc)
        whh = whh_ref[...]

        # Serial recurrence, fully unrolled (L is small and static) so every slice is
        # static and only the (Npad, 2H) @ (2H, 8H) matmul sits on the critical path.
        for t in range(seq):
            r0 = t * n_pad
            rr = (seq - 1 - t) * n_pad
            g = xg_sc[r0:r0 + n_pad, :] + jnp.dot(
                h_sc[...], whh, preferred_element_type=jnp.float32)   # (Npad, 8H)
            # gate layout along 8H: [ i_f i_r | f_f f_r | g_f g_r | o_f o_r ]
            gi = jax.nn.sigmoid(g[:, 0 * h2:1 * h2])
            gf = jax.nn.sigmoid(g[:, 1 * h2:2 * h2])
            gg = jnp.tanh(g[:, 2 * h2:3 * h2])
            go = jax.nn.sigmoid(g[:, 3 * h2:4 * h2])
            c_new = gf * c_sc[...] + gi * gg
            h_new = go * jnp.tanh(c_new)
            c_sc[...] = c_new
            h_sc[...] = h_new
            # fwd half belongs to timestep t, rev half to timestep L-1-t.
            out_ref[r0:r0 + n_pad, 0:h1] = h_new[:, 0:h1]
            out_ref[rr:rr + n_pad, h1:h2] = h_new[:, h1:h2]
            if outflip_ref is not None:
                # also maintain the time-flipped copy (used by the next layer's
                # hoisted reverse-direction projection).
                outflip_ref[rr:rr + n_pad, 0:h1] = h_new[:, 0:h1]
                outflip_ref[r0:r0 + n_pad, h1:h2] = h_new[:, h1:h2]

    run_layer(x_ref, xf_ref, wf1_ref, wr1_ref, whh1_ref, b1_ref, h1_sc, h1f_sc)
    run_layer(h1_sc, h1f_sc, wf2_ref, wr2_ref, whh2_ref, b2_ref, y_ref, None)

    # Structured self-attention scores: softmax over r of w2(tanh(w1(H))), computed
    # row-wise on all L*Npad rows (padded batch rows are discarded by the caller).
    s1 = jnp.tanh(jnp.dot(y_ref[...], w1t_ref[...],
                          preferred_element_type=jnp.float32))
    s2 = jnp.dot(s1, w2t_ref[...], preferred_element_type=jnp.float32)
    s2 = s2 - jnp.max(s2, axis=-1, keepdims=True)
    e = jnp.exp(s2)
    a_ref[...] = e / jnp.sum(e, axis=-1, keepdims=True)


def bilstm_attention(x_fl, xf_fl, layer1, layer2, w1t, w2t, *, n_pad, hidden):
    ln = x_fl.shape[0]
    r = w2t.shape[1]
    return pl.pallas_call(
        _bilstm_att_kernel,
        out_shape=(jax.ShapeDtypeStruct((ln, 2 * hidden), jnp.float32),
                   jax.ShapeDtypeStruct((ln, r), jnp.float32)),
        in_specs=[pl.BlockSpec(memory_space=pltpu.MemorySpace.VMEM)] * 12,
        out_specs=(pl.BlockSpec(memory_space=pltpu.MemorySpace.VMEM),
                   pl.BlockSpec(memory_space=pltpu.MemorySpace.VMEM)),
        scratch_shapes=[pltpu.VMEM((ln, 8 * hidden), jnp.float32),
                        pltpu.VMEM((ln, 2 * hidden), jnp.float32),
                        pltpu.VMEM((ln, 2 * hidden), jnp.float32),
                        pltpu.VMEM((n_pad, 2 * hidden), jnp.float32),
                        pltpu.VMEM((n_pad, 2 * hidden), jnp.float32)],
    )(x_fl, xf_fl, *layer1, *layer2, w1t, w2t)


# ----------------------------- bmm + penalty kernel ---------------------------------
def _bmm_penalty_kernel(a_ref, h_ref, m_ref, p_ref):
    # a_ref : (N, r, L)   h_ref : (N, L, 2H)   m_ref : (N, r, 2H)   p_ref : (1, 1)
    n = a_ref.shape[0]
    total = jnp.float32(0.0)
    for b in range(n):                                   # static small batch, unrolled
        a = a_ref[b]                                     # (r, L)
        m_ref[b] = jnp.dot(a, h_ref[b], preferred_element_type=jnp.float32)
        aat = jax.lax.dot_general(a, a, (((1,), (1,)), ((), ())),
                                  preferred_element_type=jnp.float32)   # A @ A^T
        # ||A A^T - I||_F^2 = sum(AAt^2) - 2*trace(AAt) + r ;  trace(A A^T) = sum(A*A)
        total = total + jnp.sum(aat * aat) - 2.0 * jnp.sum(a * a) + float(a.shape[0])
    p_ref[...] = total + jnp.zeros_like(p_ref)


def bmm_penalty(A, Hv):
    n, r, seq = A.shape
    two_h = Hv.shape[2]
    return pl.pallas_call(
        _bmm_penalty_kernel,
        out_shape=(jax.ShapeDtypeStruct((n, r, two_h), jnp.float32),
                   jax.ShapeDtypeStruct((1, 1), jnp.float32)),
        in_specs=[pl.BlockSpec(memory_space=pltpu.MemorySpace.VMEM)] * 2,
        out_specs=(pl.BlockSpec(memory_space=pltpu.MemorySpace.VMEM),
                   pl.BlockSpec(memory_space=pltpu.MemorySpace.VMEM)),
    )(A, Hv)


# ----------------------------- weight packing ---------------------------------------
def _pack_bilstm_layer(pf, pr, hidden):
    """Pack one bi-LSTM layer for the fused kernel.

    Gate layout along the 8H axis is gate-major / direction-minor:
        [ i_f | i_r | f_f | f_r | g_f | g_r | o_f | o_r ]   (each block H wide)
    so i/f/g/o slices of the (Npad, 8H) gate tensor are 2H-wide lane slices and the
    recurrent state is laid out as [h_fwd | h_rev] (2H wide).  W_hh is block-diagonal
    over the two directions so one (2H, 8H) matmul drives both recurrences.
    """
    d_in = pf["w_ih"].shape[1]
    z_d = jnp.zeros((d_in, hidden), jnp.float32)
    z_h = jnp.zeros((hidden, hidden), jnp.float32)
    wf_blocks, wr_blocks, whh_top, whh_bot, b_blocks = [], [], [], [], []
    for g in range(4):                                   # PyTorch gate order i, f, g, o
        sl = slice(g * hidden, (g + 1) * hidden)
        wf_blocks += [pf["w_ih"][sl, :].T, z_d]
        wr_blocks += [z_d, pr["w_ih"][sl, :].T]
        whh_top += [pf["w_hh"][sl, :].T, z_h]
        whh_bot += [z_h, pr["w_hh"][sl, :].T]
        b_blocks += [pf["b"][sl], pr["b"][sl]]
    wih_f = jnp.concatenate(wf_blocks, axis=1)           # (Din, 8H), rev columns zero
    wih_r = jnp.concatenate(wr_blocks, axis=1)           # (Din, 8H), fwd columns zero
    whh = jnp.concatenate([jnp.concatenate(whh_top, axis=1),
                           jnp.concatenate(whh_bot, axis=1)], axis=0)   # (2H, 8H)
    b = jnp.concatenate(b_blocks).reshape(1, 8 * hidden)                # (1, 8H)
    return wih_f, wih_r, whh, b


# ----------------------------- full forward -----------------------------------------
def self_att_net_forward(params, x, cfg):
    assert cfg.num_layers == 2, "fused kernel implements exactly two bi-LSTM layers"
    n, seq = x.shape
    emb_dim = cfg.embedding_dim
    hid = cfg.hidden_dim
    n_pad = max(8, -(-n // 8) * 8)                       # pad batch to sublane multiple

    # Embedding lookup (gather kept as XLA glue) + faithful emb_x.view(L, N, -1).
    emb = params["embedding"][x]                         # (N, L, E)
    emb_x = emb.reshape(seq, n, emb_dim)                 # raw row-major view, as in ref
    emb_pad = jnp.pad(emb_x, ((0, 0), (0, n_pad - n), (0, 0)))
    x_fl = emb_pad.reshape(seq * n_pad, emb_dim)
    xf_fl = jnp.flip(emb_pad, axis=0).reshape(seq * n_pad, emb_dim)

    layer1 = _pack_bilstm_layer(params["lstm"][0]["fwd"], params["lstm"][0]["rev"], hid)
    layer2 = _pack_bilstm_layer(params["lstm"][1]["fwd"], params["lstm"][1]["rev"], hid)

    y_flat, a_full = bilstm_attention(x_fl, xf_fl, layer1, layer2,
                                      params["w1"].T, params["w2"].T,
                                      n_pad=n_pad, hidden=hid)

    # Drop batch padding and replicate the reference .view() semantics (raw reshapes).
    h_seq = y_flat.reshape(seq, n_pad, 2 * hid)[:, :n, :]          # (L, N, 2H)
    Hv = h_seq.reshape(n, seq, 2 * hid)                            # H.view(N, L, -1)
    A = a_full.reshape(seq, n_pad, cfg.r)[:, :n, :].reshape(n, cfg.r, seq)  # A.view(N,-1,L)

    M, p_sq = bmm_penalty(A, Hv)                         # M: (N, r, 2H), p_sq: (1, 1)
    P = jnp.sqrt(p_sq[0, 0])
    return M, P


# ----------------------------- parameter init ---------------------------------------
def init_params(key, cfg):
    keys = iter(jax.random.split(key, 64))
    p = {}
    p["embedding"] = jax.random.normal(next(keys),
                                       (cfg.num_embeddings, cfg.embedding_dim),
                                       jnp.float32)
    k = 1.0 / math.sqrt(cfg.hidden_dim)
    lstm = []
    for layer in range(cfg.num_layers):
        in_dim = cfg.embedding_dim if layer == 0 else 2 * cfg.hidden_dim
        layer_p = {}
        for d in ("fwd", "rev"):
            w_ih = jax.random.uniform(next(keys), (4 * cfg.hidden_dim, in_dim),
                                      jnp.float32, -k, k)
            w_hh = jax.random.uniform(next(keys), (4 * cfg.hidden_dim, cfg.hidden_dim),
                                      jnp.float32, -k, k)
            b_ih = jax.random.uniform(next(keys), (4 * cfg.hidden_dim,), jnp.float32, -k, k)
            b_hh = jax.random.uniform(next(keys), (4 * cfg.hidden_dim,), jnp.float32, -k, k)
            layer_p[d] = {"w_ih": w_ih, "w_hh": w_hh, "b": b_ih + b_hh}
        lstm.append(layer_p)
    p["lstm"] = lstm
    p["w1"] = jax.random.uniform(next(keys), (cfg.da, 2 * cfg.hidden_dim),
                                 jnp.float32, -0.25, 0.25)
    p["w2"] = jax.random.uniform(next(keys), (cfg.r, cfg.da), jnp.float32, -0.25, 0.25)
    return p


# ----------------------------- main --------------------------------------------------
if __name__ == "__main__":
    cfg = Config()
    key = jax.random.PRNGKey(0)
    kp, kx = jax.random.split(key)
    params = init_params(kp, cfg)

    N, L = 2, 8
    x = jax.random.randint(kx, (N, L), 0, cfg.num_embeddings, dtype=jnp.int32)

    fwd_fn = jax.jit(functools.partial(self_att_net_forward, cfg=cfg))
    M, P = fwd_fn(params, x)
    jax.block_until_ready((M, P))

    assert M.shape == (N, cfg.r, 2 * cfg.hidden_dim)
    assert P.shape == ()
    assert bool(jnp.all(jnp.isfinite(M))) and bool(jnp.isfinite(P))
    print("KERNEL_OK")
</pallas_src>

<mosaic_0001>
module attributes {stable_mosaic.version = 11 : i64} {
  func.func @_bmm_penalty_kernel(%arg0: memref<2x4x8xf32, #tpu.memory_space<vmem>>, %arg1: memref<2x8x64xf32, #tpu.memory_space<vmem>>, %arg2: memref<2x4x64xf32, #tpu.memory_space<vmem>>, %arg3: memref<1x1xf32, #tpu.memory_space<vmem>>) attributes {dimension_semantics = [], scalar_prefetch = 0 : i64, scratch_operands = 0 : i64, tpu.core_type = #tpu.core_type<tc>} {
    %c0 = arith.constant 0 : index
    %c0_0 = arith.constant 0 : index
    %c0_1 = arith.constant 0 : index
    %0 = vector.load %arg0[%c0, %c0_0, %c0_1] : memref<2x4x8xf32, #tpu.memory_space<vmem>>, vector<1x4x8xf32>
    %1 = vector.shape_cast %0 : vector<1x4x8xf32> to vector<4x8xf32>
    %c0_2 = arith.constant 0 : index
    %c0_3 = arith.constant 0 : index
    %c0_4 = arith.constant 0 : index
    %2 = vector.load %arg1[%c0_2, %c0_3, %c0_4] : memref<2x8x64xf32, #tpu.memory_space<vmem>>, vector<1x8x64xf32>
    %3 = vector.shape_cast %2 : vector<1x8x64xf32> to vector<8x64xf32>
    %cst = arith.constant dense<0.000000e+00> : vector<4x64xf32>
    %4 = tpu.matmul %1, %3, %cst {dimension_numbers = #tpu.dot_dimension_numbers<[1], [0], [0], [1], [0, 0, 1, 1], [], []>} : vector<4x8xf32>, vector<8x64xf32>, vector<4x64xf32> -> vector<4x64xf32>
    %c0_5 = arith.constant 0 : index
    %c0_6 = arith.constant 0 : index
    %c0_7 = arith.constant 0 : index
    %5 = vector.load %arg2[%c0_5, %c0_6, %c0_7] : memref<2x4x64xf32, #tpu.memory_space<vmem>>, vector<1x4x64xf32>
    %6 = vector.shape_cast %5 : vector<1x4x64xf32> to vector<4x64xf32>
    %7 = vector.shape_cast %4 : vector<4x64xf32> to vector<1x4x64xf32>
    tpu.vector_store %arg2[%c0_5, %c0_6, %c0_7], %7 {strides = array<i32>} : memref<2x4x64xf32, #tpu.memory_space<vmem>>, vector<1x4x64xf32>,
    %cst_8 = arith.constant dense<0.000000e+00> : vector<4x4xf32>
    %8 = tpu.matmul %1, %1, %cst_8 {dimension_numbers = #tpu.dot_dimension_numbers<[1], [1], [0], [0], [0, 0, 1, 0], [], []>} : vector<4x8xf32>, vector<4x8xf32>, vector<4x4xf32> -> vector<4x4xf32>
    %9 = arith.mulf %8, %8 : vector<4x4xf32>
    %10 = vector.shape_cast %9 : vector<4x4xf32> to vector<1x4x4xf32>
    %cst_9 = arith.constant dense<0.000000e+00> : vector<1xf32>
    %11 = vector.multi_reduction <add>, %10, %cst_9 [1, 2] : vector<1x4x4xf32> to vector<1xf32>
    %12 = vector.shape_cast %11 : vector<1xf32> to vector<1x1x1xf32>
    %13 = vector.extract %12[0, 0, 0] : f32 from vector<1x1x1xf32>
    %cst_10 = arith.constant 0.000000e+00 : f32
    %14 = arith.addf %cst_10, %13 : f32
    %15 = arith.mulf %1, %1 : vector<4x8xf32>
    %16 = vector.shape_cast %15 : vector<4x8xf32> to vector<1x4x8xf32>
    %cst_11 = arith.constant dense<0.000000e+00> : vector<1xf32>
    %17 = vector.multi_reduction <add>, %16, %cst_11 [1, 2] : vector<1x4x8xf32> to vector<1xf32>
    %18 = vector.shape_cast %17 : vector<1xf32> to vector<1x1x1xf32>
    %19 = vector.extract %18[0, 0, 0] : f32 from vector<1x1x1xf32>
    %cst_12 = arith.constant 2.000000e+00 : f32
    %20 = arith.mulf %cst_12, %19 : f32
    %21 = arith.subf %14, %20 : f32
    %cst_13 = arith.constant 4.000000e+00 : f32
    %22 = arith.addf %21, %cst_13 : f32
    %c1 = arith.constant 1 : index
    %c0_14 = arith.constant 0 : index
    %c0_15 = arith.constant 0 : index
    %23 = vector.load %arg0[%c1, %c0_14, %c0_15] : memref<2x4x8xf32, #tpu.memory_space<vmem>>, vector<1x4x8xf32>
    %24 = vector.shape_cast %23 : vector<1x4x8xf32> to vector<4x8xf32>
    %c1_16 = arith.constant 1 : index
    %c0_17 = arith.constant 0 : index
    %c0_18 = arith.constant 0 : index
    %25 = vector.load %arg1[%c1_16, %c0_17, %c0_18] : memref<2x8x64xf32, #tpu.memory_space<vmem>>, vector<1x8x64xf32>
    %26 = vector.shape_cast %25 : vector<1x8x64xf32> to vector<8x64xf32>
    %cst_19 = arith.constant dense<0.000000e+00> : vector<4x64xf32>
    %27 = tpu.matmul %24, %26, %cst_19 {dimension_numbers = #tpu.dot_dimension_numbers<[1], [0], [0], [1], [0, 0, 1, 1], [], []>} : vector<4x8xf32>, vector<8x64xf32>, vector<4x64xf32> -> vector<4x64xf32>
    %c1_20 = arith.constant 1 : index
    %c0_21 = arith.constant 0 : index
    %c0_22 = arith.constant 0 : index
    %28 = vector.load %arg2[%c1_20, %c0_21, %c0_22] : memref<2x4x64xf32, #tpu.memory_space<vmem>>, vector<1x4x64xf32>
    %29 = vector.shape_cast %28 : vector<1x4x64xf32> to vector<4x64xf32>
    %30 = vector.shape_cast %27 : vector<4x64xf32> to vector<1x4x64xf32>
    tpu.vector_store %arg2[%c1_20, %c0_21, %c0_22], %30 {strides = array<i32>} : memref<2x4x64xf32, #tpu.memory_space<vmem>>, vector<1x4x64xf32>,
    %cst_23 = arith.constant dense<0.000000e+00> : vector<4x4xf32>
    %31 = tpu.matmul %24, %24, %cst_23 {dimension_numbers = #tpu.dot_dimension_numbers<[1], [1], [0], [0], [0, 0, 1, 0], [], []>} : vector<4x8xf32>, vector<4x8xf32>, vector<4x4xf32> -> vector<4x4xf32>
    %32 = arith.mulf %31, %31 : vector<4x4xf32>
    %33 = vector.shape_cast %32 : vector<4x4xf32> to vector<1x4x4xf32>
    %cst_24 = arith.constant dense<0.000000e+00> : vector<1xf32>
    %34 = vector.multi_reduction <add>, %33, %cst_24 [1, 2] : vector<1x4x4xf32> to vector<1xf32>
    %35 = vector.shape_cast %34 : vector<1xf32> to vector<1x1x1xf32>
    %36 = vector.extract %35[0, 0, 0] : f32 from vector<1x1x1xf32>
    %37 = arith.addf %22, %36 : f32
    %38 = arith.mulf %24, %24 : vector<4x8xf32>
    %39 = vector.shape_cast %38 : vector<4x8xf32> to vector<1x4x8xf32>
    %cst_25 = arith.constant dense<0.000000e+00> : vector<1xf32>
    %40 = vector.multi_reduction <add>, %39, %cst_25 [1, 2] : vector<1x4x8xf32> to vector<1xf32>
    %41 = vector.shape_cast %40 : vector<1xf32> to vector<1x1x1xf32>
    %42 = vector.extract %41[0, 0, 0] : f32 from vector<1x1x1xf32>
    %cst_26 = arith.constant 2.000000e+00 : f32
    %43 = arith.mulf %cst_26, %42 : f32
    %44 = arith.subf %37, %43 : f32
    %cst_27 = arith.constant 4.000000e+00 : f32
    %45 = arith.addf %44, %cst_27 : f32
    %cst_28 = arith.constant 0.000000e+00 : f32
    %46 = vector.broadcast %cst_28 : f32 to vector<1x1xf32>
    %47 = vector.broadcast %45 : f32 to vector<1x1xf32>
    %48 = arith.addf %47, %46 : vector<1x1xf32>
    %c0_29 = arith.constant 0 : index
    %c0_30 = arith.constant 0 : index
    %49 = vector.load %arg3[%c0_29, %c0_30] : memref<1x1xf32, #tpu.memory_space<vmem>>, vector<1x1xf32>
    tpu.vector_store %arg3[%c0_29, %c0_30], %48 {strides = array<i32>} : memref<1x1xf32, #tpu.memory_space<vmem>>, vector<1x1xf32>,
    return
  }
}

module attributes {stable_mosaic.version = 11 : i64} {
  func.func @_bilstm_att_kernel(%arg0: memref<64x32xf32, #tpu.memory_space<vmem>>, %arg1: memref<64x32xf32, #tpu.memory_space<vmem>>, %arg2: memref<32x256xf32, #tpu.memory_space<vmem>>, %arg3: memref<32x256xf32, #tpu.memory_space<vmem>>, %arg4: memref<64x256xf32, #tpu.memory_space<vmem>>, %arg5: memref<1x256xf32, #tpu.memory_space<vmem>>, %arg6: memref<64x256xf32, #tpu.memory_space<vmem>>, %arg7: memref<64x256xf32, #tpu.memory_space<vmem>>, %arg8: memref<64x256xf32, #tpu.memory_space<vmem>>, %arg9: memref<1x256xf32, #tpu.memory_space<vmem>>, %arg10: memref<64x16xf32, #tpu.memory_space<vmem>>, %arg11: memref<16x4xf32, #tpu.memory_space<vmem>>, %arg12: memref<64x64xf32, #tpu.memory_space<vmem>>, %arg13: memref<64x4xf32, #tpu.memory_space<vmem>>, %arg14: memref<64x256xf32, #tpu.memory_space<vmem>>, %arg15: memref<64x64xf32, #tpu.memory_space<vmem>>, %arg16: memref<64x64xf32, #tpu.memory_space<vmem>>, %arg17: memref<8x64xf32, #tpu.memory_space<vmem>>, %arg18: memref<8x64xf32, #tpu.memory_space<vmem>>) attributes {dimension_semantics = [], scalar_prefetch = 0 : i64, scratch_operands = 5 : i64, tpu.core_type = #tpu.core_type<tc>} {
    %c0 = arith.constant 0 : index
    %c0_0 = arith.constant 0 : index
    %0 = vector.load %arg0[%c0, %c0_0] : memref<64x32xf32, #tpu.memory_space<vmem>>, vector<64x32xf32>
    %c0_1 = arith.constant 0 : index
    %c0_2 = arith.constant 0 : index
    %1 = vector.load %arg2[%c0_1, %c0_2] : memref<32x256xf32, #tpu.memory_space<vmem>>, vector<32x256xf32>
    %cst = arith.constant dense<0.000000e+00> : vector<64x256xf32>
    %2 = tpu.matmul %0, %1, %cst {dimension_numbers = #tpu.dot_dimension_numbers<[1], [0], [0], [1], [0, 0, 1, 1], [], []>} : vector<64x32xf32>, vector<32x256xf32>, vector<64x256xf32> -> vector<64x256xf32>
    %c0_3 = arith.constant 0 : index
    %c0_4 = arith.constant 0 : index
    %3 = vector.load %arg1[%c0_3, %c0_4] : memref<64x32xf32, #tpu.memory_space<vmem>>, vector<64x32xf32>
    %c0_5 = arith.constant 0 : index
    %c0_6 = arith.constant 0 : index
    %4 = vector.load %arg3[%c0_5, %c0_6] : memref<32x256xf32, #tpu.memory_space<vmem>>, vector<32x256xf32>
    %cst_7 = arith.constant dense<0.000000e+00> : vector<64x256xf32>
    %5 = tpu.matmul %3, %4, %cst_7 {dimension_numbers = #tpu.dot_dimension_numbers<[1], [0], [0], [1], [0, 0, 1, 1], [], []>} : vector<64x32xf32>, vector<32x256xf32>, vector<64x256xf32> -> vector<64x256xf32>
    %6 = arith.addf %2, %5 : vector<64x256xf32>
    %c0_8 = arith.constant 0 : index
    %c0_9 = arith.constant 0 : index
    %7 = vector.load %arg5[%c0_8, %c0_9] : memref<1x256xf32, #tpu.memory_space<vmem>>, vector<1x256xf32>
    %8 = vector.broadcast %7 : vector<1x256xf32> to vector<64x256xf32>
    %9 = arith.addf %6, %8 : vector<64x256xf32>
    %c0_10 = arith.constant 0 : index
    %c0_11 = arith.constant 0 : index
    %10 = vector.load %arg14[%c0_10, %c0_11] : memref<64x256xf32, #tpu.memory_space<vmem>>, vector<64x256xf32>
    tpu.vector_store %arg14[%c0_10, %c0_11], %9 {strides = array<i32>} : memref<64x256xf32, #tpu.memory_space<vmem>>, vector<64x256xf32>,
    %cst_12 = arith.constant 0.000000e+00 : f32
    %11 = vector.broadcast %cst_12 : f32 to vector<8x64xf32>
    %c0_13 = arith.constant 0 : index
    %c0_14 = arith.constant 0 : index
    %12 = vector.load %arg17[%c0_13, %c0_14] : memref<8x64xf32, #tpu.memory_space<vmem>>, vector<8x64xf32>
    tpu.vector_store %arg17[%c0_13, %c0_14], %11 {strides = array<i32>} : memref<8x64xf32, #tpu.memory_space<vmem>>, vector<8x64xf32>,
    %cst_15 = arith.constant 0.000000e+00 : f32
    %13 = vector.broadcast %cst_15 : f32 to vector<8x64xf32>
    %c0_16 = arith.constant 0 : index
    %c0_17 = arith.constant 0 : index
    %14 = vector.load %arg18[%c0_16, %c0_17] : memref<8x64xf32, #tpu.memory_space<vmem>>, vector<8x64xf32>
    tpu.vector_store %arg18[%c0_16, %c0_17], %13 {strides = array<i32>} : memref<8x64xf32, #tpu.memory_space<vmem>>, vector<8x64xf32>,
    %c0_18 = arith.constant 0 : index
    %c0_19 = arith.constant 0 : index
    %15 = vector.load %arg4[%c0_18, %c0_19] : memref<64x256xf32, #tpu.memory_space<vmem>>, vector<64x256xf32>
    %c0_20 = arith.constant 0 : index
    %c0_21 = arith.constant 0 : index
    %16 = vector.load %arg14[%c0_20, %c0_21] : memref<64x256xf32, #tpu.memory_space<vmem>>, vector<8x256xf32>
    %c0_22 = arith.constant 0 : index
    %c0_23 = arith.constant 0 : index
    %17 = vector.load %arg17[%c0_22, %c0_23] : memref<8x64xf32, #tpu.memory_space<vmem>>, vector<8x64xf32>
    %cst_24 = arith.constant dense<0.000000e+00> : vector<8x256xf32>
    %18 = tpu.matmul %17, %15, %cst_24 {dimension_numbers = #tpu.dot_dimension_numbers<[1], [0], [0], [1], [0, 0, 1, 1], [], []>} : vector<8x64xf32>, vector<64x256xf32>, vector<8x256xf32> -> vector<8x256xf32>
    %19 = arith.addf %16, %18 : vector<8x256xf32>
    %20 = vector.extract_strided_slice %19 {offsets = [0, 0], sizes = [8, 64], strides = [1, 1]} : vector<8x256xf32> to vector<8x64xf32>
    %21 = arith.negf %20 : vector<8x64xf32>
    %22 = math.exp %21 : vector<8x64xf32>
    %cst_25 = arith.constant 1.000000e+00 : f32
    %23 = vector.broadcast %cst_25 : f32 to vector<8x64xf32>
    %24 = arith.addf %23, %22 : vector<8x64xf32>
    %25 = arith.divf %23, %24 : vector<8x64xf32>
    %26 = vector.extract_strided_slice %19 {offsets = [0, 64], sizes = [8, 64], strides = [1, 1]} : vector<8x256xf32> to vector<8x64xf32>
    %27 = arith.negf %26 : vector<8x64xf32>
    %28 = math.exp %27 : vector<8x64xf32>
    %cst_26 = arith.constant 1.000000e+00 : f32
    %29 = vector.broadcast %cst_26 : f32 to vector<8x64xf32>
    %30 = arith.addf %29, %28 : vector<8x64xf32>
    %31 = arith.divf %29, %30 : vector<8x64xf32>
    %32 = vector.extract_strided_slice %19 {offsets = [0, 128], sizes = [8, 64], strides = [1, 1]} : vector<8x256xf32> to vector<8x64xf32>
    %33 = math.tanh %32 : vector<8x64xf32>
    %34 = vector.extract_strided_slice %19 {offsets = [0, 192], sizes = [8, 64], strides = [1, 1]} : vector<8x256xf32> to vector<8x64xf32>
    %35 = arith.negf %34 : vector<8x64xf32>
    %36 = math.exp %35 : vector<8x64xf32>
    %cst_27 = arith.constant 1.000000e+00 : f32
    %37 = vector.broadcast %cst_27 : f32 to vector<8x64xf32>
    %38 = arith.addf %37, %36 : vector<8x64xf32>
    %39 = arith.divf %37, %38 : vector<8x64xf32>
    %c0_28 = arith.constant 0 : index
    %c0_29 = arith.constant 0 : index
    %40 = vector.load %arg18[%c0_28, %c0_29] : memref<8x64xf32, #tpu.memory_space<vmem>>, vector<8x64xf32>
    %41 = arith.mulf %31, %40 : vector<8x64xf32>
    %42 = arith.mulf %25, %33 : vector<8x64xf32>
    %43 = arith.addf %41, %42 : vector<8x64xf32>
    %44 = math.tanh %43 : vector<8x64xf32>
    %45 = arith.mulf %39, %44 : vector<8x64xf32>
    %c0_30 = arith.constant 0 : index
    %c0_31 = arith.constant 0 : index
    %46 = vector.load %arg18[%c0_30, %c0_31] : memref<8x64xf32, #tpu.memory_space<vmem>>, vector<8x64xf32>
    tpu.vector_store %arg18[%c0_30, %c0_31], %43 {strides = array<i32>} : memref<8x64xf32, #tpu.memory_space<vmem>>, vector<8x64xf32>,
    %c0_32 = arith.constant 0 : index
    %c0_33 = arith.constant 0 : index
    %47 = vector.load %arg17[%c0_32, %c0_33] : memref<8x64xf32, #tpu.memory_space<vmem>>, vector<8x64xf32>
    tpu.vector_store %arg17[%c0_32, %c0_33], %45 {strides = array<i32>} : memref<8x64xf32, #tpu.memory_space<vmem>>, vector<8x64xf32>,
    %48 = vector.extract_strided_slice %45 {offsets = [0, 0], sizes = [8, 32], strides = [1, 1]} : vector<8x64xf32> to vector<8x32xf32>
    %c0_34 = arith.constant 0 : index
    %c0_35 = arith.constant 0 : index
    %49 = vector.load %arg15[%c0_34, %c0_35] : memref<64x64xf32, #tpu.memory_space<vmem>>, vector<8x32xf32>
    tpu.vector_store %arg15[%c0_34, %c0_35], %48 {strides = array<i32>} : memref<64x64xf32, #tpu.memory_space<vmem>>, vector<8x32xf32>,
    %50 = vector.extract_strided_slice %45 {offsets = [0, 32], sizes = [8, 32], strides = [1, 1]} : vector<8x64xf32> to vector<8x32xf32>
    %c56 = arith.constant 56 : index
    %c32 = arith.constant 32 : index
    %51 = vector.load %arg15[%c56, %c32] : memref<64x64xf32, #tpu.memory_space<vmem>>, vector<8x32xf32>
    tpu.vector_store %arg15[%c56, %c32], %50 {strides = array<i32>} : memref<64x64xf32, #tpu.memory_space<vmem>>, vector<8x32xf32>,
    %52 = vector.extract_strided_slice %45 {offsets = [0, 0], sizes = [8, 32], strides = [1, 1]} : vector<8x64xf32> to vector<8x32xf32>
    %c56_36 = arith.constant 56 : index
    %c0_37 = arith.constant 0 : index
    %53 = vector.load %arg16[%c56_36, %c0_37] : memref<64x64xf32, #tpu.memory_space<vmem>>, vector<8x32xf32>
    tpu.vector_store %arg16[%c56_36, %c0_37], %52 {strides = array<i32>} : memref<64x64xf32, #tpu.memory_space<vmem>>, vector<8x32xf32>,
    %54 = vector.extract_strided_slice %45 {offsets = [0, 32], sizes = [8, 32], strides = [1, 1]} : vector<8x64xf32> to vector<8x32xf32>
    %c0_38 = arith.constant 0 : index
    %c32_39 = arith.constant 32 : index
    %55 = vector.load %arg16[%c0_38, %c32_39] : memref<64x64xf32, #tpu.memory_space<vmem>>, vector<8x32xf32>
    tpu.vector_store %arg16[%c0_38, %c32_39], %54 {strides = array<i32>} : memref<64x64xf32, #tpu.memory_space<vmem>>, vector<8x32xf32>,
    %c8 = arith.constant 8 : index
    %c0_40 = arith.constant 0 : index
    %56 = vector.load %arg14[%c8, %c0_40] : memref<64x256xf32, #tpu.memory_space<vmem>>, vector<8x256xf32>
    %c0_41 = arith.constant 0 : index
    %c0_42 = arith.constant 0 : index
    %57 = vector.load %arg17[%c0_41, %c0_42] : memref<8x64xf32, #tpu.memory_space<vmem>>, vector<8x64xf32>
    %cst_43 = arith.constant dense<0.000000e+00> : vector<8x256xf32>
    %58 = tpu.matmul %57, %15, %cst_43 {dimension_numbers = #tpu.dot_dimension_numbers<[1], [0], [0], [1], [0, 0, 1, 1], [], []>} : vector<8x64xf32>, vector<64x256xf32>, vector<8x256xf32> -> vector<8x256xf32>
    %59 = arith.addf %56, %58 : vector<8x256xf32>
    %60 = vector.extract_strided_slice %59 {offsets = [0, 0], sizes = [8, 64], strides = [1, 1]} : vector<8x256xf32> to vector<8x64xf32>
    %61 = arith.negf %60 : vector<8x64xf32>
    %62 = math.exp %61 : vector<8x64xf32>
    %cst_44 = arith.constant 1.000000e+00 : f32
    %63 = vector.broadcast %cst_44 : f32 to vector<8x64xf32>
    %64 = arith.addf %63, %62 : vector<8x64xf32>
    %65 = arith.divf %63, %64 : vector<8x64xf32>
    %66 = vector.extract_strided_slice %59 {offsets = [0, 64], sizes = [8, 64], strides = [1, 1]} : vector<8x256xf32> to vector<8x64xf32>
    %67 = arith.negf %66 : vector<8x64xf32>
    %68 = math.exp %67 : vector<8x64xf32>
    %cst_45 = arith.constant 1.000000e+00 : f32
    %69 = vector.broadcast %cst_45 : f32 to vector<8x64xf32>
    %70 = arith.addf %69, %68 : vector<8x64xf32>
    %71 = arith.divf %69, %70 : vector<8x64xf32>
    %72 = vector.extract_strided_slice %59 {offsets = [0, 128], sizes = [8, 64], strides = [1, 1]} : vector<8x256xf32> to vector<8x64xf32>
    %73 = math.tanh %72 : vector<8x64xf32>
    %74 = vector.extract_strided_slice %59 {offsets = [0, 192], sizes = [8, 64], strides = [1, 1]} : vector<8x256xf32> to vector<8x64xf32>
    %75 = arith.negf %74 : vector<8x64xf32>
    %76 = math.exp %75 : vector<8x64xf32>
    %cst_46 = arith.constant 1.000000e+00 : f32
    %77 = vector.broadcast %cst_46 : f32 to vector<8x64xf32>
    %78 = arith.addf %77, %76 : vector<8x64xf32>
    %79 = arith.divf %77, %78 : vector<8x64xf32>
    %c0_47 = arith.constant 0 : index
    %c0_48 = arith.constant 0 : index
    %80 = vector.load %arg18[%c0_47, %c0_48] : memref<8x64xf32, #tpu.memory_space<vmem>>, vector<8x64xf32>
    %81 = arith.mulf %71, %80 : vector<8x64xf32>
    %82 = arith.mulf %65, %73 : vector<8x64xf32>
    %83 = arith.addf %81, %82 : vector<8x64xf32>
    %84 = math.tanh %83 : vector<8x64xf32>
    %85 = arith.mulf %79, %84 : vector<8x64xf32>
    %c0_49 = arith.constant 0 : index
    %c0_50 = arith.constant 0 : index
    %86 = vector.load %arg18[%c0_49, %c0_50] : memref<8x64xf32, #tpu.memory_space<vmem>>, vector<8x64xf32>
    tpu.vector_store %arg18[%c0_49, %c0_50], %83 {strides = array<i32>} : memref<8x64xf32, #tpu.memory_space<vmem>>, vector<8x64xf32>,
    %c0_51 = arith.constant 0 : index
    %c0_52 = arith.constant 0 : index
    %87 = vector.load %arg17[%c0_51, %c0_52] : memref<8x64xf32, #tpu.memory_space<vmem>>, vector<8x64xf32>
    tpu.vector_store %arg17[%c0_51, %c0_52], %85 {strides = array<i32>} : memref<8x64xf32, #tpu.memory_space<vmem>>, vector<8x64xf32>,
    %88 = vector.extract_strided_slice %85 {offsets = [0, 0], sizes = [8, 32], strides = [1, 1]} : vector<8x64xf32> to vector<8x32xf32>
    %c8_53 = arith.constant 8 : index
    %c0_54 = arith.constant 0 : index
    %89 = vector.load %arg15[%c8_53, %c0_54] : memref<64x64xf32, #tpu.memory_space<vmem>>, vector<8x32xf32>
    tpu.vector_store %arg15[%c8_53, %c0_54], %88 {strides = array<i32>} : memref<64x64xf32, #tpu.memory_space<vmem>>, vector<8x32xf32>,
    %90 = vector.extract_strided_slice %85 {offsets = [0, 32], sizes = [8, 32], strides = [1, 1]} : vector<8x64xf32> to vector<8x32xf32>
    %c48 = arith.constant 48 : index
    %c32_55 = arith.constant 32 : index
    %91 = vector.load %arg15[%c48, %c32_55] : memref<64x64xf32, #tpu.memory_space<vmem>>, vector<8x32xf32>
    tpu.vector_store %arg15[%c48, %c32_55], %90 {strides = array<i32>} : memref<64x64xf32, #tpu.memory_space<vmem>>, vector<8x32xf32>,
    %92 = vector.extract_strided_slice %85 {offsets = [0, 0], sizes = [8, 32], strides = [1, 1]} : vector<8x64xf32> to vector<8x32xf32>
    %c48_56 = arith.constant 48 : index
    %c0_57 = arith.constant 0 : index
    %93 = vector.load %arg16[%c48_56, %c0_57] : memref<64x64xf32, #tpu.memory_space<vmem>>, vector<8x32xf32>
    tpu.vector_store %arg16[%c48_56, %c0_57], %92 {strides = array<i32>} : memref<64x64xf32, #tpu.memory_space<vmem>>, vector<8x32xf32>,
    %94 = vector.extract_strided_slice %85 {offsets = [0, 32], sizes = [8, 32], strides = [1, 1]} : vector<8x64xf32> to vector<8x32xf32>
    %c8_58 = arith.constant 8 : index
    %c32_59 = arith.constant 32 : index
    %95 = vector.load %arg16[%c8_58, %c32_59] : memref<64x64xf32, #tpu.memory_space<vmem>>, vector<8x32xf32>
    tpu.vector_store %arg16[%c8_58, %c32_59], %94 {strides = array<i32>} : memref<64x64xf32, #tpu.memory_space<vmem>>, vector<8x32xf32>,
    %c16 = arith.constant 16 : index
    %c0_60 = arith.constant 0 : index
    %96 = vector.load %arg14[%c16, %c0_60] : memref<64x256xf32, #tpu.memory_space<vmem>>, vector<8x256xf32>
    %c0_61 = arith.constant 0 : index
    %c0_62 = arith.constant 0 : index
    %97 = vector.load %arg17[%c0_61, %c0_62] : memref<8x64xf32, #tpu.memory_space<vmem>>, vector<8x64xf32>
    %cst_63 = arith.constant dense<0.000000e+00> : vector<8x256xf32>
    %98 = tpu.matmul %97, %15, %cst_63 {dimension_numbers = #tpu.dot_dimension_numbers<[1], [0], [0], [1], [0, 0, 1, 1], [], []>} : vector<8x64xf32>, vector<64x256xf32>, vector<8x256xf32> -> vector<8x256xf32>
    %99 = arith.addf %96, %98 : vector<8x256xf32>
    %100 = vector.extract_strided_slice %99 {offsets = [0, 0], sizes = [8, 64], strides = [1, 1]} : vector<8x256xf32> to vector<8x64xf32>
    %101 = arith.negf %100 : vector<8x64xf32>
    %102 = math.exp %101 : vector<8x64xf32>
    %cst_64 = arith.constant 1.000000e+00 : f32
    %103 = vector.broadcast %cst_64 : f32 to vector<8x64xf32>
    %104 = arith.addf %103, %102 : vector<8x64xf32>
    %105 = arith.divf %103, %104 : vector<8x64xf32>
    %106 = vector.extract_strided_slice %99 {offsets = [0, 64], sizes = [8, 64], strides = [1, 1]} : vector<8x256xf32> to vector<8x64xf32>
    %107 = arith.negf %106 : vector<8x64xf32>
    %108 = math.exp %107 : vector<8x64xf32>
    %cst_65 = arith.constant 1.000000e+00 : f32
    %109 = vector.broadcast %cst_65 : f32 to vector<8x64xf32>
    %110 = arith.addf %109, %108 : vector<8x64xf32>
    %111 = arith.divf %109, %110 : vector<8x64xf32>
    %112 = vector.extract_strided_slice %99 {offsets = [0, 128], sizes = [8, 64], strides = [1, 1]} : vector<8x256xf32> to vector<8x64xf32>
    %113 = math.tanh %112 : vector<8x64xf32>
    %114 = vector.extract_strided_slice %99 {offsets = [0, 192], sizes = [8, 64], strides = [1, 1]} : vector<8x256xf32> to vector<8x64xf32>
    %115 = arith.negf %114 : vector<8x64xf32>
    %116 = math.exp %115 : vector<8x64xf32>
    %cst_66 = arith.constant 1.000000e+00 : f32
    %117 = vector.broadcast %cst_66 : f32 to vector<8x64xf32>
    %118 = arith.addf %117, %116 : vector<8x64xf32>
    %119 = arith.divf %117, %118 : vector<8x64xf32>
    %c0_67 = arith.constant 0 : index
    %c0_68 = arith.constant 0 : index
    %120 = vector.load %arg18[%c0_67, %c0_68] : memref<8x64xf32, #tpu.memory_space<vmem>>, vector<8x64xf32>
    %121 = arith.mulf %111, %120 : vector<8x64xf32>
    %122 = arith.mulf %105, %113 : vector<8x64xf32>
    %123 = arith.addf %121, %122 : vector<8x64xf32>
    %124 = math.tanh %123 : vector<8x64xf32>
    %125 = arith.mulf %119, %124 : vector<8x64xf32>
    %c0_69 = arith.constant 0 : index
    %c0_70 = arith.constant 0 : index
    %126 = vector.load %arg18[%c0_69, %c0_70] : memref<8x64xf32, #tpu.memory_space<vmem>>, vector<8x64xf32>
    tpu.vector_store %arg18[%c0_69, %c0_70], %123 {strides = array<i32>} : memref<8x64xf32, #tpu.memory_space<vmem>>, vector<8x64xf32>,
    %c0_71 = arith.constant 0 : index
    %c0_72 = arith.constant 0 : index
    %127 = vector.load %arg17[%c0_71, %c0_72] : memref<8x64xf32, #tpu.memory_space<vmem>>, vector<8x64xf32>
    tpu.vector_store %arg17[%c0_71, %c0_72], %125 {strides = array<i32>} : memref<8x64xf32, #tpu.memory_space<vmem>>, vector<8x64xf32>,
    %128 = vector.extract_strided_slice %125 {offsets = [0, 0], sizes = [8, 32], strides = [1, 1]} : vector<8x64xf32> to vector<8x32xf32>
    %c16_73 = arith.constant 16 : index
    %c0_74 = arith.constant 0 : index
    %129 = vector.load %arg15[%c16_73, %c0_74] : memref<64x64xf32, #tpu.memory_space<vmem>>, vector<8x32xf32>
    tpu.vector_store %arg15[%c16_73, %c0_74], %128 {strides = array<i32>} : memref<64x64xf32, #tpu.memory_space<vmem>>, vector<8x32xf32>,
    %130 = vector.extract_strided_slice %125 {offsets = [0, 32], sizes = [8, 32], strides = [1, 1]} : vector<8x64xf32> to vector<8x32xf32>
    %c40 = arith.constant 40 : index
    %c32_75 = arith.constant 32 : index
    %131 = vector.load %arg15[%c40, %c32_75] : memref<64x64xf32, #tpu.memory_space<vmem>>, vector<8x32xf32>
    tpu.vector_store %arg15[%c40, %c32_75], %130 {strides = array<i32>} : memref<64x64xf32, #tpu.memory_space<vmem>>, vector<8x32xf32>,
    %132 = vector.extract_strided_slice %125 {offsets = [0, 0], sizes = [8, 32], strides = [1, 1]} : vector<8x64xf32> to vector<8x32xf32>
    %c40_76 = arith.constant 40 : index
    %c0_77 = arith.constant 0 : index
    %133 = vector.load %arg16[%c40_76, %c0_77] : memref<64x64xf32, #tpu.memory_space<vmem>>, vector<8x32xf32>
    tpu.vector_store %arg16[%c40_76, %c0_77], %132 {strides = array<i32>} : memref<64x64xf32, #tpu.memory_space<vmem>>, vector<8x32xf32>,
    %134 = vector.extract_strided_slice %125 {offsets = [0, 32], sizes = [8, 32], strides = [1, 1]} : vector<8x64xf32> to vector<8x32xf32>
    %c16_78 = arith.constant 16 : index
    %c32_79 = arith.constant 32 : index
    %135 = vector.load %arg16[%c16_78, %c32_79] : memref<64x64xf32, #tpu.memory_space<vmem>>, vector<8x32xf32>
    tpu.vector_store %arg16[%c16_78, %c32_79], %134 {strides = array<i32>} : memref<64x64xf32, #tpu.memory_space<vmem>>, vector<8x32xf32>,
    %c24 = arith.constant 24 : index
    %c0_80 = arith.constant 0 : index
    %136 = vector.load %arg14[%c24, %c0_80] : memref<64x256xf32, #tpu.memory_space<vmem>>, vector<8x256xf32>
    %c0_81 = arith.constant 0 : index
    %c0_82 = arith.constant 0 : index
    %137 = vector.load %arg17[%c0_81, %c0_82] : memref<8x64xf32, #tpu.memory_space<vmem>>, vector<8x64xf32>
    %cst_83 = arith.constant dense<0.000000e+00> : vector<8x256xf32>
    %138 = tpu.matmul %137, %15, %cst_83 {dimension_numbers = #tpu.dot_dimension_numbers<[1], [0], [0], [1], [0, 0, 1, 1], [], []>} : vector<8x64xf32>, vector<64x256xf32>, vector<8x256xf32> -> vector<8x256xf32>
    %139 = arith.addf %136, %138 : vector<8x256xf32>
    %140 = vector.extract_strided_slice %139 {offsets = [0, 0], sizes = [8, 64], strides = [1, 1]} : vector<8x256xf32> to vector<8x64xf32>
    %141 = arith.negf %140 : vector<8x64xf32>
    %142 = math.exp %141 : vector<8x64xf32>
    %cst_84 = arith.constant 1.000000e+00 : f32
    %143 = vector.broadcast %cst_84 : f32 to vector<8x64xf32>
    %144 = arith.addf %143, %142 : vector<8x64xf32>
    %145 = arith.divf %143, %144 : vector<8x64xf32>
    %146 = vector.extract_strided_slice %139 {offsets = [0, 64], sizes = [8, 64], strides = [1, 1]} : vector<8x256xf32> to vector<8x64xf32>
    %147 = arith.negf %146 : vector<8x64xf32>
    %148 = math.exp %147 : vector<8x64xf32>
    %cst_85 = arith.constant 1.000000e+00 : f32
    %149 = vector.broadcast %cst_85 : f32 to vector<8x64xf32>
    %150 = arith.addf %149, %148 : vector<8x64xf32>
    %151 = arith.divf %149, %150 : vector<8x64xf32>
    %152 = vector.extract_strided_slice %139 {offsets = [0, 128], sizes = [8, 64], strides = [1, 1]} : vector<8x256xf32> to vector<8x64xf32>
    %153 = math.tanh %152 : vector<8x64xf32>
    %154 = vector.extract_strided_slice %139 {offsets = [0, 192], sizes = [8, 64], strides = [1, 1]} : vector<8x256xf32> to vector<8x64xf32>
    %155 = arith.negf %154 : vector<8x64xf32>
    %156 = math.exp %155 : vector<8x64xf32>
    %cst_86 = arith.constant 1.000000e+00 : f32
    %157 = vector.broadcast %cst_86 : f32 to vector<8x64xf32>
    %158 = arith.addf %157, %156 : vector<8x64xf32>
    %159 = arith.divf %157, %158 : vector<8x64xf32>
    %c0_87 = arith.constant 0 : index
    %c0_88 = arith.constant 0 : index
    %160 = vector.load %arg18[%c0_87, %c0_88] : memref<8x64xf32, #tpu.memory_space<vmem>>, vector<8x64xf32>
    %161 = arith.mulf %151, %160 : vector<8x64xf32>
    %162 = arith.mulf %145, %153 : vector<8x64xf32>
    %163 = arith.addf %161, %162 : vector<8x64xf32>
    %164 = math.tanh %163 : vector<8x64xf32>
    %165 = arith.mulf %159, %164 : vector<8x64xf32>
    %c0_89 = arith.constant 0 : index
    %c0_90 = arith.constant 0 : index
    %166 = vector.load %arg18[%c0_89, %c0_90] : memref<8x64xf32, #tpu.memory_space<vmem>>, vector<8x64xf32>
    tpu.vector_store %arg18[%c0_89, %c0_90], %163 {strides = array<i32>} : memref<8x64xf32, #tpu.memory_space<vmem>>, vector<8x64xf32>,
    %c0_91 = arith.constant 0 : index
    %c0_92 = arith.constant 0 : index
    %167 = vector.load %arg17[%c0_91, %c0_92] : memref<8x64xf32, #tpu.memory_space<vmem>>, vector<8x64xf32>
    tpu.vector_store %arg17[%c0_91, %c0_92], %165 {strides = array<i32>} : memref<8x64xf32, #tpu.memory_space<vmem>>, vector<8x64xf32>,
    %168 = vector.extract_strided_slice %165 {offsets = [0, 0], sizes = [8, 32], strides = [1, 1]} : vector<8x64xf32> to vector<8x32xf32>
    %c24_93 = arith.constant 24 : index
    %c0_94 = arith.constant 0 : index
    %169 = vector.load %arg15[%c24_93, %c0_94] : memref<64x64xf32, #tpu.memory_space<vmem>>, vector<8x32xf32>
    tpu.vector_store %arg15[%c24_93, %c0_94], %168 {strides = array<i32>} : memref<64x64xf32, #tpu.memory_space<vmem>>, vector<8x32xf32>,
    %170 = vector.extract_strided_slice %165 {offsets = [0, 32], sizes = [8, 32], strides = [1, 1]} : vector<8x64xf32> to vector<8x32xf32>
    %c32_95 = arith.constant 32 : index
    %c32_96 = arith.constant 32 : index
    %171 = vector.load %arg15[%c32_95, %c32_96] : memref<64x64xf32, #tpu.memory_space<vmem>>, vector<8x32xf32>
    tpu.vector_store %arg15[%c32_95, %c32_96], %170 {strides = array<i32>} : memref<64x64xf32, #tpu.memory_space<vmem>>, vector<8x32xf32>,
    %172 = vector.extract_strided_slice %165 {offsets = [0, 0], sizes = [8, 32], strides = [1, 1]} : vector<8x64xf32> to vector<8x32xf32>
    %c32_97 = arith.constant 32 : index
    %c0_98 = arith.constant 0 : index
    %173 = vector.load %arg16[%c32_97, %c0_98] : memref<64x64xf32, #tpu.memory_space<vmem>>, vector<8x32xf32>
    tpu.vector_store %arg16[%c32_97, %c0_98], %172 {strides = array<i32>} : memref<64x64xf32, #tpu.memory_space<vmem>>, vector<8x32xf32>,
    %174 = vector.extract_strided_slice %165 {offsets = [0, 32], sizes = [8, 32], strides = [1, 1]} : vector<8x64xf32> to vector<8x32xf32>
    %c24_99 = arith.constant 24 : index
    %c32_100 = arith.constant 32 : index
    %175 = vector.load %arg16[%c24_99, %c32_100] : memref<64x64xf32, #tpu.memory_space<vmem>>, vector<8x32xf32>
    tpu.vector_store %arg16[%c24_99, %c32_100], %174 {strides = array<i32>} : memref<64x64xf32, #tpu.memory_space<vmem>>, vector<8x32xf32>,
    %c32_101 = arith.constant 32 : index
    %c0_102 = arith.constant 0 : index
    %176 = vector.load %arg14[%c32_101, %c0_102] : memref<64x256xf32, #tpu.memory_space<vmem>>, vector<8x256xf32>
    %c0_103 = arith.constant 0 : index
    %c0_104 = arith.constant 0 : index
    %177 = vector.load %arg17[%c0_103, %c0_104] : memref<8x64xf32, #tpu.memory_space<vmem>>, vector<8x64xf32>
    %cst_105 = arith.constant dense<0.000000e+00> : vector<8x256xf32>
    %178 = tpu.matmul %177, %15, %cst_105 {dimension_numbers = #tpu.dot_dimension_numbers<[1], [0], [0], [1], [0, 0, 1, 1], [], []>} : vector<8x64xf32>, vector<64x256xf32>, vector<8x256xf32> -> vector<8x256xf32>
    %179 = arith.addf %176, %178 : vector<8x256xf32>
    %180 = vector.extract_strided_slice %179 {offsets = [0, 0], sizes = [8, 64], strides = [1, 1]} : vector<8x256xf32> to vector<8x64xf32>
    %181 = arith.negf %180 : vector<8x64xf32>
    %182 = math.exp %181 : vector<8x64xf32>
    %cst_106 = arith.constant 1.000000e+00 : f32
    %183 = vector.broadcast %cst_106 : f32 to vector<8x64xf32>
    %184 = arith.addf %183, %182 : vector<8x64xf32>
    %185 = arith.divf %183, %184 : vector<8x64xf32>
    %186 = vector.extract_strided_slice %179 {offsets = [0, 64], sizes = [8, 64], strides = [1, 1]} : vector<8x256xf32> to vector<8x64xf32>
    %187 = arith.negf %186 : vector<8x64xf32>
    %188 = math.exp %187 : vector<8x64xf32>
    %cst_107 = arith.constant 1.000000e+00 : f32
    %189 = vector.broadcast %cst_107 : f32 to vector<8x64xf32>
    %190 = arith.addf %189, %188 : vector<8x64xf32>
    %191 = arith.divf %189, %190 : vector<8x64xf32>
    %192 = vector.extract_strided_slice %179 {offsets = [0, 128], sizes = [8, 64], strides = [1, 1]} : vector<8x256xf32> to vector<8x64xf32>
    %193 = math.tanh %192 : vector<8x64xf32>
    %194 = vector.extract_strided_slice %179 {offsets = [0, 192], sizes = [8, 64], strides = [1, 1]} : vector<8x256xf32> to vector<8x64xf32>
    %195 = arith.negf %194 : vector<8x64xf32>
    %196 = math.exp %195 : vector<8x64xf32>
    %cst_108 = arith.constant 1.000000e+00 : f32
    %197 = vector.broadcast %cst_108 : f32 to vector<8x64xf32>
    %198 = arith.addf %197, %196 : vector<8x64xf32>
    %199 = arith.divf %197, %198 : vector<8x64xf32>
    %c0_109 = arith.constant 0 : index
    %c0_110 = arith.constant 0 : index
    %200 = vector.load %arg18[%c0_109, %c0_110] : memref<8x64xf32, #tpu.memory_space<vmem>>, vector<8x64xf32>
    %201 = arith.mulf %191, %200 : vector<8x64xf32>
    %202 = arith.mulf %185, %193 : vector<8x64xf32>
    %203 = arith.addf %201, %202 : vector<8x64xf32>
    %204 = math.tanh %203 : vector<8x64xf32>
    %205 = arith.mulf %199, %204 : vector<8x64xf32>
    %c0_111 = arith.constant 0 : index
    %c0_112 = arith.constant 0 : index
    %206 = vector.load %arg18[%c0_111, %c0_112] : memref<8x64xf32, #tpu.memory_space<vmem>>, vector<8x64xf32>
    tpu.vector_store %arg18[%c0_111, %c0_112], %203 {strides = array<i32>} : memref<8x64xf32, #tpu.memory_space<vmem>>, vector<8x64xf32>,
    %c0_113 = arith.constant 0 : index
    %c0_114 = arith.constant 0 : index
    %207 = vector.load %arg17[%c0_113, %c0_114] : memref<8x64xf32, #tpu.memory_space<vmem>>, vector<8x64xf32>
    tpu.vector_store %arg17[%c0_113, %c0_114], %205 {strides = array<i32>} : memref<8x64xf32, #tpu.memory_space<vmem>>, vector<8x64xf32>,
    %208 = vector.extract_strided_slice %205 {offsets = [0, 0], sizes = [8, 32], strides = [1, 1]} : vector<8x64xf32> to vector<8x32xf32>
    %c32_115 = arith.constant 32 : index
    %c0_116 = arith.constant 0 : index
    %209 = vector.load %arg15[%c32_115, %c0_116] : memref<64x64xf32, #tpu.memory_space<vmem>>, vector<8x32xf32>
    tpu.vector_store %arg15[%c32_115, %c0_116], %208 {strides = array<i32>} : memref<64x64xf32, #tpu.memory_space<vmem>>, vector<8x32xf32>,
    %210 = vector.extract_strided_slice %205 {offsets = [0, 32], sizes = [8, 32], strides = [1, 1]} : vector<8x64xf32> to vector<8x32xf32>
    %c24_117 = arith.constant 24 : index
    %c32_118 = arith.constant 32 : index
    %211 = vector.load %arg15[%c24_117, %c32_118] : memref<64x64xf32, #tpu.memory_space<vmem>>, vector<8x32xf32>
    tpu.vector_store %arg15[%c24_117, %c32_118], %210 {strides = array<i32>} : memref<64x64xf32, #tpu.memory_space<vmem>>, vector<8x32xf32>,
    %212 = vector.extract_strided_slice %205 {offsets = [0, 0], sizes = [8, 32], strides = [1, 1]} : vector<8x64xf32> to vector<8x32xf32>
    %c24_119 = arith.constant 24 : index
    %c0_120 = arith.constant 0 : index
    %213 = vector.load %arg16[%c24_119, %c0_120] : memref<64x64xf32, #tpu.memory_space<vmem>>, vector<8x32xf32>
    tpu.vector_store %arg16[%c24_119, %c0_120], %212 {strides = array<i32>} : memref<64x64xf32, #tpu.memory_space<vmem>>, vector<8x32xf32>,
    %214 = vector.extract_strided_slice %205 {offsets = [0, 32], sizes = [8, 32], strides = [1, 1]} : vector<8x64xf32> to vector<8x32xf32>
    %c32_121 = arith.constant 32 : index
    %c32_122 = arith.constant 32 : index
    %215 = vector.load %arg16[%c32_121, %c32_122] : memref<64x64xf32, #tpu.memory_space<vmem>>, vector<8x32xf32>
    tpu.vector_store %arg16[%c32_121, %c32_122], %214 {strides = array<i32>} : memref<64x64xf32, #tpu.memory_space<vmem>>, vector<8x32xf32>,
    %c40_123 = arith.constant 40 : index
    %c0_124 = arith.constant 0 : index
    %216 = vector.load %arg14[%c40_123, %c0_124] : memref<64x256xf32, #tpu.memory_space<vmem>>, vector<8x256xf32>
    %c0_125 = arith.constant 0 : index
    %c0_126 = arith.constant 0 : index
    %217 = vector.load %arg17[%c0_125, %c0_126] : memref<8x64xf32, #tpu.memory_space<vmem>>, vector<8x64xf32>
    %cst_127 = arith.constant dense<0.000000e+00> : vector<8x256xf32>
    %218 = tpu.matmul %217, %15, %cst_127 {dimension_numbers = #tpu.dot_dimension_numbers<[1], [0], [0], [1], [0, 0, 1, 1], [], []>} : vector<8x64xf32>, vector<64x256xf32>, vector<8x256xf32> -> vector<8x256xf32>
    %219 = arith.addf %216, %218 : vector<8x256xf32>
    %220 = vector.extract_strided_slice %219 {offsets = [0, 0], sizes = [8, 64], strides = [1, 1]} : vector<8x256xf32> to vector<8x64xf32>
    %221 = arith.negf %220 : vector<8x64xf32>
    %222 = math.exp %221 : vector<8x64xf32>
    %cst_128 = arith.constant 1.000000e+00 : f32
    %223 = vector.broadcast %cst_128 : f32 to vector<8x64xf32>
    %224 = arith.addf %223, %222 : vector<8x64xf32>
    %225 = arith.divf %223, %224 : vector<8x64xf32>
    %226 = vector.extract_strided_slice %219 {offsets = [0, 64], sizes = [8, 64], strides = [1, 1]} : vector<8x256xf32> to vector<8x64xf32>
    %227 = arith.negf %226 : vector<8x64xf32>
    %228 = math.exp %227 : vector<8x64xf32>
    %cst_129 = arith.constant 1.000000e+00 : f32
    %229 = vector.broadcast %cst_129 : f32 to vector<8x64xf32>
    %230 = arith.addf %229, %228 : vector<8x64xf32>
    %231 = arith.divf %229, %230 : vector<8x64xf32>
    %232 = vector.extract_strided_slice %219 {offsets = [0, 128], sizes = [8, 64], strides = [1, 1]} : vector<8x256xf32> to vector<8x64xf32>
    %233 = math.tanh %232 : vector<8x64xf32>
    %234 = vector.extract_strided_slice %219 {offsets = [0, 192], sizes = [8, 64], strides = [1, 1]} : vector<8x256xf32> to vector<8x64xf32>
    %235 = arith.negf %234 : vector<8x64xf32>
    %236 = math.exp %235 : vector<8x64xf32>
    %cst_130 = arith.constant 1.000000e+00 : f32
    %237 = vector.broadcast %cst_130 : f32 to vector<8x64xf32>
    %238 = arith.addf %237, %236 : vector<8x64xf32>
    %239 = arith.divf %237, %238 : vector<8x64xf32>
    %c0_131 = arith.constant 0 : index
    %c0_132 = arith.constant 0 : index
    %240 = vector.load %arg18[%c0_131, %c0_132] : memref<8x64xf32, #tpu.memory_space<vmem>>, vector<8x64xf32>
    %241 = arith.mulf %231, %240 : vector<8x64xf32>
    %242 = arith.mulf %225, %233 : vector<8x64xf32>
    %243 = arith.addf %241, %242 : vector<8x64xf32>
    %244 = math.tanh %243 : vector<8x64xf32>
    %245 = arith.mulf %239, %244 : vector<8x64xf32>
    %c0_133 = arith.constant 0 : index
    %c0_134 = arith.constant 0 : index
    %246 = vector.load %arg18[%c0_133, %c0_134] : memref<8x64xf32, #tpu.memory_space<vmem>>, vector<8x64xf32>
    tpu.vector_store %arg18[%c0_133, %c0_134], %243 {strides = array<i32>} : memref<8x64xf32, #tpu.memory_space<vmem>>, vector<8x64xf32>,
    %c0_135 = arith.constant 0 : index
    %c0_136 = arith.constant 0 : index
    %247 = vector.load %arg17[%c0_135, %c0_136] : memref<8x64xf32, #tpu.memory_space<vmem>>, vector<8x64xf32>
    tpu.vector_store %arg17[%c0_135, %c0_136], %245 {strides = array<i32>} : memref<8x64xf32, #tpu.memory_space<vmem>>, vector<8x64xf32>,
    %248 = vector.extract_strided_slice %245 {offsets = [0, 0], sizes = [8, 32], strides = [1, 1]} : vector<8x64xf32> to vector<8x32xf32>
    %c40_137 = arith.constant 40 : index
    %c0_138 = arith.constant 0 : index
    %249 = vector.load %arg15[%c40_137, %c0_138] : memref<64x64xf32, #tpu.memory_space<vmem>>, vector<8x32xf32>
    tpu.vector_store %arg15[%c40_137, %c0_138], %248 {strides = array<i32>} : memref<64x64xf32, #tpu.memory_space<vmem>>, vector<8x32xf32>,
    %250 = vector.extract_strided_slice %245 {offsets = [0, 32], sizes = [8, 32], strides = [1, 1]} : vector<8x64xf32> to vector<8x32xf32>
    %c16_139 = arith.constant 16 : index
    %c32_140 = arith.constant 32 : index
    %251 = vector.load %arg15[%c16_139, %c32_140] : memref<64x64xf32, #tpu.memory_space<vmem>>, vector<8x32xf32>
    tpu.vector_store %arg15[%c16_139, %c32_140], %250 {strides = array<i32>} : memref<64x64xf32, #tpu.memory_space<vmem>>, vector<8x32xf32>,
    %252 = vector.extract_strided_slice %245 {offsets = [0, 0], sizes = [8, 32], strides = [1, 1]} : vector<8x64xf32> to vector<8x32xf32>
    %c16_141 = arith.constant 16 : index
    %c0_142 = arith.constant 0 : index
    %253 = vector.load %arg16[%c16_141, %c0_142] : memref<64x64xf32, #tpu.memory_space<vmem>>, vector<8x32xf32>
    tpu.vector_store %arg16[%c16_141, %c0_142], %252 {strides = array<i32>} : memref<64x64xf32, #tpu.memory_space<vmem>>, vector<8x32xf32>,
    %254 = vector.extract_strided_slice %245 {offsets = [0, 32], sizes = [8, 32], strides = [1, 1]} : vector<8x64xf32> to vector<8x32xf32>
    %c40_143 = arith.constant 40 : index
    %c32_144 = arith.constant 32 : index
    %255 = vector.load %arg16[%c40_143, %c32_144] : memref<64x64xf32, #tpu.memory_space<vmem>>, vector<8x32xf32>
    tpu.vector_store %arg16[%c40_143, %c32_144], %254 {strides = array<i32>} : memref<64x64xf32, #tpu.memory_space<vmem>>, vector<8x32xf32>,
    %c48_145 = arith.constant 48 : index
    %c0_146 = arith.constant 0 : index
    %256 = vector.load %arg14[%c48_145, %c0_146] : memref<64x256xf32, #tpu.memory_space<vmem>>, vector<8x256xf32>
    %c0_147 = arith.constant 0 : index
    %c0_148 = arith.constant 0 : index
    %257 = vector.load %arg17[%c0_147, %c0_148] : memref<8x64xf32, #tpu.memory_space<vmem>>, vector<8x64xf32>
    %cst_149 = arith.constant dense<0.000000e+00> : vector<8x256xf32>
    %258 = tpu.matmul %257, %15, %cst_149 {dimension_numbers = #tpu.dot_dimension_numbers<[1], [0], [0], [1], [0, 0, 1, 1], [], []>} : vector<8x64xf32>, vector<64x256xf32>, vector<8x256xf32> -> vector<8x256xf32>
    %259 = arith.addf %256, %258 : vector<8x256xf32>
    %260 = vector.extract_strided_slice %259 {offsets = [0, 0], sizes = [8, 64], strides = [1, 1]} : vector<8x256xf32> to vector<8x64xf32>
    %261 = arith.negf %260 : vector<8x64xf32>
    %262 = math.exp %261 : vector<8x64xf32>
    %cst_150 = arith.constant 1.000000e+00 : f32
    %263 = vector.broadcast %cst_150 : f32 to vector<8x64xf32>
    %264 = arith.addf %263, %262 : vector<8x64xf32>
    %265 = arith.divf %263, %264 : vector<8x64xf32>
    %266 = vector.extract_strided_slice %259 {offsets = [0, 64], sizes = [8, 64], strides = [1, 1]} : vector<8x256xf32> to vector<8x64xf32>
    %267 = arith.negf %266 : vector<8x64xf32>
    %268 = math.exp %267 : vector<8x64xf32>
    %cst_151 = arith.constant 1.000000e+00 : f32
    %269 = vector.broadcast %cst_151 : f32 to vector<8x64xf32>
    %270 = arith.addf %269, %268 : vector<8x64xf32>
    %271 = arith.divf %269, %270 : vector<8x64xf32>
    %272 = vector.extract_strided_slice %259 {offsets = [0, 128], sizes = [8, 64], strides = [1, 1]} : vector<8x256xf32> to vector<8x64xf32>
    %273 = math.tanh %272 : vector<8x64xf32>
    %274 = vector.extract_strided_slice %259 {offsets = [0, 192], sizes = [8, 64], strides = [1, 1]} : vector<8x256xf32> to vector<8x64xf32>
    %275 = arith.negf %274 : vector<8x64xf32>
    %276 = math.exp %275 : vector<8x64xf32>
    %cst_152 = arith.constant 1.000000e+00 : f32
    %277 = vector.broadcast %cst_152 : f32 to vector<8x64xf32>
    %278 = arith.addf %277, %276 : vector<8x64xf32>
    %279 = arith.divf %277, %278 : vector<8x64xf32>
    %c0_153 = arith.constant 0 : index
    %c0_154 = arith.constant 0 : index
    %280 = vector.load %arg18[%c0_153, %c0_154] : memref<8x64xf32, #tpu.memory_space<vmem>>, vector<8x64xf32>
    %281 = arith.mulf %271, %280 : vector<8x64xf32>
    %282 = arith.mulf %265, %273 : vector<8x64xf32>
    %283 = arith.addf %281, %282 : vector<8x64xf32>
    %284 = math.tanh %283 : vector<8x64xf32>
    %285 = arith.mulf %279, %284 : vector<8x64xf32>
    %c0_155 = arith.constant 0 : index
    %c0_156 = arith.constant 0 : index
    %286 = vector.load %arg18[%c0_155, %c0_156] : memref<8x64xf32, #tpu.memory_space<vmem>>, vector<8x64xf32>
    tpu.vector_store %arg18[%c0_155, %c0_156], %283 {strides = array<i32>} : memref<8x64xf32, #tpu.memory_space<vmem>>, vector<8x64xf32>,
    %c0_157 = arith.constant 0 : index
    %c0_158 = arith.constant 0 : index
    %287 = vector.load %arg17[%c0_157, %c0_158] : memref<8x64xf32, #tpu.memory_space<vmem>>, vector<8x64xf32>
    tpu.vector_store %arg17[%c0_157, %c0_158], %285 {strides = array<i32>} : memref<8x64xf32, #tpu.memory_space<vmem>>, vector<8x64xf32>,
    %288 = vector.extract_strided_slice %285 {offsets = [0, 0], sizes = [8, 32], strides = [1, 1]} : vector<8x64xf32> to vector<8x32xf32>
    %c48_159 = arith.constant 48 : index
    %c0_160 = arith.constant 0 : index
    %289 = vector.load %arg15[%c48_159, %c0_160] : memref<64x64xf32, #tpu.memory_space<vmem>>, vector<8x32xf32>
    tpu.vector_store %arg15[%c48_159, %c0_160], %288 {strides = array<i32>} : memref<64x64xf32, #tpu.memory_space<vmem>>, vector<8x32xf32>,
    %290 = vector.extract_strided_slice %285 {offsets = [0, 32], sizes = [8, 32], strides = [1, 1]} : vector<8x64xf32> to vector<8x32xf32>
    %c8_161 = arith.constant 8 : index
    %c32_162 = arith.constant 32 : index
    %291 = vector.load %arg15[%c8_161, %c32_162] : memref<64x64xf32, #tpu.memory_space<vmem>>, vector<8x32xf32>
    tpu.vector_store %arg15[%c8_161, %c32_162], %290 {strides = array<i32>} : memref<64x64xf32, #tpu.memory_space<vmem>>, vector<8x32xf32>,
    %292 = vector.extract_strided_slice %285 {offsets = [0, 0], sizes = [8, 32], strides = [1, 1]} : vector<8x64xf32> to vector<8x32xf32>
    %c8_163 = arith.constant 8 : index
    %c0_164 = arith.constant 0 : index
    %293 = vector.load %arg16[%c8_163, %c0_164] : memref<64x64xf32, #tpu.memory_space<vmem>>, vector<8x32xf32>
    tpu.vector_store %arg16[%c8_163, %c0_164], %292 {strides = array<i32>} : memref<64x64xf32, #tpu.memory_space<vmem>>, vector<8x32xf32>,
    %294 = vector.extract_strided_slice %285 {offsets = [0, 32], sizes = [8, 32], strides = [1, 1]} : vector<8x64xf32> to vector<8x32xf32>
    %c48_165 = arith.constant 48 : index
    %c32_166 = arith.constant 32 : index
    %295 = vector.load %arg16[%c48_165, %c32_166] : memref<64x64xf32, #tpu.memory_space<vmem>>, vector<8x32xf32>
    tpu.vector_store %arg16[%c48_165, %c32_166], %294 {strides = array<i32>} : memref<64x64xf32, #tpu.memory_space<vmem>>, vector<8x32xf32>,
    %c56_167 = arith.constant 56 : index
    %c0_168 = arith.constant 0 : index
    %296 = vector.load %arg14[%c56_167, %c0_168] : memref<64x256xf32, #tpu.memory_space<vmem>>, vector<8x256xf32>
    %c0_169 = arith.constant 0 : index
    %c0_170 = arith.constant 0 : index
    %297 = vector.load %arg17[%c0_169, %c0_170] : memref<8x64xf32, #tpu.memory_space<vmem>>, vector<8x64xf32>
    %cst_171 = arith.constant dense<0.000000e+00> : vector<8x256xf32>
    %298 = tpu.matmul %297, %15, %cst_171 {dimension_numbers = #tpu.dot_dimension_numbers<[1], [0], [0], [1], [0, 0, 1, 1], [], []>} : vector<8x64xf32>, vector<64x256xf32>, vector<8x256xf32> -> vector<8x256xf32>
    %299 = arith.addf %296, %298 : vector<8x256xf32>
    %300 = vector.extract_strided_slice %299 {offsets = [0, 0], sizes = [8, 64], strides = [1, 1]} : vector<8x256xf32> to vector<8x64xf32>
    %301 = arith.negf %300 : vector<8x64xf32>
    %302 = math.exp %301 : vector<8x64xf32>
    %cst_172 = arith.constant 1.000000e+00 : f32
    %303 = vector.broadcast %cst_172 : f32 to vector<8x64xf32>
    %304 = arith.addf %303, %302 : vector<8x64xf32>
    %305 = arith.divf %303, %304 : vector<8x64xf32>
    %306 = vector.extract_strided_slice %299 {offsets = [0, 64], sizes = [8, 64], strides = [1, 1]} : vector<8x256xf32> to vector<8x64xf32>
    %307 = arith.negf %306 : vector<8x64xf32>
    %308 = math.exp %307 : vector<8x64xf32>
    %cst_173 = arith.constant 1.000000e+00 : f32
    %309 = vector.broadcast %cst_173 : f32 to vector<8x64xf32>
    %310 = arith.addf %309, %308 : vector<8x64xf32>
    %311 = arith.divf %309, %310 : vector<8x64xf32>
    %312 = vector.extract_strided_slice %299 {offsets = [0, 128], sizes = [8, 64], strides = [1, 1]} : vector<8x256xf32> to vector<8x64xf32>
    %313 = math.tanh %312 : vector<8x64xf32>
    %314 = vector.extract_strided_slice %299 {offsets = [0, 192], sizes = [8, 64], strides = [1, 1]} : vector<8x256xf32> to vector<8x64xf32>
    %315 = arith.negf %314 : vector<8x64xf32>
    %316 = math.exp %315 : vector<8x64xf32>
    %cst_174 = arith.constant 1.000000e+00 : f32
    %317 = vector.broadcast %cst_174 : f32 to vector<8x64xf32>
    %318 = arith.addf %317, %316 : vector<8x64xf32>
    %319 = arith.divf %317, %318 : vector<8x64xf32>
    %c0_175 = arith.constant 0 : index
    %c0_176 = arith.constant 0 : index
    %320 = vector.load %arg18[%c0_175, %c0_176] : memref<8x64xf32, #tpu.memory_space<vmem>>, vector<8x64xf32>
    %321 = arith.mulf %311, %320 : vector<8x64xf32>
    %322 = arith.mulf %305, %313 : vector<8x64xf32>
    %323 = arith.addf %321, %322 : vector<8x64xf32>
    %324 = math.tanh %323 : vector<8x64xf32>
    %325 = arith.mulf %319, %324 : vector<8x64xf32>
    %c0_177 = arith.constant 0 : index
    %c0_178 = arith.constant 0 : index
    %326 = vector.load %arg18[%c0_177, %c0_178] : memref<8x64xf32, #tpu.memory_space<vmem>>, vector<8x64xf32>
    tpu.vector_store %arg18[%c0_177, %c0_178], %323 {strides = array<i32>} : memref<8x64xf32, #tpu.memory_space<vmem>>, vector<8x64xf32>,
    %c0_179 = arith.constant 0 : index
    %c0_180 = arith.constant 0 : index
    %327 = vector.load %arg17[%c0_179, %c0_180] : memref<8x64xf32, #tpu.memory_space<vmem>>, vector<8x64xf32>
    tpu.vector_store %arg17[%c0_179, %c0_180], %325 {strides = array<i32>} : memref<8x64xf32, #tpu.memory_space<vmem>>, vector<8x64xf32>,
    %328 = vector.extract_strided_slice %325 {offsets = [0, 0], sizes = [8, 32], strides = [1, 1]} : vector<8x64xf32> to vector<8x32xf32>
    %c56_181 = arith.constant 56 : index
    %c0_182 = arith.constant 0 : index
    %329 = vector.load %arg15[%c56_181, %c0_182] : memref<64x64xf32, #tpu.memory_space<vmem>>, vector<8x32xf32>
    tpu.vector_store %arg15[%c56_181, %c0_182], %328 {strides = array<i32>} : memref<64x64xf32, #tpu.memory_space<vmem>>, vector<8x32xf32>,
    %330 = vector.extract_strided_slice %325 {offsets = [0, 32], sizes = [8, 32], strides = [1, 1]} : vector<8x64xf32> to vector<8x32xf32>
    %c0_183 = arith.constant 0 : index
    %c32_184 = arith.constant 32 : index
    %331 = vector.load %arg15[%c0_183, %c32_184] : memref<64x64xf32, #tpu.memory_space<vmem>>, vector<8x32xf32>
    tpu.vector_store %arg15[%c0_183, %c32_184], %330 {strides = array<i32>} : memref<64x64xf32, #tpu.memory_space<vmem>>, vector<8x32xf32>,
    %332 = vector.extract_strided_slice %325 {offsets = [0, 0], sizes = [8, 32], strides = [1, 1]} : vector<8x64xf32> to vector<8x32xf32>
    %c0_185 = arith.constant 0 : index
    %c0_186 = arith.constant 0 : index
    %333 = vector.load %arg16[%c0_185, %c0_186] : memref<64x64xf32, #tpu.memory_space<vmem>>, vector<8x32xf32>
    tpu.vector_store %arg16[%c0_185, %c0_186], %332 {strides = array<i32>} : memref<64x64xf32, #tpu.memory_space<vmem>>, vector<8x32xf32>,
    %334 = vector.extract_strided_slice %325 {offsets = [0, 32], sizes = [8, 32], strides = [1, 1]} : vector<8x64xf32> to vector<8x32xf32>
    %c56_187 = arith.constant 56 : index
    %c32_188 = arith.constant 32 : index
    %335 = vector.load %arg16[%c56_187, %c32_188] : memref<64x64xf32, #tpu.memory_space<vmem>>, vector<8x32xf32>
    tpu.vector_store %arg16[%c56_187, %c32_188], %334 {strides = array<i32>} : memref<64x64xf32, #tpu.memory_space<vmem>>, vector<8x32xf32>,
    %c0_189 = arith.constant 0 : index
    %c0_190 = arith.constant 0 : index
    %336 = vector.load %arg15[%c0_189, %c0_190] : memref<64x64xf32, #tpu.memory_space<vmem>>, vector<64x64xf32>
    %c0_191 = arith.constant 0 : index
    %c0_192 = arith.constant 0 : index
    %337 = vector.load %arg6[%c0_191, %c0_192] : memref<64x256xf32, #tpu.memory_space<vmem>>, vector<64x256xf32>
    %cst_193 = arith.constant dense<0.000000e+00> : vector<64x256xf32>
    %338 = tpu.matmul %336, %337, %cst_193 {dimension_numbers = #tpu.dot_dimension_numbers<[1], [0], [0], [1], [0, 0, 1, 1], [], []>} : vector<64x64xf32>, vector<64x256xf32>, vector<64x256xf32> -> vector<64x256xf32>
    %c0_194 = arith.constant 0 : index
    %c0_195 = arith.constant 0 : index
    %339 = vector.load %arg16[%c0_194, %c0_195] : memref<64x64xf32, #tpu.memory_space<vmem>>, vector<64x64xf32>
    %c0_196 = arith.constant 0 : index
    %c0_197 = arith.constant 0 : index
    %340 = vector.load %arg7[%c0_196, %c0_197] : memref<64x256xf32, #tpu.memory_space<vmem>>, vector<64x256xf32>
    %cst_198 = arith.constant dense<0.000000e+00> : vector<64x256xf32>
    %341 = tpu.matmul %339, %340, %cst_198 {dimension_numbers = #tpu.dot_dimension_numbers<[1], [0], [0], [1], [0, 0, 1, 1], [], []>} : vector<64x64xf32>, vector<64x256xf32>, vector<64x256xf32> -> vector<64x256xf32>
    %342 = arith.addf %338, %341 : vector<64x256xf32>
    %c0_199 = arith.constant 0 : index
    %c0_200 = arith.constant 0 : index
    %343 = vector.load %arg9[%c0_199, %c0_200] : memref<1x256xf32, #tpu.memory_space<vmem>>, vector<1x256xf32>
    %344 = vector.broadcast %343 : vector<1x256xf32> to vector<64x256xf32>
    %345 = arith.addf %342, %344 : vector<64x256xf32>
    %c0_201 = arith.constant 0 : index
    %c0_202 = arith.constant 0 : index
    %346 = vector.load %arg14[%c0_201, %c0_202] : memref<64x256xf32, #tpu.memory_space<vmem>>, vector<64x256xf32>
    tpu.vector_store %arg14[%c0_201, %c0_202], %345 {strides = array<i32>} : memref<64x256xf32, #tpu.memory_space<vmem>>, vector<64x256xf32>,
    %cst_203 = arith.constant 0.000000e+00 : f32
    %347 = vector.broadcast %cst_203 : f32 to vector<8x64xf32>
    %c0_204 = arith.constant 0 : index
    %c0_205 = arith.constant 0 : index
    %348 = vector.load %arg17[%c0_204, %c0_205] : memref<8x64xf32, #tpu.memory_space<vmem>>, vector<8x64xf32>
    tpu.vector_store %arg17[%c0_204, %c0_205], %347 {strides = array<i32>} : memref<8x64xf32, #tpu.memory_space<vmem>>, vector<8x64xf32>,
    %cst_206 = arith.constant 0.000000e+00 : f32
    %349 = vector.broadcast %cst_206 : f32 to vector<8x64xf32>
    %c0_207 = arith.constant 0 : index
    %c0_208 = arith.constant 0 : index
    %350 = vector.load %arg18[%c0_207, %c0_208] : memref<8x64xf32, #tpu.memory_space<vmem>>, vector<8x64xf32>
    tpu.vector_store %arg18[%c0_207, %c0_208], %349 {strides = array<i32>} : memref<8x64xf32, #tpu.memory_space<vmem>>, vector<8x64xf32>,
    %c0_209 = arith.constant 0 : index
    %c0_210 = arith.constant 0 : index
    %351 = vector.load %arg8[%c0_209, %c0_210] : memref<64x256xf32, #tpu.memory_space<vmem>>, vector<64x256xf32>
    %c0_211 = arith.constant 0 : index
    %c0_212 = arith.constant 0 : index
    %352 = vector.load %arg14[%c0_211, %c0_212] : memref<64x256xf32, #tpu.memory_space<vmem>>, vector<8x256xf32>
    %c0_213 = arith.constant 0 : index
    %c0_214 = arith.constant 0 : index
    %353 = vector.load %arg17[%c0_213, %c0_214] : memref<8x64xf32, #tpu.memory_space<vmem>>, vector<8x64xf32>
    %cst_215 = arith.constant dense<0.000000e+00> : vector<8x256xf32>
    %354 = tpu.matmul %353, %351, %cst_215 {dimension_numbers = #tpu.dot_dimension_numbers<[1], [0], [0], [1], [0, 0, 1, 1], [], []>} : vector<8x64xf32>, vector<64x256xf32>, vector<8x256xf32> -> vector<8x256xf32>
    %355 = arith.addf %352, %354 : vector<8x256xf32>
    %356 = vector.extract_strided_slice %355 {offsets = [0, 0], sizes = [8, 64], strides = [1, 1]} : vector<8x256xf32> to vector<8x64xf32>
    %357 = arith.negf %356 : vector<8x64xf32>
    %358 = math.exp %357 : vector<8x64xf32>
    %cst_216 = arith.constant 1.000000e+00 : f32
    %359 = vector.broadcast %cst_216 : f32 to vector<8x64xf32>
    %360 = arith.addf %359, %358 : vector<8x64xf32>
    %361 = arith.divf %359, %360 : vector<8x64xf32>
    %362 = vector.extract_strided_slice %355 {offsets = [0, 64], sizes = [8, 64], strides = [1, 1]} : vector<8x256xf32> to vector<8x64xf32>
    %363 = arith.negf %362 : vector<8x64xf32>
    %364 = math.exp %363 : vector<8x64xf32>
    %cst_217 = arith.constant 1.000000e+00 : f32
    %365 = vector.broadcast %cst_217 : f32 to vector<8x64xf32>
    %366 = arith.addf %365, %364 : vector<8x64xf32>
    %367 = arith.divf %365, %366 : vector<8x64xf32>
    %368 = vector.extract_strided_slice %355 {offsets = [0, 128], sizes = [8, 64], strides = [1, 1]} : vector<8x256xf32> to vector<8x64xf32>
    %369 = math.tanh %368 : vector<8x64xf32>
    %370 = vector.extract_strided_slice %355 {offsets = [0, 192], sizes = [8, 64], strides = [1, 1]} : vector<8x256xf32> to vector<8x64xf32>
    %371 = arith.negf %370 : vector<8x64xf32>
    %372 = math.exp %371 : vector<8x64xf32>
    %cst_218 = arith.constant 1.000000e+00 : f32
    %373 = vector.broadcast %cst_218 : f32 to vector<8x64xf32>
    %374 = arith.addf %373, %372 : vector<8x64xf32>
    %375 = arith.divf %373, %374 : vector<8x64xf32>
    %c0_219 = arith.constant 0 : index
    %c0_220 = arith.constant 0 : index
    %376 = vector.load %arg18[%c0_219, %c0_220] : memref<8x64xf32, #tpu.memory_space<vmem>>, vector<8x64xf32>
    %377 = arith.mulf %367, %376 : vector<8x64xf32>
    %378 = arith.mulf %361, %369 : vector<8x64xf32>
    %379 = arith.addf %377, %378 : vector<8x64xf32>
    %380 = math.tanh %379 : vector<8x64xf32>
    %381 = arith.mulf %375, %380 : vector<8x64xf32>
    %c0_221 = arith.constant 0 : index
    %c0_222 = arith.constant 0 : index
    %382 = vector.load %arg18[%c0_221, %c0_222] : memref<8x64xf32, #tpu.memory_space<vmem>>, vector<8x64xf32>
    tpu.vector_store %arg18[%c0_221, %c0_222], %379 {strides = array<i32>} : memref<8x64xf32, #tpu.memory_space<vmem>>, vector<8x64xf32>,
    %c0_223 = arith.constant 0 : index
    %c0_224 = arith.constant 0 : index
    %383 = vector.load %arg17[%c0_223, %c0_224] : memref<8x64xf32, #tpu.memory_space<vmem>>, vector<8x64xf32>
    tpu.vector_store %arg17[%c0_223, %c0_224], %381 {strides = array<i32>} : memref<8x64xf32, #tpu.memory_space<vmem>>, vector<8x64xf32>,
    %384 = vector.extract_strided_slice %381 {offsets = [0, 0], sizes = [8, 32], strides = [1, 1]} : vector<8x64xf32> to vector<8x32xf32>
    %c0_225 = arith.constant 0 : index
    %c0_226 = arith.constant 0 : index
    %385 = vector.load %arg12[%c0_225, %c0_226] : memref<64x64xf32, #tpu.memory_space<vmem>>, vector<8x32xf32>
    tpu.vector_store %arg12[%c0_225, %c0_226], %384 {strides = array<i32>} : memref<64x64xf32, #tpu.memory_space<vmem>>, vector<8x32xf32>,
    %386 = vector.extract_strided_slice %381 {offsets = [0, 32], sizes = [8, 32], strides = [1, 1]} : vector<8x64xf32> to vector<8x32xf32>
    %c56_227 = arith.constant 56 : index
    %c32_228 = arith.constant 32 : index
    %387 = vector.load %arg12[%c56_227, %c32_228] : memref<64x64xf32, #tpu.memory_space<vmem>>, vector<8x32xf32>
    tpu.vector_store %arg12[%c56_227, %c32_228], %386 {strides = array<i32>} : memref<64x64xf32, #tpu.memory_space<vmem>>, vector<8x32xf32>,
    %c8_229 = arith.constant 8 : index
    %c0_230 = arith.constant 0 : index
    %388 = vector.load %arg14[%c8_229, %c0_230] : memref<64x256xf32, #tpu.memory_space<vmem>>, vector<8x256xf32>
    %c0_231 = arith.constant 0 : index
    %c0_232 = arith.constant 0 : index
    %389 = vector.load %arg17[%c0_231, %c0_232] : memref<8x64xf32, #tpu.memory_space<vmem>>, vector<8x64xf32>
    %cst_233 = arith.constant dense<0.000000e+00> : vector<8x256xf32>
    %390 = tpu.matmul %389, %351, %cst_233 {dimension_numbers = #tpu.dot_dimension_numbers<[1], [0], [0], [1], [0, 0, 1, 1], [], []>} : vector<8x64xf32>, vector<64x256xf32>, vector<8x256xf32> -> vector<8x256xf32>
    %391 = arith.addf %388, %390 : vector<8x256xf32>
    %392 = vector.extract_strided_slice %391 {offsets = [0, 0], sizes = [8, 64], strides = [1, 1]} : vector<8x256xf32> to vector<8x64xf32>
    %393 = arith.negf %392 : vector<8x64xf32>
    %394 = math.exp %393 : vector<8x64xf32>
    %cst_234 = arith.constant 1.000000e+00 : f32
    %395 = vector.broadcast %cst_234 : f32 to vector<8x64xf32>
    %396 = arith.addf %395, %394 : vector<8x64xf32>
    %397 = arith.divf %395, %396 : vector<8x64xf32>
    %398 = vector.extract_strided_slice %391 {offsets = [0, 64], sizes = [8, 64], strides = [1, 1]} : vector<8x256xf32> to vector<8x64xf32>
    %399 = arith.negf %398 : vector<8x64xf32>
    %400 = math.exp %399 : vector<8x64xf32>
    %cst_235 = arith.constant 1.000000e+00 : f32
    %401 = vector.broadcast %cst_235 : f32 to vector<8x64xf32>
    %402 = arith.addf %401, %400 : vector<8x64xf32>
    %403 = arith.divf %401, %402 : vector<8x64xf32>
    %404 = vector.extract_strided_slice %391 {offsets = [0, 128], sizes = [8, 64], strides = [1, 1]} : vector<8x256xf32> to vector<8x64xf32>
    %405 = math.tanh %404 : vector<8x64xf32>
    %406 = vector.extract_strided_slice %391 {offsets = [0, 192], sizes = [8, 64], strides = [1, 1]} : vector<8x256xf32> to vector<8x64xf32>
    %407 = arith.negf %406 : vector<8x64xf32>
    %408 = math.exp %407 : vector<8x64xf32>
    %cst_236 = arith.constant 1.000000e+00 : f32
    %409 = vector.broadcast %cst_236 : f32 to vector<8x64xf32>
    %410 = arith.addf %409, %408 : vector<8x64xf32>
    %411 = arith.divf %409, %410 : vector<8x64xf32>
    %c0_237 = arith.constant 0 : index
    %c0_238 = arith.constant 0 : index
    %412 = vector.load %arg18[%c0_237, %c0_238] : memref<8x64xf32, #tpu.memory_space<vmem>>, vector<8x64xf32>
    %413 = arith.mulf %403, %412 : vector<8x64xf32>
    %414 = arith.mulf %397, %405 : vector<8x64xf32>
    %415 = arith.addf %413, %414 : vector<8x64xf32>
    %416 = math.tanh %415 : vector<8x64xf32>
    %417 = arith.mulf %411, %416 : vector<8x64xf32>
    %c0_239 = arith.constant 0 : index
    %c0_240 = arith.constant 0 : index
    %418 = vector.load %arg18[%c0_239, %c0_240] : memref<8x64xf32, #tpu.memory_space<vmem>>, vector<8x64xf32>
    tpu.vector_store %arg18[%c0_239, %c0_240], %415 {strides = array<i32>} : memref<8x64xf32, #tpu.memory_space<vmem>>, vector<8x64xf32>,
    %c0_241 = arith.constant 0 : index
    %c0_242 = arith.constant 0 : index
    %419 = vector.load %arg17[%c0_241, %c0_242] : memref<8x64xf32, #tpu.memory_space<vmem>>, vector<8x64xf32>
    tpu.vector_store %arg17[%c0_241, %c0_242], %417 {strides = array<i32>} : memref<8x64xf32, #tpu.memory_space<vmem>>, vector<8x64xf32>,
    %420 = vector.extract_strided_slice %417 {offsets = [0, 0], sizes = [8, 32], strides = [1, 1]} : vector<8x64xf32> to vector<8x32xf32>
    %c8_243 = arith.constant 8 : index
    %c0_244 = arith.constant 0 : index
    %421 = vector.load %arg12[%c8_243, %c0_244] : memref<64x64xf32, #tpu.memory_space<vmem>>, vector<8x32xf32>
    tpu.vector_store %arg12[%c8_243, %c0_244], %420 {strides = array<i32>} : memref<64x64xf32, #tpu.memory_space<vmem>>, vector<8x32xf32>,
    %422 = vector.extract_strided_slice %417 {offsets = [0, 32], sizes = [8, 32], strides = [1, 1]} : vector<8x64xf32> to vector<8x32xf32>
    %c48_245 = arith.constant 48 : index
    %c32_246 = arith.constant 32 : index
    %423 = vector.load %arg12[%c48_245, %c32_246] : memref<64x64xf32, #tpu.memory_space<vmem>>, vector<8x32xf32>
    tpu.vector_store %arg12[%c48_245, %c32_246], %422 {strides = array<i32>} : memref<64x64xf32, #tpu.memory_space<vmem>>, vector<8x32xf32>,
    %c16_247 = arith.constant 16 : index
    %c0_248 = arith.constant 0 : index
    %424 = vector.load %arg14[%c16_247, %c0_248] : memref<64x256xf32, #tpu.memory_space<vmem>>, vector<8x256xf32>
    %c0_249 = arith.constant 0 : index
    %c0_250 = arith.constant 0 : index
    %425 = vector.load %arg17[%c0_249, %c0_250] : memref<8x64xf32, #tpu.memory_space<vmem>>, vector<8x64xf32>
    %cst_251 = arith.constant dense<0.000000e+00> : vector<8x256xf32>
    %426 = tpu.matmul %425, %351, %cst_251 {dimension_numbers = #tpu.dot_dimension_numbers<[1], [0], [0], [1], [0, 0, 1, 1], [], []>} : vector<8x64xf32>, vector<64x256xf32>, vector<8x256xf32> -> vector<8x256xf32>
    %427 = arith.addf %424, %426 : vector<8x256xf32>
    %428 = vector.extract_strided_slice %427 {offsets = [0, 0], sizes = [8, 64], strides = [1, 1]} : vector<8x256xf32> to vector<8x64xf32>
    %429 = arith.negf %428 : vector<8x64xf32>
    %430 = math.exp %429 : vector<8x64xf32>
    %cst_252 = arith.constant 1.000000e+00 : f32
    %431 = vector.broadcast %cst_252 : f32 to vector<8x64xf32>
    %432 = arith.addf %431, %430 : vector<8x64xf32>
    %433 = arith.divf %431, %432 : vector<8x64xf32>
    %434 = vector.extract_strided_slice %427 {offsets = [0, 64], sizes = [8, 64], strides = [1, 1]} : vector<8x256xf32> to vector<8x64xf32>
    %435 = arith.negf %434 : vector<8x64xf32>
    %436 = math.exp %435 : vector<8x64xf32>
    %cst_253 = arith.constant 1.000000e+00 : f32
    %437 = vector.broadcast %cst_253 : f32 to vector<8x64xf32>
    %438 = arith.addf %437, %436 : vector<8x64xf32>
    %439 = arith.divf %437, %438 : vector<8x64xf32>
    %440 = vector.extract_strided_slice %427 {offsets = [0, 128], sizes = [8, 64], strides = [1, 1]} : vector<8x256xf32> to vector<8x64xf32>
    %441 = math.tanh %440 : vector<8x64xf32>
    %442 = vector.extract_strided_slice %427 {offsets = [0, 192], sizes = [8, 64], strides = [1, 1]} : vector<8x256xf32> to vector<8x64xf32>
    %443 = arith.negf %442 : vector<8x64xf32>
    %444 = math.exp %443 : vector<8x64xf32>
    %cst_254 = arith.constant 1.000000e+00 : f32
    %445 = vector.broadcast %cst_254 : f32 to vector<8x64xf32>
    %446 = arith.addf %445, %444 : vector<8x64xf32>
    %447 = arith.divf %445, %446 : vector<8x64xf32>
    %c0_255 = arith.constant 0 : index
    %c0_256 = arith.constant 0 : index
    %448 = vector.load %arg18[%c0_255, %c0_256] : memref<8x64xf32, #tpu.memory_space<vmem>>, vector<8x64xf32>
    %449 = arith.mulf %439, %448 : vector<8x64xf32>
    %450 = arith.mulf %433, %441 : vector<8x64xf32>
    %451 = arith.addf %449, %450 : vector<8x64xf32>
    %452 = math.tanh %451 : vector<8x64xf32>
    %453 = arith.mulf %447, %452 : vector<8x64xf32>
    %c0_257 = arith.constant 0 : index
    %c0_258 = arith.constant 0 : index
    %454 = vector.load %arg18[%c0_257, %c0_258] : memref<8x64xf32, #tpu.memory_space<vmem>>, vector<8x64xf32>
    tpu.vector_store %arg18[%c0_257, %c0_258], %451 {strides = array<i32>} : memref<8x64xf32, #tpu.memory_space<vmem>>, vector<8x64xf32>,
    %c0_259 = arith.constant 0 : index
    %c0_260 = arith.constant 0 : index
    %455 = vector.load %arg17[%c0_259, %c0_260] : memref<8x64xf32, #tpu.memory_space<vmem>>, vector<8x64xf32>
    tpu.vector_store %arg17[%c0_259, %c0_260], %453 {strides = array<i32>} : memref<8x64xf32, #tpu.memory_space<vmem>>, vector<8x64xf32>,
    %456 = vector.extract_strided_slice %453 {offsets = [0, 0], sizes = [8, 32], strides = [1, 1]} : vector<8x64xf32> to vector<8x32xf32>
    %c16_261 = arith.constant 16 : index
    %c0_262 = arith.constant 0 : index
    %457 = vector.load %arg12[%c16_261, %c0_262] : memref<64x64xf32, #tpu.memory_space<vmem>>, vector<8x32xf32>
    tpu.vector_store %arg12[%c16_261, %c0_262], %456 {strides = array<i32>} : memref<64x64xf32, #tpu.memory_space<vmem>>, vector<8x32xf32>,
    %458 = vector.extract_strided_slice %453 {offsets = [0, 32], sizes = [8, 32], strides = [1, 1]} : vector<8x64xf32> to vector<8x32xf32>
    %c40_263 = arith.constant 40 : index
    %c32_264 = arith.constant 32 : index
    %459 = vector.load %arg12[%c40_263, %c32_264] : memref<64x64xf32, #tpu.memory_space<vmem>>, vector<8x32xf32>
    tpu.vector_store %arg12[%c40_263, %c32_264], %458 {strides = array<i32>} : memref<64x64xf32, #tpu.memory_space<vmem>>, vector<8x32xf32>,
    %c24_265 = arith.constant 24 : index
    %c0_266 = arith.constant 0 : index
    %460 = vector.load %arg14[%c24_265, %c0_266] : memref<64x256xf32, #tpu.memory_space<vmem>>, vector<8x256xf32>
    %c0_267 = arith.constant 0 : index
    %c0_268 = arith.constant 0 : index
    %461 = vector.load %arg17[%c0_267, %c0_268] : memref<8x64xf32, #tpu.memory_space<vmem>>, vector<8x64xf32>
    %cst_269 = arith.constant dense<0.000000e+00> : vector<8x256xf32>
    %462 = tpu.matmul %461, %351, %cst_269 {dimension_numbers = #tpu.dot_dimension_numbers<[1], [0], [0], [1], [0, 0, 1, 1], [], []>} : vector<8x64xf32>, vector<64x256xf32>, vector<8x256xf32> -> vector<8x256xf32>
    %463 = arith.addf %460, %462 : vector<8x256xf32>
    %464 = vector.extract_strided_slice %463 {offsets = [0, 0], sizes = [8, 64], strides = [1, 1]} : vector<8x256xf32> to vector<8x64xf32>
    %465 = arith.negf %464 : vector<8x64xf32>
    %466 = math.exp %465 : vector<8x64xf32>
    %cst_270 = arith.constant 1.000000e+00 : f32
    %467 = vector.broadcast %cst_270 : f32 to vector<8x64xf32>
    %468 = arith.addf %467, %466 : vector<8x64xf32>
    %469 = arith.divf %467, %468 : vector<8x64xf32>
    %470 = vector.extract_strided_slice %463 {offsets = [0, 64], sizes = [8, 64], strides = [1, 1]} : vector<8x256xf32> to vector<8x64xf32>
    %471 = arith.negf %470 : vector<8x64xf32>
    %472 = math.exp %471 : vector<8x64xf32>
    %cst_271 = arith.constant 1.000000e+00 : f32
    %473 = vector.broadcast %cst_271 : f32 to vector<8x64xf32>
    %474 = arith.addf %473, %472 : vector<8x64xf32>
    %475 = arith.divf %473, %474 : vector<8x64xf32>
    %476 = vector.extract_strided_slice %463 {offsets = [0, 128], sizes = [8, 64], strides = [1, 1]} : vector<8x256xf32> to vector<8x64xf32>
    %477 = math.tanh %476 : vector<8x64xf32>
    %478 = vector.extract_strided_slice %463 {offsets = [0, 192], sizes = [8, 64], strides = [1, 1]} : vector<8x256xf32> to vector<8x64xf32>
    %479 = arith.negf %478 : vector<8x64xf32>
    %480 = math.exp %479 : vector<8x64xf32>
    %cst_272 = arith.constant 1.000000e+00 : f32
    %481 = vector.broadcast %cst_272 : f32 to vector<8x64xf32>
    %482 = arith.addf %481, %480 : vector<8x64xf32>
    %483 = arith.divf %481, %482 : vector<8x64xf32>
    %c0_273 = arith.constant 0 : index
    %c0_274 = arith.constant 0 : index
    %484 = vector.load %arg18[%c0_273, %c0_274] : memref<8x64xf32, #tpu.memory_space<vmem>>, vector<8x64xf32>
    %485 = arith.mulf %475, %484 : vector<8x64xf32>
    %486 = arith.mulf %469, %477 : vector<8x64xf32>
    %487 = arith.addf %485, %486 : vector<8x64xf32>
    %488 = math.tanh %487 : vector<8x64xf32>
    %489 = arith.mulf %483, %488 : vector<8x64xf32>
    %c0_275 = arith.constant 0 : index
    %c0_276 = arith.constant 0 : index
    %490 = vector.load %arg18[%c0_275, %c0_276] : memref<8x64xf32, #tpu.memory_space<vmem>>, vector<8x64xf32>
    tpu.vector_store %arg18[%c0_275, %c0_276], %487 {strides = array<i32>} : memref<8x64xf32, #tpu.memory_space<vmem>>, vector<8x64xf32>,
    %c0_277 = arith.constant 0 : index
    %c0_278 = arith.constant 0 : index
    %491 = vector.load %arg17[%c0_277, %c0_278] : memref<8x64xf32, #tpu.memory_space<vmem>>, vector<8x64xf32>
    tpu.vector_store %arg17[%c0_277, %c0_278], %489 {strides = array<i32>} : memref<8x64xf32, #tpu.memory_space<vmem>>, vector<8x64xf32>,
    %492 = vector.extract_strided_slice %489 {offsets = [0, 0], sizes = [8, 32], strides = [1, 1]} : vector<8x64xf32> to vector<8x32xf32>
    %c24_279 = arith.constant 24 : index
    %c0_280 = arith.constant 0 : index
    %493 = vector.load %arg12[%c24_279, %c0_280] : memref<64x64xf32, #tpu.memory_space<vmem>>, vector<8x32xf32>
    tpu.vector_store %arg12[%c24_279, %c0_280], %492 {strides = array<i32>} : memref<64x64xf32, #tpu.memory_space<vmem>>, vector<8x32xf32>,
    %494 = vector.extract_strided_slice %489 {offsets = [0, 32], sizes = [8, 32], strides = [1, 1]} : vector<8x64xf32> to vector<8x32xf32>
    %c32_281 = arith.constant 32 : index
    %c32_282 = arith.constant 32 : index
    %495 = vector.load %arg12[%c32_281, %c32_282] : memref<64x64xf32, #tpu.memory_space<vmem>>, vector<8x32xf32>
    tpu.vector_store %arg12[%c32_281, %c32_282], %494 {strides = array<i32>} : memref<64x64xf32, #tpu.memory_space<vmem>>, vector<8x32xf32>,
    %c32_283 = arith.constant 32 : index
    %c0_284 = arith.constant 0 : index
    %496 = vector.load %arg14[%c32_283, %c0_284] : memref<64x256xf32, #tpu.memory_space<vmem>>, vector<8x256xf32>
    %c0_285 = arith.constant 0 : index
    %c0_286 = arith.constant 0 : index
    %497 = vector.load %arg17[%c0_285, %c0_286] : memref<8x64xf32, #tpu.memory_space<vmem>>, vector<8x64xf32>
    %cst_287 = arith.constant dense<0.000000e+00> : vector<8x256xf32>
    %498 = tpu.matmul %497, %351, %cst_287 {dimension_numbers = #tpu.dot_dimension_numbers<[1], [0], [0], [1], [0, 0, 1, 1], [], []>} : vector<8x64xf32>, vector<64x256xf32>, vector<8x256xf32> -> vector<8x256xf32>
    %499 = arith.addf %496, %498 : vector<8x256xf32>
    %500 = vector.extract_strided_slice %499 {offsets = [0, 0], sizes = [8, 64], strides = [1, 1]} : vector<8x256xf32> to vector<8x64xf32>
    %501 = arith.negf %500 : vector<8x64xf32>
    %502 = math.exp %501 : vector<8x64xf32>
    %cst_288 = arith.constant 1.000000e+00 : f32
    %503 = vector.broadcast %cst_288 : f32 to vector<8x64xf32>
    %504 = arith.addf %503, %502 : vector<8x64xf32>
    %505 = arith.divf %503, %504 : vector<8x64xf32>
    %506 = vector.extract_strided_slice %499 {offsets = [0, 64], sizes = [8, 64], strides = [1, 1]} : vector<8x256xf32> to vector<8x64xf32>
    %507 = arith.negf %506 : vector<8x64xf32>
    %508 = math.exp %507 : vector<8x64xf32>
    %cst_289 = arith.constant 1.000000e+00 : f32
    %509 = vector.broadcast %cst_289 : f32 to vector<8x64xf32>
    %510 = arith.addf %509, %508 : vector<8x64xf32>
    %511 = arith.divf %509, %510 : vector<8x64xf32>
    %512 = vector.extract_strided_slice %499 {offsets = [0, 128], sizes = [8, 64], strides = [1, 1]} : vector<8x256xf32> to vector<8x64xf32>
    %513 = math.tanh %512 : vector<8x64xf32>
    %514 = vector.extract_strided_slice %499 {offsets = [0, 192], sizes = [8, 64], strides = [1, 1]} : vector<8x256xf32> to vector<8x64xf32>
    %515 = arith.negf %514 : vector<8x64xf32>
    %516 = math.exp %515 : vector<8x64xf32>
    %cst_290 = arith.constant 1.000000e+00 : f32
    %517 = vector.broadcast %cst_290 : f32 to vector<8x64xf32>
    %518 = arith.addf %517, %516 : vector<8x64xf32>
    %519 = arith.divf %517, %518 : vector<8x64xf32>
    %c0_291 = arith.constant 0 : index
    %c0_292 = arith.constant 0 : index
    %520 = vector.load %arg18[%c0_291, %c0_292] : memref<8x64xf32, #tpu.memory_space<vmem>>, vector<8x64xf32>
    %521 = arith.mulf %511, %520 : vector<8x64xf32>
    %522 = arith.mulf %505, %513 : vector<8x64xf32>
    %523 = arith.addf %521, %522 : vector<8x64xf32>
    %524 = math.tanh %523 : vector<8x64xf32>
    %525 = arith.mulf %519, %524 : vector<8x64xf32>
    %c0_293 = arith.constant 0 : index
    %c0_294 = arith.constant 0 : index
    %526 = vector.load %arg18[%c0_293, %c0_294] : memref<8x64xf32, #tpu.memory_space<vmem>>, vector<8x64xf32>
    tpu.vector_store %arg18[%c0_293, %c0_294], %523 {strides = array<i32>} : memref<8x64xf32, #tpu.memory_space<vmem>>, vector<8x64xf32>,
    %c0_295 = arith.constant 0 : index
    %c0_296 = arith.constant 0 : index
    %527 = vector.load %arg17[%c0_295, %c0_296] : memref<8x64xf32, #tpu.memory_space<vmem>>, vector<8x64xf32>
    tpu.vector_store %arg17[%c0_295, %c0_296], %525 {strides = array<i32>} : memref<8x64xf32, #tpu.memory_space<vmem>>, vector<8x64xf32>,
    %528 = vector.extract_strided_slice %525 {offsets = [0, 0], sizes = [8, 32], strides = [1, 1]} : vector<8x64xf32> to vector<8x32xf32>
    %c32_297 = arith.constant 32 : index
    %c0_298 = arith.constant 0 : index
    %529 = vector.load %arg12[%c32_297, %c0_298] : memref<64x64xf32, #tpu.memory_space<vmem>>, vector<8x32xf32>
    tpu.vector_store %arg12[%c32_297, %c0_298], %528 {strides = array<i32>} : memref<64x64xf32, #tpu.memory_space<vmem>>, vector<8x32xf32>,
    %530 = vector.extract_strided_slice %525 {offsets = [0, 32], sizes = [8, 32], strides = [1, 1]} : vector<8x64xf32> to vector<8x32xf32>
    %c24_299 = arith.constant 24 : index
    %c32_300 = arith.constant 32 : index
    %531 = vector.load %arg12[%c24_299, %c32_300] : memref<64x64xf32, #tpu.memory_space<vmem>>, vector<8x32xf32>
    tpu.vector_store %arg12[%c24_299, %c32_300], %530 {strides = array<i32>} : memref<64x64xf32, #tpu.memory_space<vmem>>, vector<8x32xf32>,
    %c40_301 = arith.constant 40 : index
    %c0_302 = arith.constant 0 : index
    %532 = vector.load %arg14[%c40_301, %c0_302] : memref<64x256xf32, #tpu.memory_space<vmem>>, vector<8x256xf32>
    %c0_303 = arith.constant 0 : index
    %c0_304 = arith.constant 0 : index
    %533 = vector.load %arg17[%c0_303, %c0_304] : memref<8x64xf32, #tpu.memory_space<vmem>>, vector<8x64xf32>
    %cst_305 = arith.constant dense<0.000000e+00> : vector<8x256xf32>
    %534 = tpu.matmul %533, %351, %cst_305 {dimension_numbers = #tpu.dot_dimension_numbers<[1], [0], [0], [1], [0, 0, 1, 1], [], []>} : vector<8x64xf32>, vector<64x256xf32>, vector<8x256xf32> -> vector<8x256xf32>
    %535 = arith.addf %532, %534 : vector<8x256xf32>
    %536 = vector.extract_strided_slice %535 {offsets = [0, 0], sizes = [8, 64], strides = [1, 1]} : vector<8x256xf32> to vector<8x64xf32>
    %537 = arith.negf %536 : vector<8x64xf32>
    %538 = math.exp %537 : vector<8x64xf32>
    %cst_306 = arith.constant 1.000000e+00 : f32
    %539 = vector.broadcast %cst_306 : f32 to vector<8x64xf32>
    %540 = arith.addf %539, %538 : vector<8x64xf32>
    %541 = arith.divf %539, %540 : vector<8x64xf32>
    %542 = vector.extract_strided_slice %535 {offsets = [0, 64], sizes = [8, 64], strides = [1, 1]} : vector<8x256xf32> to vector<8x64xf32>
    %543 = arith.negf %542 : vector<8x64xf32>
    %544 = math.exp %543 : vector<8x64xf32>
    %cst_307 = arith.constant 1.000000e+00 : f32
    %545 = vector.broadcast %cst_307 : f32 to vector<8x64xf32>
    %546 = arith.addf %545, %544 : vector<8x64xf32>
    %547 = arith.divf %545, %546 : vector<8x64xf32>
    %548 = vector.extract_strided_slice %535 {offsets = [0, 128], sizes = [8, 64], strides = [1, 1]} : vector<8x256xf32> to vector<8x64xf32>
    %549 = math.tanh %548 : vector<8x64xf32>
    %550 = vector.extract_strided_slice %535 {offsets = [0, 192], sizes = [8, 64], strides = [1, 1]} : vector<8x256xf32> to vector<8x64xf32>
    %551 = arith.negf %550 : vector<8x64xf32>
    %552 = math.exp %551 : vector<8x64xf32>
    %cst_308 = arith.constant 1.000000e+00 : f32
    %553 = vector.broadcast %cst_308 : f32 to vector<8x64xf32>
    %554 = arith.addf %553, %552 : vector<8x64xf32>
    %555 = arith.divf %553, %554 : vector<8x64xf32>
    %c0_309 = arith.constant 0 : index
    %c0_310 = arith.constant 0 : index
    %556 = vector.load %arg18[%c0_309, %c0_310] : memref<8x64xf32, #tpu.memory_space<vmem>>, vector<8x64xf32>
    %557 = arith.mulf %547, %556 : vector<8x64xf32>
    %558 = arith.mulf %541, %549 : vector<8x64xf32>
    %559 = arith.addf %557, %558 : vector<8x64xf32>
    %560 = math.tanh %559 : vector<8x64xf32>
    %561 = arith.mulf %555, %560 : vector<8x64xf32>
    %c0_311 = arith.constant 0 : index
    %c0_312 = arith.constant 0 : index
    %562 = vector.load %arg18[%c0_311, %c0_312] : memref<8x64xf32, #tpu.memory_space<vmem>>, vector<8x64xf32>
    tpu.vector_store %arg18[%c0_311, %c0_312], %559 {strides = array<i32>} : memref<8x64xf32, #tpu.memory_space<vmem>>, vector<8x64xf32>,
    %c0_313 = arith.constant 0 : index
    %c0_314 = arith.constant 0 : index
    %563 = vector.load %arg17[%c0_313, %c0_314] : memref<8x64xf32, #tpu.memory_space<vmem>>, vector<8x64xf32>
    tpu.vector_store %arg17[%c0_313, %c0_314], %561 {strides = array<i32>} : memref<8x64xf32, #tpu.memory_space<vmem>>, vector<8x64xf32>,
    %564 = vector.extract_strided_slice %561 {offsets = [0, 0], sizes = [8, 32], strides = [1, 1]} : vector<8x64xf32> to vector<8x32xf32>
    %c40_315 = arith.constant 40 : index
    %c0_316 = arith.constant 0 : index
    %565 = vector.load %arg12[%c40_315, %c0_316] : memref<64x64xf32, #tpu.memory_space<vmem>>, vector<8x32xf32>
    tpu.vector_store %arg12[%c40_315, %c0_316], %564 {strides = array<i32>} : memref<64x64xf32, #tpu.memory_space<vmem>>, vector<8x32xf32>,
    %566 = vector.extract_strided_slice %561 {offsets = [0, 32], sizes = [8, 32], strides = [1, 1]} : vector<8x64xf32> to vector<8x32xf32>
    %c16_317 = arith.constant 16 : index
    %c32_318 = arith.constant 32 : index
    %567 = vector.load %arg12[%c16_317, %c32_318] : memref<64x64xf32, #tpu.memory_space<vmem>>, vector<8x32xf32>
    tpu.vector_store %arg12[%c16_317, %c32_318], %566 {strides = array<i32>} : memref<64x64xf32, #tpu.memory_space<vmem>>, vector<8x32xf32>,
    %c48_319 = arith.constant 48 : index
    %c0_320 = arith.constant 0 : index
    %568 = vector.load %arg14[%c48_319, %c0_320] : memref<64x256xf32, #tpu.memory_space<vmem>>, vector<8x256xf32>
    %c0_321 = arith.constant 0 : index
    %c0_322 = arith.constant 0 : index
    %569 = vector.load %arg17[%c0_321, %c0_322] : memref<8x64xf32, #tpu.memory_space<vmem>>, vector<8x64xf32>
    %cst_323 = arith.constant dense<0.000000e+00> : vector<8x256xf32>
    %570 = tpu.matmul %569, %351, %cst_323 {dimension_numbers = #tpu.dot_dimension_numbers<[1], [0], [0], [1], [0, 0, 1, 1], [], []>} : vector<8x64xf32>, vector<64x256xf32>, vector<8x256xf32> -> vector<8x256xf32>
    %571 = arith.addf %568, %570 : vector<8x256xf32>
    %572 = vector.extract_strided_slice %571 {offsets = [0, 0], sizes = [8, 64], strides = [1, 1]} : vector<8x256xf32> to vector<8x64xf32>
    %573 = arith.negf %572 : vector<8x64xf32>
    %574 = math.exp %573 : vector<8x64xf32>
    %cst_324 = arith.constant 1.000000e+00 : f32
    %575 = vector.broadcast %cst_324 : f32 to vector<8x64xf32>
    %576 = arith.addf %575, %574 : vector<8x64xf32>
    %577 = arith.divf %575, %576 : vector<8x64xf32>
    %578 = vector.extract_strided_slice %571 {offsets = [0, 64], sizes = [8, 64], strides = [1, 1]} : vector<8x256xf32> to vector<8x64xf32>
    %579 = arith.negf %578 : vector<8x64xf32>
    %580 = math.exp %579 : vector<8x64xf32>
    %cst_325 = arith.constant 1.000000e+00 : f32
    %581 = vector.broadcast %cst_325 : f32 to vector<8x64xf32>
    %582 = arith.addf %581, %580 : vector<8x64xf32>
    %583 = arith.divf %581, %582 : vector<8x64xf32>
    %584 = vector.extract_strided_slice %571 {offsets = [0, 128], sizes = [8, 64], strides = [1, 1]} : vector<8x256xf32> to vector<8x64xf32>
    %585 = math.tanh %584 : vector<8x64xf32>
    %586 = vector.extract_strided_slice %571 {offsets = [0, 192], sizes = [8, 64], strides = [1, 1]} : vector<8x256xf32> to vector<8x64xf32>
    %587 = arith.negf %586 : vector<8x64xf32>
    %588 = math.exp %587 : vector<8x64xf32>
    %cst_326 = arith.constant 1.000000e+00 : f32
    %589 = vector.broadcast %cst_326 : f32 to vector<8x64xf32>
    %590 = arith.addf %589, %588 : vector<8x64xf32>
    %591 = arith.divf %589, %590 : vector<8x64xf32>
    %c0_327 = arith.constant 0 : index
    %c0_328 = arith.constant 0 : index
    %592 = vector.load %arg18[%c0_327, %c0_328] : memref<8x64xf32, #tpu.memory_space<vmem>>, vector<8x64xf32>
    %593 = arith.mulf %583, %592 : vector<8x64xf32>
    %594 = arith.mulf %577, %585 : vector<8x64xf32>
    %595 = arith.addf %593, %594 : vector<8x64xf32>
    %596 = math.tanh %595 : vector<8x64xf32>
    %597 = arith.mulf %591, %596 : vector<8x64xf32>
    %c0_329 = arith.constant 0 : index
    %c0_330 = arith.constant 0 : index
    %598 = vector.load %arg18[%c0_329, %c0_330] : memref<8x64xf32, #tpu.memory_space<vmem>>, vector<8x64xf32>
    tpu.vector_store %arg18[%c0_329, %c0_330], %595 {strides = array<i32>} : memref<8x64xf32, #tpu.memory_space<vmem>>, vector<8x64xf32>,
    %c0_331 = arith.constant 0 : index
    %c0_332 = arith.constant 0 : index
    %599 = vector.load %arg17[%c0_331, %c0_332] : memref<8x64xf32, #tpu.memory_space<vmem>>, vector<8x64xf32>
    tpu.vector_store %arg17[%c0_331, %c0_332], %597 {strides = array<i32>} : memref<8x64xf32, #tpu.memory_space<vmem>>, vector<8x64xf32>,
    %600 = vector.extract_strided_slice %597 {offsets = [0, 0], sizes = [8, 32], strides = [1, 1]} : vector<8x64xf32> to vector<8x32xf32>
    %c48_333 = arith.constant 48 : index
    %c0_334 = arith.constant 0 : index
    %601 = vector.load %arg12[%c48_333, %c0_334] : memref<64x64xf32, #tpu.memory_space<vmem>>, vector<8x32xf32>
    tpu.vector_store %arg12[%c48_333, %c0_334], %600 {strides = array<i32>} : memref<64x64xf32, #tpu.memory_space<vmem>>, vector<8x32xf32>,
    %602 = vector.extract_strided_slice %597 {offsets = [0, 32], sizes = [8, 32], strides = [1, 1]} : vector<8x64xf32> to vector<8x32xf32>
    %c8_335 = arith.constant 8 : index
    %c32_336 = arith.constant 32 : index
    %603 = vector.load %arg12[%c8_335, %c32_336] : memref<64x64xf32, #tpu.memory_space<vmem>>, vector<8x32xf32>
    tpu.vector_store %arg12[%c8_335, %c32_336], %602 {strides = array<i32>} : memref<64x64xf32, #tpu.memory_space<vmem>>, vector<8x32xf32>,
    %c56_337 = arith.constant 56 : index
    %c0_338 = arith.constant 0 : index
    %604 = vector.load %arg14[%c56_337, %c0_338] : memref<64x256xf32, #tpu.memory_space<vmem>>, vector<8x256xf32>
    %c0_339 = arith.constant 0 : index
    %c0_340 = arith.constant 0 : index
    %605 = vector.load %arg17[%c0_339, %c0_340] : memref<8x64xf32, #tpu.memory_space<vmem>>, vector<8x64xf32>
    %cst_341 = arith.constant dense<0.000000e+00> : vector<8x256xf32>
    %606 = tpu.matmul %605, %351, %cst_341 {dimension_numbers = #tpu.dot_dimension_numbers<[1], [0], [0], [1], [0, 0, 1, 1], [], []>} : vector<8x64xf32>, vector<64x256xf32>, vector<8x256xf32> -> vector<8x256xf32>
    %607 = arith.addf %604, %606 : vector<8x256xf32>
    %608 = vector.extract_strided_slice %607 {offsets = [0, 0], sizes = [8, 64], strides = [1, 1]} : vector<8x256xf32> to vector<8x64xf32>
    %609 = arith.negf %608 : vector<8x64xf32>
    %610 = math.exp %609 : vector<8x64xf32>
    %cst_342 = arith.constant 1.000000e+00 : f32
    %611 = vector.broadcast %cst_342 : f32 to vector<8x64xf32>
    %612 = arith.addf %611, %610 : vector<8x64xf32>
    %613 = arith.divf %611, %612 : vector<8x64xf32>
    %614 = vector.extract_strided_slice %607 {offsets = [0, 64], sizes = [8, 64], strides = [1, 1]} : vector<8x256xf32> to vector<8x64xf32>
    %615 = arith.negf %614 : vector<8x64xf32>
    %616 = math.exp %615 : vector<8x64xf32>
    %cst_343 = arith.constant 1.000000e+00 : f32
    %617 = vector.broadcast %cst_343 : f32 to vector<8x64xf32>
    %618 = arith.addf %617, %616 : vector<8x64xf32>
    %619 = arith.divf %617, %618 : vector<8x64xf32>
    %620 = vector.extract_strided_slice %607 {offsets = [0, 128], sizes = [8, 64], strides = [1, 1]} : vector<8x256xf32> to vector<8x64xf32>
    %621 = math.tanh %620 : vector<8x64xf32>
    %622 = vector.extract_strided_slice %607 {offsets = [0, 192], sizes = [8, 64], strides = [1, 1]} : vector<8x256xf32> to vector<8x64xf32>
    %623 = arith.negf %622 : vector<8x64xf32>
    %624 = math.exp %623 : vector<8x64xf32>
    %cst_344 = arith.constant 1.000000e+00 : f32
    %625 = vector.broadcast %cst_344 : f32 to vector<8x64xf32>
    %626 = arith.addf %625, %624 : vector<8x64xf32>
    %627 = arith.divf %625, %626 : vector<8x64xf32>
    %c0_345 = arith.constant 0 : index
    %c0_346 = arith.constant 0 : index
    %628 = vector.load %arg18[%c0_345, %c0_346] : memref<8x64xf32, #tpu.memory_space<vmem>>, vector<8x64xf32>
    %629 = arith.mulf %619, %628 : vector<8x64xf32>
    %630 = arith.mulf %613, %621 : vector<8x64xf32>
    %631 = arith.addf %629, %630 : vector<8x64xf32>
    %632 = math.tanh %631 : vector<8x64xf32>
    %633 = arith.mulf %627, %632 : vector<8x64xf32>
    %c0_347 = arith.constant 0 : index
    %c0_348 = arith.constant 0 : index
    %634 = vector.load %arg18[%c0_347, %c0_348] : memref<8x64xf32, #tpu.memory_space<vmem>>, vector<8x64xf32>
    tpu.vector_store %arg18[%c0_347, %c0_348], %631 {strides = array<i32>} : memref<8x64xf32, #tpu.memory_space<vmem>>, vector<8x64xf32>,
    %c0_349 = arith.constant 0 : index
    %c0_350 = arith.constant 0 : index
    %635 = vector.load %arg17[%c0_349, %c0_350] : memref<8x64xf32, #tpu.memory_space<vmem>>, vector<8x64xf32>
    tpu.vector_store %arg17[%c0_349, %c0_350], %633 {strides = array<i32>} : memref<8x64xf32, #tpu.memory_space<vmem>>, vector<8x64xf32>,
    %636 = vector.extract_strided_slice %633 {offsets = [0, 0], sizes = [8, 32], strides = [1, 1]} : vector<8x64xf32> to vector<8x32xf32>
    %c56_351 = arith.constant 56 : index
    %c0_352 = arith.constant 0 : index
    %637 = vector.load %arg12[%c56_351, %c0_352] : memref<64x64xf32, #tpu.memory_space<vmem>>, vector<8x32xf32>
    tpu.vector_store %arg12[%c56_351, %c0_352], %636 {strides = array<i32>} : memref<64x64xf32, #tpu.memory_space<vmem>>, vector<8x32xf32>,
    %638 = vector.extract_strided_slice %633 {offsets = [0, 32], sizes = [8, 32], strides = [1, 1]} : vector<8x64xf32> to vector<8x32xf32>
    %c0_353 = arith.constant 0 : index
    %c32_354 = arith.constant 32 : index
    %639 = vector.load %arg12[%c0_353, %c32_354] : memref<64x64xf32, #tpu.memory_space<vmem>>, vector<8x32xf32>
    tpu.vector_store %arg12[%c0_353, %c32_354], %638 {strides = array<i32>} : memref<64x64xf32, #tpu.memory_space<vmem>>, vector<8x32xf32>,
    %c0_355 = arith.constant 0 : index
    %c0_356 = arith.constant 0 : index
    %640 = vector.load %arg12[%c0_355, %c0_356] : memref<64x64xf32, #tpu.memory_space<vmem>>, vector<64x64xf32>
    %c0_357 = arith.constant 0 : index
    %c0_358 = arith.constant 0 : index
    %641 = vector.load %arg10[%c0_357, %c0_358] : memref<64x16xf32, #tpu.memory_space<vmem>>, vector<64x16xf32>
    %cst_359 = arith.constant dense<0.000000e+00> : vector<64x16xf32>
    %642 = tpu.matmul %640, %641, %cst_359 {dimension_numbers = #tpu.dot_dimension_numbers<[1], [0], [0], [1], [0, 0, 1, 1], [], []>} : vector<64x64xf32>, vector<64x16xf32>, vector<64x16xf32> -> vector<64x16xf32>
    %643 = math.tanh %642 : vector<64x16xf32>
    %c0_360 = arith.constant 0 : index
    %c0_361 = arith.constant 0 : index
    %644 = vector.load %arg11[%c0_360, %c0_361] : memref<16x4xf32, #tpu.memory_space<vmem>>, vector<16x4xf32>
    %cst_362 = arith.constant dense<0.000000e+00> : vector<64x4xf32>
    %645 = tpu.matmul %643, %644, %cst_362 {dimension_numbers = #tpu.dot_dimension_numbers<[1], [0], [0], [1], [0, 0, 1, 1], [], []>} : vector<64x16xf32>, vector<16x4xf32>, vector<64x4xf32> -> vector<64x4xf32>
    %cst_363 = arith.constant dense<0xFF800000> : vector<64xf32>
    %646 = vector.multi_reduction <maximumf>, %645, %cst_363 [1] : vector<64x4xf32> to vector<64xf32>
    %647 = vector.shape_cast %646 : vector<64xf32> to vector<64x1xf32>
    %648 = vector.broadcast %647 : vector<64x1xf32> to vector<64x4xf32>
    %649 = arith.subf %645, %648 : vector<64x4xf32>
    %650 = math.exp %649 : vector<64x4xf32>
    %cst_364 = arith.constant dense<0.000000e+00> : vector<64xf32>
    %651 = vector.multi_reduction <add>, %650, %cst_364 [1] : vector<64x4xf32> to vector<64xf32>
    %652 = vector.shape_cast %651 : vector<64xf32> to vector<64x1xf32>
    %653 = vector.broadcast %652 : vector<64x1xf32> to vector<64x4xf32>
    %654 = arith.divf %650, %653 : vector<64x4xf32>
    %c0_365 = arith.constant 0 : index
    %c0_366 = arith.constant 0 : index
    %655 = vector.load %arg13[%c0_365, %c0_366] : memref<64x4xf32, #tpu.memory_space<vmem>>, vector<64x4xf32>
    tpu.vector_store %arg13[%c0_365, %c0_366], %654 {strides = array<i32>} : memref<64x4xf32, #tpu.memory_space<vmem>>, vector<64x4xf32>,
    return
  }
}

</mosaic_0001>

<bundles_post_ra>
// kernel: self_att_net_forward.3
= control target key start
LH: loop header
LB: loop body
LE: loop exit
PB: predicated region body
PF: predicated region fallthrough
CT: control target
= control target key end

     0   :  { %9 = vsyncpa [#allocation3], 0  ;;  %vm17_vm0 = vcmask 64512   ;;  %s318_s0 = inlined_call_operand.vmem [shape: f32[2,4,8], index: 0, kind: input, shape index: {}]   ;;  %s319_s1 = inlined_call_operand.vmem [shape: f32[2,8,64], index: 1, kind: input, shape index: {}]   ;;  %s320_s2 = inlined_call_operand.hbm [shape: f32[2,4,64], index: 2, kind: output, shape index: {0}]   ;;  %s321_s3 = inlined_call_operand.hbm [shape: f32[1,1], index: 3, kind: output, shape index: {1}]  }
   0x1   :  { %v15_v0 = vld [vmem:[%s318_s0] sm:$0xf]  ;;  %v207_v1 = vld [vmem:[%s318_s0 + $0x4] sm:$0xf] }
   0x2   :  { %205 = vmatpush.xpose.msk.msra.mxu1 %vm17_vm0, %v15_v0  ;;  %210 = vmatpush.xpose.msk.msra.mxu3 %vm17_vm0, %v207_v1 }
   0x3   :  { %10 = vsyncpa [#allocation5], 0  ;;  %v208_v2 = vld [vmem:[%s319_s1 + $0x8] sm:$0xff]  ;;  %v16_v3 = vld [vmem:[%s319_s1] sm:$0xff]  ;;  %vm64_vm1 = vcmask 27648   ;;  %v76_v7 = vmul.f32 %v15_v0, %v15_v0  ;;  %vm77_vm2 = vcmask 60416   ;;  %v152_v12 = vmul.f32 %v207_v1, %v207_v1 }
   0x4   :  { %113 = vmatpush.msra.mxu2 %v208_v2  ;;  %36 = vmatpush.msra.mxu0 %v16_v3  ;;  %s276_s0 = smov [#allocation2]   ;;  %s176_s22 = sshll.u32 %s320_s2, 4  ;;  %vm41_vm3 = vcmask 519168   ;;  %vm168_vm4 = vcmask 0   ;;  %s177_s22 = int_to_ptr.hbm [resolvable:$true] %s176_s22 }
   0x5   :  { %206 = vmatmul.msk.f32.vlgmr.msra.gmra.mxu1 %vm17_vm0, %v15_v0  ;;  %211 = vmatmul.msk.f32.vlgmr.msra.gmra.mxu3 %vm17_vm0, %v207_v1  ;;  %v78_v11 = vsel %vm77_vm2, %v76_v7, 0.0  ;;  %v153_v13 = vsel %vm77_vm2, %v152_v12, 0.0  ;;  %s174_s1 = sshll.u32 %s276_s0, 4  ;;  %s277_s23 = smov 64   ;;  %s175_s1 = int_to_ptr.vmem [resolvable:$true] %s174_s1 }
   0x6   :  { %209 = vmatmul.msk.f32.vlgmr.msra.gmra.mxu2 %vm17_vm0, %v207_v1  ;;  %204 = vmatmul.msk.f32.vlgmr.msra.gmra.mxu0 %vm17_vm0, %v15_v0  ;;  %s278_s24 = smov 4   ;;  %s279_s2 = smov [#allocation4]  }
   0x7   :  { %s188_s7 = sshll.u32 %s279_s2, 4  ;;  %s190_s11 = sshll.u32 %s321_s3, 4  ;;  %s189_s7 = int_to_ptr.vmem [resolvable:$true] %s188_s7  ;;  %s191_s11 = int_to_ptr.hbm [resolvable:$true] %s190_s11 }
  0x82   :  { %v60_v4 = vpop.f32.mrf.mxu1 }
  0x83   :  { %v63_v5 = vmul.f32 %v60_v4, %v60_v4  ;;  %v38_v42 = vpop.f32.mrf.mxu0 }
  0x84   :  { %42 = vst.msk [vmem:[#allocation2] sm:$0xf] %vm41_vm3, %v38_v42 }
  0x85   :  { %v65_v6 = vsel %vm64_vm1, %v63_v5, 0.0 }
  0x86   :  { %66 = vadd.xlane.f32.xlu0 %v65_v6 }
  0x88   :  { %v137_v8 = vpop.f32.mrf.mxu3 }
  0x89   :  { %v140_v9 = vmul.f32 %v137_v8, %v137_v8  ;;  %v115_v43 = vpop.f32.mrf.mxu2 }
  0x8a   :  { %119 = vst.msk [vmem:[#allocation2 + $0x4] sm:$0xf] %vm41_vm3, %v115_v43 }
  0x8b   :  { %v141_v10 = vsel %vm64_vm1, %v140_v9, 0.0  ;;  %182 = dma.vmem_to_hbm [thread:$0]  %s175_s1, 128, %s177_s22, [#allocation3], %s277_s23, %s277_s23, %s278_s24  }
  0x8c   :  { %142 = vadd.xlane.f32.xlu1 %v141_v10 }
  0x8e   :  { %79 = vadd.xlane.f32.xlu0 %v78_v11 }
  0x94   :  { %154 = vadd.xlane.f32.xlu1 %v153_v13 }
  0xf9   :  { %v67_v14 = vpop.xlane.xlu0 %66 }
  0xfa   :  { %v68_v15 = vrot.slane %v67_v14, 4 }
  0xfc   :  { %v69_v16 = vadd.f32 %v68_v15, %v67_v14 }
  0xfe   :  { %v70_v17 = vrot.slane %v69_v16, 2 }
  0xff   :  { %v143_v18 = vpop.xlane.xlu1 %142 }
 0x100   :  { %v144_v19 = vrot.slane %v143_v18, 4  ;;  %v71_v20 = vadd.f32 %v70_v17, %v69_v16 }
 0x101   :  { %v80_v21 = vpop.xlane.xlu0 %79 }
 0x102   :  { %v145_v22 = vadd.f32 %v144_v19, %v143_v18  ;;  %v81_v23 = vrot.slane %v80_v21, 4  ;;  %v72_v24 = vrot.slane %v71_v20, 1 }
 0x104   :  { %v146_v25 = vrot.slane %v145_v22, 2  ;;  %v82_v26 = vadd.f32 %v81_v23, %v80_v21  ;;  %v73_v27 = vadd.f32 %v72_v24, %v71_v20 }
 0x106   :  { %v83_v28 = vrot.slane %v82_v26, 2  ;;  %212 = vpush %v73_v27  ;;  %v147_v29 = vadd.f32 %v146_v25, %v145_v22 }
 0x107   :  { %v155_v30 = vpop.xlane.xlu1 %154 }
 0x108   :  { %v84_v31 = vadd.f32 %v83_v28, %v82_v26  ;;  %v156_v32 = vrot.slane %v155_v30, 4  ;;  %v148_v33 = vrot.slane %v147_v29, 1 }
 0x10a   :  { %v157_v34 = vadd.f32 %v156_v32, %v155_v30  ;;  %v85_v35 = vrot.slane %v84_v31, 1  ;;  %v149_v38 = vadd.f32 %v148_v33, %v147_v29 }
 0x10c   :  { %v158_v36 = vrot.slane %v157_v34, 2  ;;  %v86_v37 = vadd.f32 %v85_v35, %v84_v31 }
 0x10e   :  { %v159_v39 = vadd.f32 %v158_v36, %v157_v34  ;;  %214 = vpush %v86_v37 }
 0x10f   :  { %216 = vpush %v149_v38 }
 0x110   :  { %v160_v40 = vrot.slane %v159_v39, 1 }
 0x112   :  { %v161_v41 = vadd.f32 %v160_v40, %v159_v39 }
 0x114   :  { %218 = vpush %v161_v41 }
 0x137   :  { %s213_s25 = spop %212 }
 0x13f   :  { %s215_s26 = spop %214 }
 0x140   :  { %s88_s27 = smul.f32 2.0, %s215_s26  ;;  %s217_s30 = spop %216 }
 0x142   :  { %s89_s28 = ssub.f32 %s213_s25, %s88_s27 }
 0x144   :  { %s90_s29 = sadd.f32 4.0, %s89_s28 }
 0x145   :  { %s219_s4 = spop %218 }
 0x146   :  { %s151_s5 = sadd.f32 %s217_s30, %s90_s29  ;;  %s163_s6 = smul.f32 2.0, %s219_s4 }
 0x148   :  { %s164_s8 = ssub.f32 %s151_s5, %s163_s6 }
 0x14a   :  { %s165_s12 = sadd.f32 4.0, %s164_s8 }
 0x14c   :  { %v166_v44 = vstv %s165_s12 }
 0x14d   :  { %169 = vst.msk [vmem:[#allocation4] sm:$0x1] %vm168_vm4, %v166_v44 }
 0x14e   :  { %193 = dma.vmem_to_hbm [thread:$0]  %s189_s7, 16, %s191_s11, [#allocation5]  }
 0x14f   :  { %272 = dma.done.wait [#allocation3], 128  }
 0x150   :  { %273 = vsyncadd [#allocation3], 4294967168 }
 0x151   :  { %274 = dma.done.wait [#allocation5], 16  }
 0x152   :  { %275 = vsyncadd [#allocation5], 4294967280 }
 0x153   :  { %202 = vsyncpa [#allocation3], 1 }
 0x154   :  { %203 = vsyncpa [#allocation5], 1 }

// kernel: self_att_net_forward.2
= control target key start
LH: loop header
LB: loop body
LE: loop exit
PB: predicated region body
PF: predicated region fallthrough
CT: control target
= control target key end

     0   :  { %vm75_vm0 = vcmask 261120   ;;  %vm326_vm1 = vcmask 523264   ;;  %v3246_v15 = vmov 0.0   ;;  %s3247_s20 = smov 64   ;;  %vm457_vm10 = vcmask 523520   ;;  %s4523_s3 = inlined_call_operand.vmem [shape: f32[32,256], index: 3, kind: input, shape index: {}]   ;;  %s4524_s1 = inlined_call_operand.vmem [shape: f32[64,32], index: 1, kind: input, shape index: {}]   ;;  %s4525_s2 = inlined_call_operand.vmem [shape: f32[32,256], index: 2, kind: input, shape index: {}]   ;;  %s4526_s4 = inlined_call_operand.vmem [shape: f32[64,256], index: 4, kind: input, shape index: {}]   ;;  %s4527_s0 = inlined_call_operand.vmem [shape: f32[64,32], index: 0, kind: input, shape index: {}]   ;;  %s4528_s5 = inlined_call_operand.vmem [shape: f32[1,256], index: 5, kind: input, shape index: {}]   ;;  %s4529_s7 = inlined_call_operand.vmem [shape: f32[64,256], index: 7, kind: input, shape index: {}]   ;;  %s4530_s6 = inlined_call_operand.vmem [shape: f32[64,256], index: 6, kind: input, shape index: {}]   ;;  %s4531_s8 = inlined_call_operand.vmem [shape: f32[64,256], index: 8, kind: input, shape index: {}]   ;;  %s4532_s9 = inlined_call_operand.vmem [shape: f32[1,256], index: 9, kind: input, shape index: {}]   ;;  %s4533_s12 = inlined_call_operand.vmem [shape: f32[64,64], index: 12, kind: output, shape index: {0}]   ;;  %s4534_s10 = inlined_call_operand.vmem [shape: f32[64,16], index: 10, kind: input, shape index: {}]   ;;  %s4535_s11 = inlined_call_operand.vmem [shape: f32[16,4], index: 11, kind: input, shape index: {}]   ;;  %s4536_s13 = inlined_call_operand.vmem [shape: f32[64,4], index: 13, kind: output, shape index: {1}]  }
   0x1   :  { %v73_v0 = vld [vmem:[%s4523_s3 + $0x30] sm:$0xff]  ;;  %v74_v1 = vld [vmem:[%s4523_s3 + $0x38] sm:$0xff]  ;;  %v71_v2 = vld [vmem:[%s4523_s3 + $0x20] sm:$0xff]  ;;  %327 = vst.msk [vmem:[#allocation5] sm:$0xff] %vm326_vm1, %v3246_v15 }
   0x2   :  { %2996 = vmatpush.msra.mxu2 %v73_v0  ;;  %153 = vmatpush.msra.mxu1 %v74_v1  ;;  %v72_v3 = vld [vmem:[%s4523_s3 + $0x28] sm:$0xff]  ;;  %v69_v4 = vld [vmem:[%s4523_s3 + $0x10] sm:$0xff]  ;;  %v70_v5 = vld [vmem:[%s4523_s3 + $0x18] sm:$0xff]  ;;  %328 = vst.msk [vmem:[#allocation6] sm:$0xff] %vm326_vm1, %v3246_v15 }
   0x3   :  { %3000 = vmatpush.msra.mxu3 %v74_v1  ;;  %112 = vmatpush.msra.mxu0 %v73_v0  ;;  %v67_v6 = vld [vmem:[%s4523_s3] sm:$0xff]  ;;  %v68_v7 = vld [vmem:[%s4523_s3 + $0x8] sm:$0xff]  ;;  %v57_v11 = vld [vmem:[%s4525_s2 + $0x30] sm:$0xff] }
   0x4   :  { %2997 = vmatpush.msra.mxu2 %v71_v2  ;;  %154 = vmatpush.msra.mxu1 %v72_v3  ;;  %v3345_v8 = vld [vmem:[%s4524_s1 + $0x20] sm:$0xff]  ;;  %v64_v10 = vld [vmem:[%s4524_s1 + $0x28] sm:$0xff]  ;;  %v58_v12 = vld [vmem:[%s4525_s2 + $0x38] sm:$0xff] }
   0x5   :  { %3001 = vmatpush.msra.mxu3 %v72_v3  ;;  %113 = vmatpush.msra.mxu0 %v71_v2  ;;  %v59_v9 = vld [vmem:[%s4524_s1] sm:$0xff]  ;;  %v3369_v14 = vld [vmem:[%s4526_s4 + $0x70] sm:$0xff]  ;;  %v56_v16 = vld [vmem:[%s4525_s2 + $0x28] sm:$0xff] }
   0x6   :  { %2998 = vmatpush.msra.mxu2 %v69_v4  ;;  %155 = vmatpush.msra.mxu1 %v70_v5  ;;  %v55_v13 = vld [vmem:[%s4525_s2 + $0x20] sm:$0xff]  ;;  %v3379_v17 = vld [vmem:[%s4526_s4 + $0x78] sm:$0xff]  ;;  %v53_v19 = vld [vmem:[%s4525_s2 + $0x10] sm:$0xff] }
   0x7   :  { %3002 = vmatpush.msra.mxu3 %v70_v5  ;;  %114 = vmatpush.msra.mxu0 %v69_v4  ;;  %v3387_v18 = vld [vmem:[%s4526_s4 + $0x60] sm:$0xff]  ;;  %v54_v20 = vld [vmem:[%s4525_s2 + $0x18] sm:$0xff]  ;;  %v3399_v21 = vld [vmem:[%s4526_s4 + $0x68] sm:$0xff] }
   0x8   :  { %2999 = vmatpush.msra.mxu2 %v67_v6  ;;  %156 = vmatpush.msra.mxu1 %v68_v7  ;;  %v3404_v22 = vld [vmem:[%s4526_s4 + $0x50] sm:$0xff]  ;;  %v60_v23 = vld [vmem:[%s4524_s1 + $0x8] sm:$0xff]  ;;  %v3417_v25 = vld [vmem:[%s4526_s4 + $0x40] sm:$0xff] }
   0x9   :  { %3003 = vmatpush.msra.mxu3 %v68_v7  ;;  %2856 = vmatmul.msk.f32.vlgmr.msra.gmra.mxu2 %vm75_vm0, %v3345_v8  ;;  %v65_v24 = vld [vmem:[%s4524_s1 + $0x30] sm:$0xff]  ;;  %v52_v26 = vld [vmem:[%s4525_s2 + $0x8] sm:$0xff]  ;;  %v51_v27 = vld [vmem:[%s4525_s2] sm:$0xff] }
   0xa   :  { %2860 = vmatmul.msk.f32.vlgmr.msra.gmra.mxu1 %vm75_vm0, %v59_v9  ;;  %2865 = vmatmul.msk.f32.vlgmr.msra.gmra.mxu3 %vm75_vm0, %v64_v10  ;;  %v3433_v28 = vld [vmem:[%s4526_s4 + $0x30] sm:$0xff]  ;;  %v3438_v29 = vld [vmem:[%s4526_s4 + $0x58] sm:$0xff]  ;;  %v3445_v30 = vld [vmem:[%s4526_s4 + $0x20] sm:$0xff] }
   0xb   :  { %218 = vmatpush.msrb.mxu2 %v57_v11  ;;  %115 = vmatpush.msra.mxu0 %v67_v6  ;;  %v3450_v31 = vld [vmem:[%s4526_s4 + $0x48] sm:$0xff]  ;;  %v3457_v32 = vld [vmem:[%s4526_s4 + $0x38] sm:$0xff]  ;;  %v61_v33 = vld [vmem:[%s4524_s1 + $0x10] sm:$0xff] }
   0xc   :  { %2852 = vmatmul.msk.f32.vlgmr.msra.gmra.mxu0 %vm75_vm0, %v59_v9  ;;  %259 = vmatpush.msrb.mxu3 %v58_v12  ;;  %v66_v34 = vld [vmem:[%s4524_s1 + $0x38] sm:$0xff]  ;;  %v3472_v35 = vld [vmem:[%s4526_s4 + $0x10] sm:$0xff]  ;;  %v3477_v36 = vld [vmem:[%s4526_s4 + $0x28] sm:$0xff] }
   0xd   :  { %219 = vmatpush.msrb.mxu2 %v55_v13  ;;  %359 = vmatpush.msrb.mxu0 %v3369_v14  ;;  %v3488_v37 = vld [vmem:[%s4526_s4 + $0x18] sm:$0xff]  ;;  %v3493_v38 = vld [vmem:[%s4526_s4] sm:$0xff]  ;;  %v3501_v39 = vld [vmem:[%s4526_s4 + $0x8] sm:$0xff] }
   0xe   :  { %260 = vmatpush.msrb.mxu3 %v56_v16  ;;  %379 = vmatpush.msrb.mxu1 %v3379_v17  ;;  %v62_v40 = vld [vmem:[%s4524_s1 + $0x18] sm:$0xff]  ;;  %v43_v41 = vld [vmem:[%s4527_s0] sm:$0xff]  ;;  %v44_v42 = vld [vmem:[%s4527_s0 + $0x8] sm:$0xff] }
   0xf   :  { %360 = vmatpush.msrb.mxu0 %v3387_v18  ;;  %220 = vmatpush.msrb.mxu2 %v53_v19  ;;  %v347_v43 = vld [vmem:[#allocation5] sm:$0xff]  ;;  %v45_v44 = vld [vmem:[%s4527_s0 + $0x10] sm:$0xff]  ;;  %v46_v45 = vld [vmem:[%s4527_s0 + $0x18] sm:$0xff] }
  0x10   :  { %261 = vmatpush.msrb.mxu3 %v54_v20  ;;  %380 = vmatpush.msrb.mxu1 %v3399_v21  ;;  %v432_v46 = vld [vmem:[#allocation6] sm:$0xff]  ;;  %v47_v47 = vld [vmem:[%s4527_s0 + $0x20] sm:$0xff]  ;;  %v49_v49 = vld [vmem:[%s4527_s0 + $0x30] sm:$0xff] }
  0x11   :  { %2857 = vmatmul.msk.f32.gmra.mxu2 %vm75_vm0, %v64_v10  ;;  %361 = vmatpush.msrb.mxu0 %v3404_v22  ;;  %v48_v48 = vld [vmem:[%s4527_s0 + $0x28] sm:$0xff]  ;;  %v50_v50 = vld [vmem:[%s4527_s0 + $0x38] sm:$0xff]  ;;  %v288_v2 = vld [vmem:[%s4528_s5] sm:$0x3] }
  0x12   :  { %2861 = vmatmul.msk.f32.gmra.mxu1 %vm75_vm0, %v60_v23  ;;  %2866 = vmatmul.msk.f32.gmra.mxu3 %vm75_vm0, %v65_v24  ;;  %v3638_v3 = vperm.slane %v288_v2, 0  ;;  %v3645_v16 = vperm.slane %v288_v2, 1 }
  0x13   :  { %362 = vmatpush.msrb.mxu0 %v3417_v25  ;;  %262 = vmatpush.msrb.mxu3 %v52_v26 }
  0x14   :  { %2853 = vmatmul.msk.f32.gmra.mxu0 %vm75_vm0, %v60_v23  ;;  %221 = vmatpush.msrb.mxu2 %v51_v27 }
  0x15   :  { %363 = vmatpush.msrb.mxu0 %v3433_v28  ;;  %381 = vmatpush.msrb.mxu1 %v3438_v29 }
  0x16   :  { %475 = vmatpush.msra.mxu2 %v3369_v14  ;;  %495 = vmatpush.msra.mxu3 %v3379_v17 }
  0x17   :  { %364 = vmatpush.msrb.mxu0 %v3445_v30  ;;  %382 = vmatpush.msrb.mxu1 %v3450_v31 }
  0x18   :  { %476 = vmatpush.msra.mxu2 %v3387_v18  ;;  %496 = vmatpush.msra.mxu3 %v3399_v21 }
  0x19   :  { %2858 = vmatmul.msk.f32.gmra.mxu2 %vm75_vm0, %v65_v24  ;;  %383 = vmatpush.msrb.mxu1 %v3457_v32 }
  0x1a   :  { %2862 = vmatmul.msk.f32.gmra.mxu1 %vm75_vm0, %v61_v33  ;;  %2867 = vmatmul.msk.f32.gmra.mxu3 %vm75_vm0, %v66_v34 }
  0x1b   :  { %365 = vmatpush.msrb.mxu0 %v3472_v35  ;;  %384 = vmatpush.msrb.mxu1 %v3477_v36 }
  0x1c   :  { %2854 = vmatmul.msk.f32.gmra.mxu0 %vm75_vm0, %v61_v33  ;;  %477 = vmatpush.msra.mxu2 %v3404_v22 }
  0x1d   :  { %385 = vmatpush.msrb.mxu1 %v3488_v37  ;;  %366 = vmatpush.msrb.mxu0 %v3493_v38 }
  0x1e   :  { %478 = vmatpush.msra.mxu2 %v3417_v25  ;;  %497 = vmatpush.msra.mxu3 %v3438_v29 }
  0x1f   :  { %386 = vmatpush.msrb.mxu1 %v3501_v39  ;;  %590 = vmatpush.msra.mxu0 %v3369_v14 }
  0x20   :  { %479 = vmatpush.msra.mxu2 %v3433_v28  ;;  %498 = vmatpush.msra.mxu3 %v3450_v31 }
  0x21   :  { %2859 = vmatmul.msk.f32.gmra.mxu2 %vm75_vm0, %v66_v34  ;;  %610 = vmatpush.msra.mxu1 %v3379_v17 }
  0x22   :  { %2863 = vmatmul.msk.f32.gmra.mxu1 %vm75_vm0, %v62_v40  ;;  %2876 = vmatmul.msk.f32.vlgmr.msrb.gmra.mxu3 %vm75_vm0, %v43_v41 }
  0x23   :  { %480 = vmatpush.msra.mxu2 %v3445_v30  ;;  %499 = vmatpush.msra.mxu3 %v3457_v32 }
  0x24   :  { %2855 = vmatmul.msk.f32.gmra.mxu0 %vm75_vm0, %v62_v40  ;;  %611 = vmatpush.msra.mxu1 %v3399_v21 }
  0x25   :  { %481 = vmatpush.msra.mxu2 %v3472_v35  ;;  %500 = vmatpush.msra.mxu3 %v3477_v36 }
  0x26   :  { %591 = vmatpush.msra.mxu0 %v3387_v18  ;;  %612 = vmatpush.msra.mxu1 %v3438_v29 }
  0x27   :  { %482 = vmatpush.msra.mxu2 %v3493_v38  ;;  %501 = vmatpush.msra.mxu3 %v3488_v37 }
  0x28   :  { %592 = vmatpush.msra.mxu0 %v3404_v22  ;;  %613 = vmatpush.msra.mxu1 %v3450_v31 }
  0x29   :  { %2868 = vmatmul.msk.f32.vlgmr.msrb.gmra.mxu2 %vm75_vm0, %v43_v41  ;;  %502 = vmatpush.msra.mxu3 %v3501_v39 }
  0x2a   :  { %2864 = vmatmul.msk.f32.gmra.mxu1 %vm75_vm0, %v3345_v8  ;;  %2877 = vmatmul.msk.f32.gmra.mxu3 %vm75_vm0, %v44_v42 }
  0x2b   :  { %593 = vmatpush.msra.mxu0 %v3417_v25  ;;  %614 = vmatpush.msra.mxu1 %v3457_v32 }
  0x2c   :  { %2884 = vmatmul.msk.f32.vlgmr.msrb.gmra.mxu0 %vm326_vm1, %v347_v43  ;;  %705 = vmatpush.msrb.mxu2 %v3369_v14 }
  0x2d   :  { %594 = vmatpush.msra.mxu0 %v3433_v28  ;;  %615 = vmatpush.msra.mxu1 %v3477_v36 }
  0x2e   :  { %725 = vmatpush.msrb.mxu3 %v3379_v17  ;;  %706 = vmatpush.msrb.mxu2 %v3387_v18 }
  0x2f   :  { %595 = vmatpush.msra.mxu0 %v3445_v30  ;;  %616 = vmatpush.msra.mxu1 %v3488_v37 }
  0x30   :  { %726 = vmatpush.msrb.mxu3 %v3399_v21  ;;  %707 = vmatpush.msrb.mxu2 %v3404_v22 }
  0x31   :  { %2869 = vmatmul.msk.f32.gmra.mxu2 %vm75_vm0, %v44_v42  ;;  %596 = vmatpush.msra.mxu0 %v3472_v35 }
  0x32   :  { %2878 = vmatmul.msk.f32.gmra.mxu3 %vm75_vm0, %v45_v44  ;;  %2885 = vmatmul.msk.f32.vlgmr.msrb.gmra.mxu1 %vm326_vm1, %v347_v43 }
  0x33   :  { %597 = vmatpush.msra.mxu0 %v3493_v38  ;;  %617 = vmatpush.msra.mxu1 %v3501_v39 }
  0x34   :  { %727 = vmatpush.msrb.mxu3 %v3438_v29  ;;  %708 = vmatpush.msrb.mxu2 %v3417_v25 }
  0x35   :  { %820 = vmatpush.msrb.mxu0 %v3369_v14  ;;  %840 = vmatpush.msrb.mxu1 %v3379_v17 }
  0x36   :  { %728 = vmatpush.msrb.mxu3 %v3450_v31  ;;  %709 = vmatpush.msrb.mxu2 %v3433_v28 }
  0x37   :  { %821 = vmatpush.msrb.mxu0 %v3387_v18  ;;  %841 = vmatpush.msrb.mxu1 %v3399_v21 }
  0x38   :  { %729 = vmatpush.msrb.mxu3 %v3457_v32  ;;  %710 = vmatpush.msrb.mxu2 %v3445_v30 }
  0x39   :  { %2870 = vmatmul.msk.f32.gmra.mxu2 %vm75_vm0, %v45_v44  ;;  %822 = vmatpush.msrb.mxu0 %v3404_v22 }
  0x3a   :  { %2879 = vmatmul.msk.f32.gmra.mxu3 %vm75_vm0, %v46_v45  ;;  %711 = vmatpush.msrb.mxu2 %v3472_v35 }
  0x3b   :  { %434 = vrot.lane.b32.xlu0 %v432_v46, %s3247_s20  ;;  %730 = vmatpush.msrb.mxu3 %v3477_v36 }
  0x3c   :  { %712 = vmatpush.msrb.mxu2 %v3493_v38  ;;  %842 = vmatpush.msrb.mxu1 %v3438_v29 }
  0x3d   :  { %731 = vmatpush.msrb.mxu3 %v3488_v37  ;;  %823 = vmatpush.msrb.mxu0 %v3417_v25 }
  0x3e   :  { %843 = vmatpush.msrb.mxu1 %v3450_v31 }
  0x3f   :  { %732 = vmatpush.msrb.mxu3 %v3501_v39  ;;  %824 = vmatpush.msrb.mxu0 %v3433_v28 }
  0x40   :  { %844 = vmatpush.msrb.mxu1 %v3457_v32 }
  0x41   :  { %2871 = vmatmul.msk.f32.gmra.mxu2 %vm75_vm0, %v46_v45  ;;  %825 = vmatpush.msrb.mxu0 %v3445_v30 }
  0x42   :  { %2880 = vmatmul.msk.f32.gmra.mxu3 %vm75_vm0, %v47_v47  ;;  %845 = vmatpush.msrb.mxu1 %v3477_v36 }
  0x43   :  { %826 = vmatpush.msrb.mxu0 %v3472_v35 }
  0x44   :  { %846 = vmatpush.msrb.mxu1 %v3488_v37 }
  0x45   :  { %827 = vmatpush.msrb.mxu0 %v3493_v38 }
  0x46   :  { %847 = vmatpush.msrb.mxu1 %v3501_v39 }
  0x49   :  { %2872 = vmatmul.msk.f32.gmra.mxu2 %vm75_vm0, %v47_v47 }
  0x4a   :  { %2881 = vmatmul.msk.f32.gmra.mxu3 %vm75_vm0, %v48_v48 }
  0x51   :  { %2873 = vmatmul.msk.f32.gmra.mxu2 %vm75_vm0, %v48_v48 }
  0x52   :  { %2882 = vmatmul.msk.f32.gmra.mxu3 %vm75_vm0, %v49_v49 }
  0x59   :  { %2874 = vmatmul.msk.f32.gmra.mxu2 %vm75_vm0, %v49_v49 }
  0x5a   :  { %2883 = vmatmul.msk.f32.gmra.mxu3 %vm75_vm0, %v50_v50 }
  0x61   :  { %2875 = vmatmul.msk.f32.gmra.mxu2 %vm75_vm0, %v50_v50 }
  0x87   :  { %v158_v54 = vpop.f32.mrf.mxu1 }
  0x89   :  { %v117_v51 = vpop.f32.mrf.mxu0 }
  0x8c   :  { %v3617_v52 = vpop.f32.mrf.mxu2 }
  0x8d   :  { %v3619_v53 = vpop.f32.mrf.mxu3 }
  0x8f   :  { %v3627_v58 = vpop.f32.mrf.mxu1 }
  0x91   :  { %v3621_v55 = vpop.f32.mrf.mxu0 }
  0x94   :  { %v3623_v56 = vpop.f32.mrf.mxu2 }
  0x95   :  { %v3625_v57 = vpop.f32.mrf.mxu3 }
  0x97   :  { %v164_v62 = vpop.f32.mrf.mxu1 }
  0x99   :  { %v123_v59 = vpop.f32.mrf.mxu0 }
  0x9c   :  { %v3629_v60 = vpop.f32.mrf.mxu2 }
  0x9d   :  { %v3631_v61 = vpop.f32.mrf.mxu3 }
  0x9f   :  { %v167_v5 = vpop.f32.mrf.mxu1 }
  0xa1   :  { %v126_v0 = vpop.f32.mrf.mxu0 }
  0xa4   :  { %v3633_v63 = vpop.f32.mrf.mxu2 }
  0xa5   :  { %v264_v1 = vpop.f32.mrf.mxu3 }
  0xa6   :  { %v265_v40 = vadd.f32 %v264_v1, %v158_v54 }
  0xa7   :  { %v170_v20 = vpop.f32.mrf.mxu1 }
  0xa8   :  { %v295_v45 = vadd.f32 %v3645_v16, %v265_v40 }
  0xa9   :  { %v368_v8 = vpop.f32.mrf.mxu0 }
  0xac   :  { %v223_v4 = vpop.f32.mrf.mxu2 }
  0xad   :  { %v224_v6 = vadd.f32 %v223_v4, %v117_v51  ;;  %v3640_v7 = vpop.f32.mrf.mxu3 }
  0xaf   :  { %v294_v9 = vadd.f32 %v3638_v3, %v224_v6  ;;  %v388_v44 = vpop.f32.mrf.mxu1 }
  0xb0   :  { %v392_v47 = vadd.f32 %v388_v44, %v295_v45 }
  0xb1   :  { %v391_v10 = vadd.f32 %v368_v8, %v294_v9 }
  0xb3   :  { %v2886_v11 = vmul.f32 -1.442695, %v391_v10 }
  0xb4   :  { %v3643_v12 = vpop.f32.mrf.mxu2 }
  0xb5   :  { %3006 = vpow2.f32 %v2886_v11  ;;  %v270_v13 = vpop.f32.mrf.mxu3 }
  0xb6   :  { %v271_v19 = vadd.f32 %v270_v13, %v164_v62 }
  0xb8   :  { %v3648_v23 = vadd.f32 %v3645_v16, %v271_v19 }
  0xbb   :  { %v3007_v24 = vpop.eup %3006 }
  0xbc   :  { %v396_v26 = vadd.f32 1.0, %v3007_v24  ;;  %v229_v27 = vpop.f32.mrf.mxu2 }
  0xbd   :  { %v230_v33 = vadd.f32 %v229_v27, %v123_v59  ;;  %v273_v34 = vpop.f32.mrf.mxu3 }
  0xbe   :  { %3008 = vrcp.f32 %v396_v26  ;;  %v274_v41 = vadd.f32 %v273_v34, %v167_v5  ;;  %v408_v1 = vand.u32 2147483648, %v396_v26  ;;  %v406_v5 = vand.u32 2147483647, %v396_v26 }
  0xbf   :  { %v3651_v42 = vadd.f32 %v3638_v3, %v230_v33  ;;  %3010 = vtanh.f32 %v392_v47  ;;  %vm402_vm3 = vweird.f32 %v396_v26 }
  0xc0   :  { %v3654_v43 = vadd.f32 %v3645_v16, %v274_v41  ;;  %vm407_vm5 = vcmp.eq.f32.partialorder %v406_v5, 8.507059e+37 }
  0xc4   :  { %v3009_v46 = vpop.eup %3008  ;;  %v232_v48 = vpop.f32.mrf.mxu2 }
  0xc5   :  { %v233_v49 = vadd.f32 %v232_v48, %v126_v0  ;;  %v276_v50 = vpop.f32.mrf.mxu3  ;;  %v398_v51 = vmul.f32 %v3009_v46, %v396_v26  ;;  %vm403_vm2 = vweird.f32 %v3009_v46  ;;  %v409_v0 = vor.u32 1.1754944e-38, %v408_v1  ;;  %v3011_v13 = vpop.eup %3010 }
  0xc6   :  { %v277_v59 = vadd.f32 %v276_v50, %v170_v20  ;;  %vm404_vm4 = vmor %vm402_vm3, %vm403_vm2  ;;  %v2887_v48 = vmul.f32 -1.442695, %v392_v47 }
  0xc7   :  { %v399_v62 = vsub.f32 1.0, %v398_v51  ;;  %v3658_v54 = vadd.f32 %v3638_v3, %v233_v49 }
  0xc8   :  { %v3661_v2 = vadd.f32 %v3645_v16, %v277_v59  ;;  %3012 = vpow2.f32 %v2887_v48 }
  0xc9   :  { %v400_v4 = vmul.f32 %v3009_v46, %v399_v62 }
  0xcb   :  { %v401_v6 = vadd.f32 %v3009_v46, %v400_v4 }
  0xcc   :  { %v235_v8 = vpop.f32.mrf.mxu2 }
  0xcd   :  { %v236_v9 = vadd.f32 %v235_v8, %v3617_v52  ;;  %v279_v10 = vpop.f32.mrf.mxu3  ;;  %v405_v11 = vsel %vm404_vm4, %v3009_v46, %v401_v6 }
  0xce   :  { %v280_v19 = vadd.f32 %v279_v10, %v3619_v53  ;;  %v410_v20 = vsel %vm407_vm5, %v409_v0, %v405_v11  ;;  %v3013_v49 = vpop.eup %3012 }
  0xcf   :  { %v438_v24 = vmul.f32 %v3011_v13, %v410_v20  ;;  %v3666_v27 = vadd.f32 %v3638_v3, %v236_v9  ;;  %v416_v50 = vadd.f32 1.0, %v3013_v49 }
  0xd0   :  { %v3669_v33 = vadd.f32 %v3645_v16, %v280_v19 }
  0xd1   :  { %440 = vrot.lane.b32.xlu0 %v438_v24, %s3247_s20  ;;  %3014 = vrcp.f32 %v416_v50  ;;  %vm422_vm7 = vweird.f32 %v416_v50  ;;  %v426_v8 = vand.u32 2147483647, %v416_v50 }
  0xd3   :  { %vm427_vm9 = vcmp.eq.f32.partialorder %v426_v8, 8.507059e+37 }
  0xd4   :  { %v238_v26 = vpop.f32.mrf.mxu2 }
  0xd5   :  { %v239_v34 = vadd.f32 %v238_v26, %v3623_v56  ;;  %v282_v52 = vpop.f32.mrf.mxu3 }
  0xd6   :  { %v283_v40 = vadd.f32 %v282_v52, %v3625_v57  ;;  %v435_v57 = vpop.permute.xlu0 %434 }
  0xd7   :  { %v3675_v41 = vadd.f32 %v3638_v3, %v239_v34  ;;  %v3015_v56 = vpop.eup %3014  ;;  %v437_v1 = vmul.f32 %v435_v57, %v410_v20  ;;  %v227_v34 = vadd.f32 %v3643_v12, %v3621_v55 }
  0xd8   :  { %v3678_v53 = vadd.f32 %v3645_v16, %v283_v40  ;;  %v418_v51 = vmul.f32 %v3015_v56, %v416_v50  ;;  %vm423_vm6 = vweird.f32 %v3015_v56 }
  0xd9   :  { %vm424_vm8 = vmor %vm422_vm7, %vm423_vm6  ;;  %v296_v52 = vadd.f32 %v3638_v3, %v227_v34 }
  0xda   :  { %v419_v59 = vsub.f32 1.0, %v418_v51 }
  0xdc   :  { %v241_v44 = vpop.f32.mrf.mxu2  ;;  %v420_v62 = vmul.f32 %v3015_v56, %v419_v59 }
  0xdd   :  { %v242_v45 = vadd.f32 %v241_v44, %v3629_v60  ;;  %v428_v60 = vand.u32 2147483648, %v416_v50  ;;  %v3716_v48 = vpop.f32.mrf.mxu3 }
  0xde   :  { %v421_v6 = vadd.f32 %v3015_v56, %v420_v62 }
  0xdf   :  { %v3682_v46 = vadd.f32 %v3638_v3, %v242_v45  ;;  %v429_v0 = vor.u32 1.1754944e-38, %v428_v60 }
  0xe0   :  { %v425_v47 = vsel %vm424_vm8, %v3015_v56, %v421_v6  ;;  %v268_v56 = vadd.f32 %v3640_v7, %v3627_v58 }
  0xe1   :  { %v430_v10 = vsel %vm427_vm9, %v429_v0, %v425_v47 }
  0xe2   :  { %v297_v57 = vadd.f32 %v3645_v16, %v268_v56 }
  0xe4   :  { %v3711_v26 = vpop.f32.mrf.mxu2 }
 0x143   :  { %v441_v4 = vpop.permute.xlu0 %440 }
 0x144   :  { %v443_v5 = vadd.f32 %v441_v4, %v437_v1 }
 0x146   :  { %3016 = vtanh.f32 %v443_v5 }
 0x14c   :  { %v3017_v9 = vpop.eup %3016 }
 0x14d   :  { %v445_v11 = vmul.f32 %v3017_v9, %v430_v10 }
 0x14f   :  { %452 = vrot.lane.b32.xlu1 %v445_v11, %s3247_s20 }
 0x157   :  { %447 = vrot.lane.b32.xlu1 %v443_v5, %s3247_s20 }
 0x1c1   :  { %v453_v13 = vpop.permute.xlu1 %452 }
 0x1c2   :  { %455 = vst.msk [vmem:[#allocation5] sm:$0xff] %vm326_vm1, %v453_v13 }
 0x1c3   :  { %456 = vst.msk [vmem:[#allocation3] sm:$0xff] %vm75_vm0, %v453_v13 }
 0x1c4   :  { %458 = vst.msk [vmem:[#allocation3 + $0x38] sm:$0xff] %vm457_vm10, %v453_v13 }
 0x1c5   :  { %459 = vst.msk [vmem:[#allocation4 + $0x38] sm:$0xff] %vm75_vm0, %v453_v13 }
 0x1c6   :  { %460 = vst.msk [vmem:[#allocation4] sm:$0xff] %vm457_vm10, %v453_v13 }
 0x1c9   :  { %v448_v19 = vpop.permute.xlu1 %447  ;;  %v463_v20 = vld [vmem:[#allocation5] sm:$0xff] }
 0x1ca   :  { %450 = vst.msk [vmem:[#allocation6] sm:$0xff] %vm326_vm1, %v448_v19  ;;  %2888 = vmatmul.msk.f32.vlgmr.msra.gmra.mxu2 %vm326_vm1, %v463_v20  ;;  %2889 = vmatmul.msk.f32.vlgmr.msra.gmra.mxu3 %vm326_vm1, %v463_v20 }
 0x1cb   :  { %935 = vmatpush.msra.mxu2 %v3369_v14  ;;  %955 = vmatpush.msra.mxu3 %v3379_v17 }
 0x1cd   :  { %936 = vmatpush.msra.mxu2 %v3387_v18  ;;  %956 = vmatpush.msra.mxu3 %v3399_v21 }
 0x1cf   :  { %937 = vmatpush.msra.mxu2 %v3404_v22  ;;  %957 = vmatpush.msra.mxu3 %v3438_v29 }
 0x1d1   :  { %v548_v24 = vld [vmem:[#allocation6] sm:$0xff]  ;;  %938 = vmatpush.msra.mxu2 %v3417_v25  ;;  %958 = vmatpush.msra.mxu3 %v3450_v31 }
 0x1d2   :  { %550 = vrot.lane.b32.xlu2 %v548_v24, %s3247_s20 }
 0x1d3   :  { %939 = vmatpush.msra.mxu2 %v3433_v28  ;;  %959 = vmatpush.msra.mxu3 %v3457_v32 }
 0x1d5   :  { %940 = vmatpush.msra.mxu2 %v3445_v30  ;;  %960 = vmatpush.msra.mxu3 %v3477_v36 }
 0x1d7   :  { %941 = vmatpush.msra.mxu2 %v3472_v35  ;;  %961 = vmatpush.msra.mxu3 %v3488_v37 }
 0x1d9   :  { %942 = vmatpush.msra.mxu2 %v3493_v38  ;;  %962 = vmatpush.msra.mxu3 %v3501_v39 }
 0x22c   :  { %v551_v19 = vpop.permute.xlu2 %550 }
 0x24d   :  { %v484_v40 = vpop.f32.mrf.mxu2  ;;  %v504_v51 = vpop.f32.mrf.mxu3 }
 0x24e   :  { %v507_v44 = vadd.f32 %v484_v40, %v296_v52  ;;  %v508_v62 = vadd.f32 %v504_v51, %v297_v57 }
 0x250   :  { %v2890_v45 = vmul.f32 -1.442695, %v507_v44  ;;  %v2891_v0 = vmul.f32 -1.442695, %v508_v62 }
 0x252   :  { %3018 = vpow2.f32 %v2890_v45 }
 0x258   :  { %v3019_v49 = vpop.eup %3018 }
 0x259   :  { %v512_v50 = vadd.f32 1.0, %v3019_v49 }
 0x25b   :  { %3020 = vrcp.f32 %v512_v50  ;;  %v524_v1 = vand.u32 2147483648, %v512_v50  ;;  %v522_v5 = vand.u32 2147483647, %v512_v50  ;;  %vm518_vm12 = vweird.f32 %v512_v50 }
 0x25c   :  { %3022 = vtanh.f32 %v508_v62 }
 0x25d   :  { %v525_v60 = vor.u32 1.1754944e-38, %v524_v1  ;;  %vm523_vm14 = vcmp.eq.f32.partialorder %v522_v5, 8.507059e+37  ;;  %3024 = vpow2.f32 %v2891_v0 }
 0x261   :  { %v3021_v59 = vpop.eup %3020 }
 0x262   :  { %v514_v55 = vmul.f32 %v3021_v59, %v512_v50  ;;  %vm519_vm11 = vweird.f32 %v3021_v59  ;;  %v3023_v58 = vpop.eup %3022 }
 0x263   :  { %vm520_vm13 = vmor %vm518_vm12, %vm519_vm11  ;;  %v3025_v9 = vpop.eup %3024 }
 0x264   :  { %v515_v12 = vsub.f32 1.0, %v514_v55  ;;  %v532_v10 = vadd.f32 1.0, %v3025_v9 }
 0x266   :  { %v516_v4 = vmul.f32 %v3021_v59, %v515_v12  ;;  %3026 = vrcp.f32 %v532_v10  ;;  %v544_v45 = vand.u32 2147483648, %v532_v10  ;;  %vm538_vm2 = vweird.f32 %v532_v10 }
 0x267   :  { %v542_v49 = vand.u32 2147483647, %v532_v10 }
 0x268   :  { %v517_v6 = vadd.f32 %v3021_v59, %v516_v4  ;;  %v545_v56 = vor.u32 1.1754944e-38, %v544_v45 }
 0x269   :  { %vm543_vm4 = vcmp.eq.f32.partialorder %v542_v49, 8.507059e+37 }
 0x26a   :  { %v521_v8 = vsel %vm520_vm13, %v3021_v59, %v517_v6 }
 0x26b   :  { %v526_v7 = vsel %vm523_vm14, %v525_v60, %v521_v8 }
 0x26c   :  { %v554_v47 = vmul.f32 %v3023_v58, %v526_v7  ;;  %v3027_v11 = vpop.eup %3026  ;;  %v553_v34 = vmul.f32 %v551_v19, %v526_v7 }
 0x26d   :  { %v534_v13 = vmul.f32 %v3027_v11, %v532_v10  ;;  %vm539_vm15 = vweird.f32 %v3027_v11 }
 0x26e   :  { %556 = vrot.lane.b32.xlu2 %v554_v47, %s3247_s20  ;;  %vm540_vm3 = vmor %vm538_vm2, %vm539_vm15 }
 0x26f   :  { %v535_v20 = vsub.f32 1.0, %v534_v13 }
 0x271   :  { %v536_v24 = vmul.f32 %v3027_v11, %v535_v20 }
 0x273   :  { %v537_v44 = vadd.f32 %v3027_v11, %v536_v24 }
 0x275   :  { %v541_v50 = vsel %vm540_vm3, %v3027_v11, %v537_v44 }
 0x276   :  { %v546_v57 = vsel %vm543_vm4, %v545_v56, %v541_v50 }
 0x2c8   :  { %v557_v52 = vpop.permute.xlu2 %556 }
 0x2c9   :  { %v559_v40 = vadd.f32 %v557_v52, %v553_v34 }
 0x2cb   :  { %3028 = vtanh.f32 %v559_v40  ;;  %563 = vrot.lane.b32.xlu1 %v559_v40, %s3247_s20 }
 0x2d1   :  { %v3029_v51 = vpop.eup %3028 }
 0x2d2   :  { %v561_v59 = vmul.f32 %v3029_v51, %v546_v57 }
 0x2d4   :  { %568 = vrot.lane.b32.xlu0 %v561_v59, %s3247_s20 }
 0x33d   :  { %v564_v62 = vpop.permute.xlu1 %563 }
 0x33e   :  { %566 = vst.msk [vmem:[#allocation6] sm:$0xff] %vm326_vm1, %v564_v62 }
 0x345   :  { %v663_v55 = vld [vmem:[#allocation6] sm:$0xff] }
 0x346   :  { %665 = vrot.lane.b32.xlu2 %v663_v55, %s3247_s20  ;;  %v569_v12 = vpop.permute.xlu0 %568 }
 0x347   :  { %571 = vst.msk [vmem:[#allocation5] sm:$0xff] %vm326_vm1, %v569_v12 }
 0x348   :  { %572 = vst.msk [vmem:[#allocation3 + $0x8] sm:$0xff] %vm75_vm0, %v569_v12 }
 0x349   :  { %573 = vst.msk [vmem:[#allocation3 + $0x30] sm:$0xff] %vm457_vm10, %v569_v12 }
 0x34a   :  { %574 = vst.msk [vmem:[#allocation4 + $0x30] sm:$0xff] %vm75_vm0, %v569_v12 }
 0x34b   :  { %575 = vst.msk [vmem:[#allocation4 + $0x8] sm:$0xff] %vm457_vm10, %v569_v12 }
 0x34e   :  { %v578_v1 = vld [vmem:[#allocation5] sm:$0xff] }
 0x34f   :  { %2892 = vmatmul.msk.f32.vlgmr.msra.gmra.mxu0 %vm326_vm1, %v578_v1  ;;  %2893 = vmatmul.msk.f32.vlgmr.msra.gmra.mxu1 %vm326_vm1, %v578_v1 }
 0x350   :  { %1050 = vmatpush.msra.mxu0 %v3369_v14  ;;  %1070 = vmatpush.msra.mxu1 %v3379_v17 }
 0x352   :  { %1051 = vmatpush.msra.mxu0 %v3387_v18  ;;  %1071 = vmatpush.msra.mxu1 %v3399_v21 }
 0x354   :  { %1052 = vmatpush.msra.mxu0 %v3404_v22  ;;  %1072 = vmatpush.msra.mxu1 %v3438_v29 }
 0x356   :  { %1053 = vmatpush.msra.mxu0 %v3417_v25  ;;  %1073 = vmatpush.msra.mxu1 %v3450_v31 }
 0x358   :  { %1054 = vmatpush.msra.mxu0 %v3433_v28  ;;  %1074 = vmatpush.msra.mxu1 %v3457_v32 }
 0x35a   :  { %1055 = vmatpush.msra.mxu0 %v3445_v30  ;;  %1075 = vmatpush.msra.mxu1 %v3477_v36 }
 0x35c   :  { %1056 = vmatpush.msra.mxu0 %v3472_v35  ;;  %1076 = vmatpush.msra.mxu1 %v3488_v37 }
 0x35e   :  { %1057 = vmatpush.msra.mxu0 %v3493_v38  ;;  %1077 = vmatpush.msra.mxu1 %v3501_v39 }
 0x3a0   :  { %v666_v56 = vpop.permute.xlu2 %665 }
 0x3cc   :  { %v599_v4 = vpop.f32.mrf.mxu0  ;;  %v619_v58 = vpop.f32.mrf.mxu1 }
 0x3cd   :  { %v622_v5 = vadd.f32 %v599_v4, %v3651_v42  ;;  %v623_v47 = vadd.f32 %v619_v58, %v3648_v23 }
 0x3cf   :  { %v2894_v6 = vmul.f32 -1.442695, %v622_v5  ;;  %v2895_v40 = vmul.f32 -1.442695, %v623_v47 }
 0x3d1   :  { %3030 = vpow2.f32 %v2894_v6 }
 0x3d7   :  { %v3031_v60 = vpop.eup %3030 }
 0x3d8   :  { %v627_v8 = vadd.f32 1.0, %v3031_v60 }
 0x3da   :  { %3032 = vrcp.f32 %v627_v8  ;;  %v639_v10 = vand.u32 2147483648, %v627_v8  ;;  %v637_v13 = vand.u32 2147483647, %v627_v8  ;;  %vm633_vm6 = vweird.f32 %v627_v8 }
 0x3db   :  { %3034 = vtanh.f32 %v623_v47 }
 0x3dc   :  { %v640_v42 = vor.u32 1.1754944e-38, %v639_v10  ;;  %vm638_vm8 = vcmp.eq.f32.partialorder %v637_v13, 8.507059e+37  ;;  %3036 = vpow2.f32 %v2895_v40 }
 0x3e0   :  { %v3033_v7 = vpop.eup %3032 }
 0x3e1   :  { %v629_v0 = vmul.f32 %v3033_v7, %v627_v8  ;;  %vm634_vm5 = vweird.f32 %v3033_v7  ;;  %v3035_v24 = vpop.eup %3034 }
 0x3e2   :  { %vm635_vm7 = vmor %vm633_vm6, %vm634_vm5  ;;  %v3037_v23 = vpop.eup %3036 }
 0x3e3   :  { %v630_v9 = vsub.f32 1.0, %v629_v0  ;;  %v647_v44 = vadd.f32 1.0, %v3037_v23 }
 0x3e5   :  { %v631_v11 = vmul.f32 %v3033_v7, %v630_v9  ;;  %3038 = vrcp.f32 %v647_v44  ;;  %v659_v12 = vand.u32 2147483648, %v647_v44  ;;  %vm653_vm11 = vweird.f32 %v647_v44 }
 0x3e6   :  { %v657_v1 = vand.u32 2147483647, %v647_v44 }
 0x3e7   :  { %v632_v19 = vadd.f32 %v3033_v7, %v631_v11  ;;  %v660_v5 = vor.u32 1.1754944e-38, %v659_v12 }
 0x3e8   :  { %vm658_vm13 = vcmp.eq.f32.partialorder %v657_v1, 8.507059e+37 }
 0x3e9   :  { %v636_v20 = vsel %vm635_vm7, %v3033_v7, %v632_v19 }
 0x3ea   :  { %v641_v34 = vsel %vm638_vm8, %v640_v42, %v636_v20 }
 0x3eb   :  { %v669_v52 = vmul.f32 %v3035_v24, %v641_v34  ;;  %v3039_v45 = vpop.eup %3038  ;;  %v668_v57 = vmul.f32 %v666_v56, %v641_v34 }
 0x3ec   :  { %v649_v49 = vmul.f32 %v3039_v45, %v647_v44  ;;  %vm654_vm9 = vweird.f32 %v3039_v45 }
 0x3ed   :  { %671 = vrot.lane.b32.xlu0 %v669_v52, %s3247_s20  ;;  %vm655_vm12 = vmor %vm653_vm11, %vm654_vm9 }
 0x3ee   :  { %v650_v50 = vsub.f32 1.0, %v649_v49 }
 0x3f0   :  { %v651_v51 = vmul.f32 %v3039_v45, %v650_v50 }
 0x3f2   :  { %v652_v55 = vadd.f32 %v3039_v45, %v651_v51 }
 0x3f4   :  { %v656_v4 = vsel %vm655_vm12, %v3039_v45, %v652_v55 }
 0x3f5   :  { %v661_v60 = vsel %vm658_vm13, %v660_v5, %v656_v4 }
 0x45f   :  { %v672_v59 = vpop.permute.xlu0 %671 }
 0x460   :  { %v674_v62 = vadd.f32 %v672_v59, %v668_v57 }
 0x462   :  { %3040 = vtanh.f32 %v674_v62  ;;  %678 = vrot.lane.b32.xlu2 %v674_v62, %s3247_s20 }
 0x468   :  { %v3041_v6 = vpop.eup %3040 }
 0x469   :  { %v676_v8 = vmul.f32 %v3041_v6, %v661_v60 }
 0x46b   :  { %683 = vrot.lane.b32.xlu1 %v676_v8, %s3247_s20 }
 0x4bc   :  { %v679_v58 = vpop.permute.xlu2 %678 }
 0x4bd   :  { %681 = vst.msk [vmem:[#allocation6] sm:$0xff] %vm326_vm1, %v679_v58 }
 0x4c4   :  { %v778_v7 = vld [vmem:[#allocation6] sm:$0xff] }
 0x4c5   :  { %780 = vrot.lane.b32.xlu0 %v778_v7, %s3247_s20 }
 0x4dd   :  { %v684_v47 = vpop.permute.xlu1 %683 }
 0x4de   :  { %686 = vst.msk [vmem:[#allocation5] sm:$0xff] %vm326_vm1, %v684_v47 }
 0x4df   :  { %687 = vst.msk [vmem:[#allocation3 + $0x10] sm:$0xff] %vm75_vm0, %v684_v47 }
 0x4e0   :  { %688 = vst.msk [vmem:[#allocation3 + $0x28] sm:$0xff] %vm457_vm10, %v684_v47 }
 0x4e1   :  { %689 = vst.msk [vmem:[#allocation4 + $0x28] sm:$0xff] %vm75_vm0, %v684_v47 }
 0x4e2   :  { %690 = vst.msk [vmem:[#allocation4 + $0x10] sm:$0xff] %vm457_vm10, %v684_v47 }
 0x4e5   :  { %v693_v0 = vld [vmem:[#allocation5] sm:$0xff] }
 0x4e6   :  { %2896 = vmatmul.msk.f32.vlgmr.msrb.gmra.mxu2 %vm326_vm1, %v693_v0  ;;  %2897 = vmatmul.msk.f32.vlgmr.msrb.gmra.mxu3 %vm326_vm1, %v693_v0 }
 0x4e7   :  { %1165 = vmatpush.msrb.mxu2 %v3369_v14  ;;  %1185 = vmatpush.msrb.mxu3 %v3379_v17 }
 0x4e9   :  { %1166 = vmatpush.msrb.mxu2 %v3387_v18  ;;  %1186 = vmatpush.msrb.mxu3 %v3399_v21 }
 0x4eb   :  { %1167 = vmatpush.msrb.mxu2 %v3404_v22  ;;  %1187 = vmatpush.msrb.mxu3 %v3438_v29 }
 0x4ed   :  { %1168 = vmatpush.msrb.mxu2 %v3417_v25  ;;  %1188 = vmatpush.msrb.mxu3 %v3450_v31 }
 0x4ef   :  { %1169 = vmatpush.msrb.mxu2 %v3433_v28  ;;  %1189 = vmatpush.msrb.mxu3 %v3457_v32 }
 0x4f1   :  { %1170 = vmatpush.msrb.mxu2 %v3445_v30  ;;  %1190 = vmatpush.msrb.mxu3 %v3477_v36 }
 0x4f3   :  { %1171 = vmatpush.msrb.mxu2 %v3472_v35  ;;  %1191 = vmatpush.msrb.mxu3 %v3488_v37 }
 0x4f5   :  { %1172 = vmatpush.msrb.mxu2 %v3493_v38  ;;  %1192 = vmatpush.msrb.mxu3 %v3501_v39 }
 0x537   :  { %v781_v24 = vpop.permute.xlu0 %780 }
 0x569   :  { %v714_v14 = vpop.f32.mrf.mxu2  ;;  %v734_v25 = vpop.f32.mrf.mxu3 }
 0x56a   :  { %v737_v17 = vadd.f32 %v714_v14, %v3658_v54  ;;  %v738_v29 = vadd.f32 %v734_v25, %v3654_v43 }
 0x56c   :  { %v2898_v18 = vmul.f32 -1.442695, %v737_v17  ;;  %v2899_v11 = vmul.f32 -1.442695, %v738_v29 }
 0x56e   :  { %3042 = vpow2.f32 %v2898_v18 }
 0x574   :  { %v3043_v21 = vpop.eup %3042 }
 0x575   :  { %v742_v22 = vadd.f32 1.0, %v3043_v21 }
 0x577   :  { %3044 = vrcp.f32 %v742_v22  ;;  %v754_v32 = vand.u32 2147483648, %v742_v22  ;;  %v752_v36 = vand.u32 2147483647, %v742_v22  ;;  %vm748_vm15 = vweird.f32 %v742_v22 }
 0x578   :  { %3046 = vtanh.f32 %v738_v29 }
 0x579   :  { %v755_v38 = vor.u32 1.1754944e-38, %v754_v32  ;;  %vm753_vm3 = vcmp.eq.f32.partialorder %v752_v36, 8.507059e+37  ;;  %3048 = vpow2.f32 %v2899_v11 }
 0x57d   :  { %v3045_v28 = vpop.eup %3044 }
 0x57e   :  { %v744_v30 = vmul.f32 %v3045_v28, %v742_v22  ;;  %vm749_vm14 = vweird.f32 %v3045_v28  ;;  %v3047_v54 = vpop.eup %3046 }
 0x57f   :  { %vm750_vm2 = vmor %vm748_vm15, %vm749_vm14  ;;  %v3049_v43 = vpop.eup %3048 }
 0x580   :  { %v745_v31 = vsub.f32 1.0, %v744_v30  ;;  %v762_v13 = vadd.f32 1.0, %v3049_v43 }
 0x582   :  { %v746_v35 = vmul.f32 %v3045_v28, %v745_v31  ;;  %3050 = vrcp.f32 %v762_v13  ;;  %v774_v45 = vand.u32 2147483648, %v762_v13  ;;  %vm768_vm5 = vweird.f32 %v762_v13 }
 0x583   :  { %v772_v49 = vand.u32 2147483647, %v762_v13 }
 0x584   :  { %v747_v37 = vadd.f32 %v3045_v28, %v746_v35  ;;  %v775_v56 = vor.u32 1.1754944e-38, %v774_v45 }
 0x585   :  { %vm773_vm7 = vcmp.eq.f32.partialorder %v772_v49, 8.507059e+37 }
 0x586   :  { %v751_v39 = vsel %vm750_vm2, %v3045_v28, %v747_v37 }
 0x587   :  { %v756_v9 = vsel %vm753_vm3, %v755_v38, %v751_v39 }
 0x588   :  { %v784_v10 = vmul.f32 %v3047_v54, %v756_v9  ;;  %v3051_v19 = vpop.eup %3050  ;;  %v783_v52 = vmul.f32 %v781_v24, %v756_v9 }
 0x589   :  { %v764_v42 = vmul.f32 %v3051_v19, %v762_v13  ;;  %vm769_vm4 = vweird.f32 %v3051_v19 }
 0x58a   :  { %786 = vrot.lane.b32.xlu1 %v784_v10, %s3247_s20  ;;  %vm770_vm6 = vmor %vm768_vm5, %vm769_vm4 }
 0x58b   :  { %v765_v20 = vsub.f32 1.0, %v764_v42 }
 0x58d   :  { %v766_v34 = vmul.f32 %v3051_v19, %v765_v20 }
 0x58f   :  { %v767_v44 = vadd.f32 %v3051_v19, %v766_v34 }
 0x591   :  { %v771_v50 = vsel %vm770_vm6, %v3051_v19, %v767_v44 }
 0x592   :  { %v776_v57 = vsel %vm773_vm7, %v775_v56, %v771_v50 }
 0x5fc   :  { %v787_v40 = vpop.permute.xlu1 %786 }
 0x5fd   :  { %v789_v23 = vadd.f32 %v787_v40, %v783_v52 }
 0x5ff   :  { %3052 = vtanh.f32 %v789_v23  ;;  %793 = vrot.lane.b32.xlu0 %v789_v23, %s3247_s20 }
 0x605   :  { %v3053_v51 = vpop.eup %3052 }
 0x606   :  { %v791_v59 = vmul.f32 %v3053_v51, %v776_v57 }
 0x608   :  { %798 = vrot.lane.b32.xlu2 %v791_v59, %s3247_s20 }
 0x662   :  { %v799_v62 = vpop.permute.xlu2 %798 }
 0x663   :  { %801 = vst.msk [vmem:[#allocation5] sm:$0xff] %vm326_vm1, %v799_v62 }
 0x664   :  { %802 = vst.msk [vmem:[#allocation3 + $0x18] sm:$0xff] %vm75_vm0, %v799_v62 }
 0x665   :  { %803 = vst.msk [vmem:[#allocation3 + $0x20] sm:$0xff] %vm457_vm10, %v799_v62 }
 0x666   :  { %804 = vst.msk [vmem:[#allocation4 + $0x20] sm:$0xff] %vm75_vm0, %v799_v62 }
 0x667   :  { %805 = vst.msk [vmem:[#allocation4 + $0x18] sm:$0xff] %vm457_vm10, %v799_v62 }
 0x66a   :  { %v808_v55 = vld [vmem:[#allocation5] sm:$0xff] }
 0x66b   :  { %2900 = vmatmul.msk.f32.vlgmr.msrb.gmra.mxu0 %vm326_vm1, %v808_v55  ;;  %2901 = vmatmul.msk.f32.vlgmr.msrb.gmra.mxu1 %vm326_vm1, %v808_v55 }
 0x671   :  { %v794_v12 = vpop.permute.xlu0 %793 }
 0x672   :  { %796 = vst.msk [vmem:[#allocation6] sm:$0xff] %vm326_vm1, %v794_v12 }
 0x679   :  { %v893_v1 = vld [vmem:[#allocation6] sm:$0xff] }
 0x67a   :  { %895 = vrot.lane.b32.xlu1 %v893_v1, %s3247_s20 }
 0x6e8   :  { %v829_v4 = vpop.f32.mrf.mxu0  ;;  %v849_v58 = vpop.f32.mrf.mxu1 }
 0x6e9   :  { %v852_v5 = vadd.f32 %v829_v4, %v3666_v27  ;;  %v853_v47 = vadd.f32 %v849_v58, %v3661_v2 }
 0x6eb   :  { %v2902_v6 = vmul.f32 -1.442695, %v852_v5  ;;  %v2903_v31 = vmul.f32 -1.442695, %v853_v47 }
 0x6ec   :  { %v896_v38 = vpop.permute.xlu1 %895 }
 0x6ed   :  { %3054 = vpow2.f32 %v2902_v6 }
 0x6f3   :  { %v3055_v60 = vpop.eup %3054 }
 0x6f4   :  { %v857_v8 = vadd.f32 1.0, %v3055_v60 }
 0x6f6   :  { %3056 = vrcp.f32 %v857_v8  ;;  %v869_v17 = vand.u32 2147483648, %v857_v8  ;;  %v867_v21 = vand.u32 2147483647, %v857_v8  ;;  %vm863_vm9 = vweird.f32 %v857_v8 }
 0x6f7   :  { %3058 = vtanh.f32 %v853_v47 }
 0x6f8   :  { %v870_v27 = vor.u32 1.1754944e-38, %v869_v17  ;;  %vm868_vm12 = vcmp.eq.f32.partialorder %v867_v21, 8.507059e+37  ;;  %3060 = vpow2.f32 %v2903_v31 }
 0x6fc   :  { %v3057_v7 = vpop.eup %3056 }
 0x6fd   :  { %v859_v0 = vmul.f32 %v3057_v7, %v857_v8  ;;  %vm864_vm8 = vweird.f32 %v3057_v7  ;;  %v3059_v28 = vpop.eup %3058 }
 0x6fe   :  { %vm865_vm11 = vmor %vm863_vm9, %vm864_vm8  ;;  %v3061_v2 = vpop.eup %3060 }
 0x6ff   :  { %v860_v14 = vsub.f32 1.0, %v859_v0  ;;  %v877_v32 = vadd.f32 1.0, %v3061_v2 }
 0x701   :  { %v861_v18 = vmul.f32 %v3057_v7, %v860_v14  ;;  %3062 = vrcp.f32 %v877_v32  ;;  %v889_v43 = vand.u32 2147483648, %v877_v32  ;;  %vm883_vm14 = vweird.f32 %v877_v32 }
 0x702   :  { %v887_v13 = vand.u32 2147483647, %v877_v32 }
 0x703   :  { %v862_v22 = vadd.f32 %v3057_v7, %v861_v18  ;;  %v890_v42 = vor.u32 1.1754944e-38, %v889_v43 }
 0x704   :  { %vm888_vm2 = vcmp.eq.f32.partialorder %v887_v13, 8.507059e+37 }
 0x705   :  { %v866_v25 = vsel %vm865_vm11, %v3057_v7, %v862_v22 }
 0x706   :  { %v871_v29 = vsel %vm868_vm12, %v870_v27, %v866_v25 }
 0x707   :  { %v899_v30 = vmul.f32 %v3059_v28, %v871_v29  ;;  %v3063_v35 = vpop.eup %3062  ;;  %v898_v54 = vmul.f32 %v896_v38, %v871_v29 }
 0x708   :  { %v879_v36 = vmul.f32 %v3063_v35, %v877_v32  ;;  %vm884_vm13 = vweird.f32 %v3063_v35 }
 0x709   :  { %901 = vrot.lane.b32.xlu2 %v899_v30, %s3247_s20  ;;  %vm885_vm15 = vmor %vm883_vm14, %vm884_vm13 }
 0x70a   :  { %v880_v37 = vsub.f32 1.0, %v879_v36 }
 0x70c   :  { %v881_v39 = vmul.f32 %v3063_v35, %v880_v37 }
 0x70e   :  { %v882_v11 = vadd.f32 %v3063_v35, %v881_v39 }
 0x710   :  { %v886_v19 = vsel %vm885_vm15, %v3063_v35, %v882_v11 }
 0x711   :  { %v891_v24 = vsel %vm888_vm2, %v890_v42, %v886_v19 }
 0x763   :  { %v902_v9 = vpop.permute.xlu2 %901 }
 0x764   :  { %v904_v10 = vadd.f32 %v902_v9, %v898_v54 }
 0x766   :  { %3064 = vtanh.f32 %v904_v10  ;;  %908 = vrot.lane.b32.xlu1 %v904_v10, %s3247_s20 }
 0x76c   :  { %v3065_v20 = vpop.eup %3064 }
 0x76d   :  { %v906_v34 = vmul.f32 %v3065_v20, %v891_v24 }
 0x76f   :  { %913 = vrot.lane.b32.xlu0 %v906_v34, %s3247_s20 }
 0x7d8   :  { %v909_v52 = vpop.permute.xlu1 %908 }
 0x7d9   :  { %911 = vst.msk [vmem:[#allocation6] sm:$0xff] %vm326_vm1, %v909_v52 }
 0x7e0   :  { %v1008_v40 = vld [vmem:[#allocation6] sm:$0xff] }
 0x7e1   :  { %1010 = vrot.lane.b32.xlu2 %v1008_v40, %s3247_s20  ;;  %v914_v23 = vpop.permute.xlu0 %913 }
 0x7e2   :  { %916 = vst.msk [vmem:[#allocation5] sm:$0xff] %vm326_vm1, %v914_v23 }
 0x7e3   :  { %917 = vst.msk [vmem:[#allocation3 + $0x20] sm:$0xff] %vm75_vm0, %v914_v23 }
 0x7e4   :  { %918 = vst.msk [vmem:[#allocation3 + $0x18] sm:$0xff] %vm457_vm10, %v914_v23 }
 0x7e5   :  { %919 = vst.msk [vmem:[#allocation4 + $0x18] sm:$0xff] %vm75_vm0, %v914_v23 }
 0x7e6   :  { %920 = vst.msk [vmem:[#allocation4 + $0x20] sm:$0xff] %vm457_vm10, %v914_v23 }
 0x7e9   :  { %v923_v44 = vld [vmem:[#allocation5] sm:$0xff] }
 0x7ea   :  { %2904 = vmatmul.msk.f32.vlgmr.msra.gmra.mxu2 %vm326_vm1, %v923_v44  ;;  %2905 = vmatmul.msk.f32.vlgmr.msra.gmra.mxu3 %vm326_vm1, %v923_v44 }
 0x83b   :  { %v1011_v21 = vpop.permute.xlu2 %1010 }
 0x86d   :  { %v944_v45 = vpop.f32.mrf.mxu2  ;;  %v964_v57 = vpop.f32.mrf.mxu3 }
 0x86e   :  { %v967_v49 = vadd.f32 %v944_v45, %v3675_v41  ;;  %v968_v62 = vadd.f32 %v964_v57, %v3669_v33 }
 0x870   :  { %v2906_v50 = vmul.f32 -1.442695, %v967_v49  ;;  %v2907_v47 = vmul.f32 -1.442695, %v968_v62 }
 0x872   :  { %3066 = vpow2.f32 %v2906_v50 }
 0x878   :  { %v3067_v56 = vpop.eup %3066 }
 0x879   :  { %v972_v51 = vadd.f32 1.0, %v3067_v56 }
 0x87b   :  { %3068 = vrcp.f32 %v972_v51  ;;  %v984_v1 = vand.u32 2147483648, %v972_v51  ;;  %v982_v5 = vand.u32 2147483647, %v972_v51  ;;  %vm978_vm4 = vweird.f32 %v972_v51 }
 0x87c   :  { %3070 = vtanh.f32 %v968_v62 }
 0x87d   :  { %v985_v41 = vor.u32 1.1754944e-38, %v984_v1  ;;  %vm983_vm6 = vcmp.eq.f32.partialorder %v982_v5, 8.507059e+37  ;;  %3072 = vpow2.f32 %v2907_v47 }
 0x881   :  { %v3069_v59 = vpop.eup %3068 }
 0x882   :  { %v974_v55 = vmul.f32 %v3069_v59, %v972_v51  ;;  %vm979_vm3 = vweird.f32 %v3069_v59  ;;  %v3071_v8 = vpop.eup %3070 }
 0x883   :  { %vm980_vm5 = vmor %vm978_vm4, %vm979_vm3  ;;  %v3073_v33 = vpop.eup %3072 }
 0x884   :  { %v975_v12 = vsub.f32 1.0, %v974_v55  ;;  %v992_v0 = vadd.f32 1.0, %v3073_v33 }
 0x886   :  { %v976_v4 = vmul.f32 %v3069_v59, %v975_v12  ;;  %3074 = vrcp.f32 %v992_v0  ;;  %v1004_v30 = vand.u32 2147483648, %v992_v0  ;;  %vm998_vm8 = vweird.f32 %v992_v0 }
 0x887   :  { %v1002_v31 = vand.u32 2147483647, %v992_v0 }
 0x888   :  { %v977_v6 = vadd.f32 %v3069_v59, %v976_v4  ;;  %v1005_v32 = vor.u32 1.1754944e-38, %v1004_v30 }
 0x889   :  { %vm1003_vm11 = vcmp.eq.f32.partialorder %v1002_v31, 8.507059e+37 }
 0x88a   :  { %v981_v60 = vsel %vm980_vm5, %v3069_v59, %v977_v6 }
 0x88b   :  { %v986_v58 = vsel %vm983_vm6, %v985_v41, %v981_v60 }
 0x88c   :  { %v1014_v7 = vmul.f32 %v3071_v8, %v986_v58  ;;  %v3075_v14 = vpop.eup %3074  ;;  %v1013_v27 = vmul.f32 %v1011_v21, %v986_v58 }
 0x88d   :  { %v994_v17 = vmul.f32 %v3075_v14, %v992_v0  ;;  %vm999_vm7 = vweird.f32 %v3075_v14 }
 0x88e   :  { %1016 = vrot.lane.b32.xlu0 %v1014_v7, %s3247_s20  ;;  %vm1000_vm9 = vmor %vm998_vm8, %vm999_vm7 }
 0x88f   :  { %v995_v18 = vsub.f32 1.0, %v994_v17 }
 0x891   :  { %v996_v22 = vmul.f32 %v3075_v14, %v995_v18 }
 0x893   :  { %v997_v29 = vadd.f32 %v3075_v14, %v996_v22 }
 0x895   :  { %v1001_v2 = vsel %vm1000_vm9, %v3075_v14, %v997_v29 }
 0x896   :  { %v1006_v36 = vsel %vm1003_vm11, %v1005_v32, %v1001_v2  ;;  %v286_v32 = vadd.f32 %v3716_v48, %v3631_v61 }
 0x900   :  { %v1017_v25 = vpop.permute.xlu0 %1016 }
 0x901   :  { %v1019_v28 = vadd.f32 %v1017_v25, %v1013_v27  ;;  %v245_v27 = vadd.f32 %v3711_v26, %v3633_v63 }
 0x903   :  { %3076 = vtanh.f32 %v1019_v28  ;;  %1023 = vrot.lane.b32.xlu2 %v1019_v28, %s3247_s20  ;;  %v308_v25 = vadd.f32 %v3638_v3, %v245_v27  ;;  %v1303_v27 = vld [vmem:[%s4529_s7 + $0x28] sm:$0xff] }
 0x909   :  { %v3077_v35 = vpop.eup %3076 }
 0x90a   :  { %v1021_v37 = vmul.f32 %v3077_v35, %v1006_v36  ;;  %v309_v36 = vadd.f32 %v3645_v16, %v286_v32  ;;  %v1298_v32 = vld [vmem:[%s4529_s7] sm:$0xff] }
 0x90c   :  { %1028 = vrot.lane.b32.xlu1 %v1021_v37, %s3247_s20 }
 0x95d   :  { %v1024_v38 = vpop.permute.xlu2 %1023 }
 0x95e   :  { %1026 = vst.msk [vmem:[#allocation6] sm:$0xff] %vm326_vm1, %v1024_v38 }
 0x965   :  { %v1123_v39 = vld [vmem:[#allocation6] sm:$0xff] }
 0x966   :  { %1125 = vrot.lane.b32.xlu0 %v1123_v39, %s3247_s20 }
 0x97e   :  { %v1029_v54 = vpop.permute.xlu1 %1028 }
 0x97f   :  { %1031 = vst.msk [vmem:[#allocation5] sm:$0xff] %vm326_vm1, %v1029_v54 }
 0x980   :  { %1032 = vst.msk [vmem:[#allocation3 + $0x28] sm:$0xff] %vm75_vm0, %v1029_v54 }
 0x981   :  { %1033 = vst.msk [vmem:[#allocation3 + $0x10] sm:$0xff] %vm457_vm10, %v1029_v54 }
 0x982   :  { %1034 = vst.msk [vmem:[#allocation4 + $0x10] sm:$0xff] %vm75_vm0, %v1029_v54 }
 0x983   :  { %1035 = vst.msk [vmem:[#allocation4 + $0x28] sm:$0xff] %vm457_vm10, %v1029_v54 }
 0x986   :  { %v1038_v9 = vld [vmem:[#allocation5] sm:$0xff] }
 0x987   :  { %2908 = vmatmul.msk.f32.vlgmr.msra.gmra.mxu0 %vm326_vm1, %v1038_v9  ;;  %2909 = vmatmul.msk.f32.vlgmr.msra.gmra.mxu1 %vm326_vm1, %v1038_v9 }
 0x9d8   :  { %v1126_v1 = vpop.permute.xlu0 %1125 }
 0xa04   :  { %v1059_v10 = vpop.f32.mrf.mxu0  ;;  %v1079_v42 = vpop.f32.mrf.mxu1 }
 0xa05   :  { %v1082_v11 = vadd.f32 %v1059_v10, %v3682_v46  ;;  %v1083_v24 = vadd.f32 %v1079_v42, %v3678_v53 }
 0xa07   :  { %v2910_v43 = vmul.f32 -1.442695, %v1082_v11  ;;  %v2911_v57 = vmul.f32 -1.442695, %v1083_v24 }
 0xa09   :  { %3078 = vpow2.f32 %v2910_v43 }
 0xa0f   :  { %v3079_v13 = vpop.eup %3078 }
 0xa10   :  { %v1087_v19 = vadd.f32 1.0, %v3079_v13 }
 0xa12   :  { %3080 = vrcp.f32 %v1087_v19  ;;  %v1099_v40 = vand.u32 2147483648, %v1087_v19  ;;  %v1097_v44 = vand.u32 2147483647, %v1087_v19  ;;  %vm1093_vm13 = vweird.f32 %v1087_v19 }
 0xa13   :  { %3082 = vtanh.f32 %v1083_v24 }
 0xa14   :  { %v1100_v46 = vor.u32 1.1754944e-38, %v1099_v40  ;;  %vm1098_vm15 = vcmp.eq.f32.partialorder %v1097_v44, 8.507059e+37  ;;  %3084 = vpow2.f32 %v2911_v57 }
 0xa18   :  { %v3081_v20 = vpop.eup %3080 }
 0xa19   :  { %v1089_v34 = vmul.f32 %v3081_v20, %v1087_v19  ;;  %vm1094_vm12 = vweird.f32 %v3081_v20  ;;  %v3083_v50 = vpop.eup %3082 }
 0xa1a   :  { %vm1095_vm14 = vmor %vm1093_vm13, %vm1094_vm12  ;;  %v3085_v53 = vpop.eup %3084 }
 0xa1b   :  { %v1090_v52 = vsub.f32 1.0, %v1089_v34  ;;  %v1107_v59 = vadd.f32 1.0, %v3085_v53 }
 0xa1d   :  { %v1091_v23 = vmul.f32 %v3081_v20, %v1090_v52  ;;  %3086 = vrcp.f32 %v1107_v59  ;;  %v1119_v8 = vand.u32 2147483648, %v1107_v59  ;;  %vm1113_vm3 = vweird.f32 %v1107_v59 }
 0xa1e   :  { %v1117_v58 = vand.u32 2147483647, %v1107_v59 }
 0xa1f   :  { %v1092_v45 = vadd.f32 %v3081_v20, %v1091_v23  ;;  %v1120_v47 = vor.u32 1.1754944e-38, %v1119_v8  ;;  %v1284_v8 = vld [vmem:[%s4530_s6 + $0x50] sm:$0xff] }
 0xa20   :  { %vm1118_vm5 = vcmp.eq.f32.partialorder %v1117_v58, 8.507059e+37  ;;  %v1285_v58 = vld [vmem:[%s4530_s6 + $0x58] sm:$0xff] }
 0xa21   :  { %v1096_v49 = vsel %vm1095_vm14, %v3081_v20, %v1092_v45 }
 0xa22   :  { %v1101_v56 = vsel %vm1098_vm15, %v1100_v46, %v1096_v49 }
 0xa23   :  { %v1129_v51 = vmul.f32 %v3083_v50, %v1101_v56  ;;  %v3087_v62 = vpop.eup %3086  ;;  %v1128_v5 = vmul.f32 %v1126_v1, %v1101_v56  ;;  %v1310_v1 = vld [vmem:[%s4529_s7 + $0x60] sm:$0xff] }
 0xa24   :  { %v1109_v55 = vmul.f32 %v3087_v62, %v1107_v59  ;;  %vm1114_vm2 = vweird.f32 %v3087_v62  ;;  %v1312_v59 = vld [vmem:[%s4529_s7 + $0x70] sm:$0xff] }
 0xa25   :  { %1131 = vrot.lane.b32.xlu1 %v1129_v51, %s3247_s20  ;;  %vm1115_vm4 = vmor %vm1113_vm3, %vm1114_vm2  ;;  %1346 = vmatpush.msrb.mxu0 %v1312_v59 }
 0xa26   :  { %v1110_v12 = vsub.f32 1.0, %v1109_v55  ;;  %v1288_v55 = vld [vmem:[%s4530_s6 + $0x70] sm:$0xff] }
 0xa27   :  { %1452 = vmatpush.msra.mxu2 %v1288_v55  ;;  %1347 = vmatpush.msrb.mxu0 %v1310_v1 }
 0xa28   :  { %v1111_v4 = vmul.f32 %v3087_v62, %v1110_v12  ;;  %v1289_v12 = vld [vmem:[%s4530_s6 + $0x78] sm:$0xff] }
 0xa29   :  { %1493 = vmatpush.msra.mxu3 %v1289_v12 }
 0xa2a   :  { %v1112_v60 = vadd.f32 %v3087_v62, %v1111_v4  ;;  %v1311_v4 = vld [vmem:[%s4529_s7 + $0x68] sm:$0xff] }
 0xa2c   :  { %v1116_v7 = vsel %vm1115_vm4, %v3087_v62, %v1112_v60  ;;  %v1313_v62 = vld [vmem:[%s4529_s7 + $0x78] sm:$0xff] }
 0xa2d   :  { %v1121_v0 = vsel %vm1118_vm5, %v1120_v47, %v1116_v7  ;;  %1387 = vmatpush.msrb.mxu1 %v1313_v62  ;;  %v1309_v60 = vld [vmem:[%s4529_s7 + $0x58] sm:$0xff]  ;;  %v1306_v7 = vld [vmem:[%s4529_s7 + $0x40] sm:$0xff]  ;;  %v1307_v47 = vld [vmem:[%s4529_s7 + $0x48] sm:$0xff] }
 0xa2f   :  { %1388 = vmatpush.msrb.mxu1 %v1311_v4 }
 0xa31   :  { %1389 = vmatpush.msrb.mxu1 %v1309_v60 }
 0xa33   :  { %1390 = vmatpush.msrb.mxu1 %v1307_v47 }
 0xa97   :  { %v1132_v6 = vpop.permute.xlu1 %1131 }
 0xa98   :  { %v1134_v41 = vadd.f32 %v1132_v6, %v1128_v5  ;;  %v1286_v5 = vld [vmem:[%s4530_s6 + $0x60] sm:$0xff]  ;;  %v1287_v6 = vld [vmem:[%s4530_s6 + $0x68] sm:$0xff] }
 0xa99   :  { %1453 = vmatpush.msra.mxu2 %v1286_v5  ;;  %1494 = vmatpush.msra.mxu3 %v1287_v6 }
 0xa9a   :  { %3088 = vtanh.f32 %v1134_v41  ;;  %1138 = vrot.lane.b32.xlu0 %v1134_v41, %s3247_s20  ;;  %v1308_v41 = vld [vmem:[%s4529_s7 + $0x50] sm:$0xff] }
 0xa9b   :  { %1348 = vmatpush.msrb.mxu0 %v1308_v41  ;;  %1454 = vmatpush.msra.mxu2 %v1284_v8  ;;  %v1526_v8 = vld [vmem:[%s4532_s9] sm:$0x3] }
 0xa9c   :  { %1495 = vmatpush.msra.mxu3 %v1285_v58 }
 0xa9d   :  { %1349 = vmatpush.msrb.mxu0 %v1306_v7 }
 0xaa0   :  { %v3089_v33 = vpop.eup %3088 }
 0xaa1   :  { %v1136_v14 = vmul.f32 %v3089_v33, %v1121_v0  ;;  %v1282_v33 = vld [vmem:[%s4530_s6 + $0x40] sm:$0xff]  ;;  %v1283_v0 = vld [vmem:[%s4530_s6 + $0x48] sm:$0xff] }
 0xaa2   :  { %1455 = vmatpush.msra.mxu2 %v1282_v33  ;;  %1496 = vmatpush.msra.mxu3 %v1283_v0  ;;  %v1528_v0 = vperm.slane %v1526_v8, 0 }
 0xaa3   :  { %1143 = vrot.lane.b32.xlu2 %v1136_v14, %s3247_s20  ;;  %v1304_v14 = vld [vmem:[%s4529_s7 + $0x30] sm:$0xff] }
 0xaa4   :  { %1350 = vmatpush.msrb.mxu0 %v1304_v14  ;;  %v1529_v14 = vperm.slane %v1526_v8, 1 }
 0xafd   :  { %v1144_v17 = vpop.permute.xlu2 %1143 }
 0xafe   :  { %1146 = vst.msk [vmem:[#allocation5] sm:$0xff] %vm326_vm1, %v1144_v17 }
 0xaff   :  { %1147 = vst.msk [vmem:[#allocation3 + $0x30] sm:$0xff] %vm75_vm0, %v1144_v17 }
 0xb00   :  { %1148 = vst.msk [vmem:[#allocation3 + $0x8] sm:$0xff] %vm457_vm10, %v1144_v17 }
 0xb01   :  { %1149 = vst.msk [vmem:[#allocation4 + $0x8] sm:$0xff] %vm75_vm0, %v1144_v17 }
 0xb02   :  { %1150 = vst.msk [vmem:[#allocation4 + $0x30] sm:$0xff] %vm457_vm10, %v1144_v17  ;;  %v1305_v17 = vld [vmem:[%s4529_s7 + $0x38] sm:$0xff] }
 0xb03   :  { %1391 = vmatpush.msrb.mxu1 %v1305_v17 }
 0xb05   :  { %v1153_v18 = vld [vmem:[#allocation5] sm:$0xff]  ;;  %1392 = vmatpush.msrb.mxu1 %v1303_v27 }
 0xb06   :  { %2912 = vmatmul.msk.f32.vlgmr.msrb.gmra.mxu2 %vm326_vm1, %v1153_v18  ;;  %2913 = vmatmul.msk.f32.vlgmr.msrb.gmra.mxu3 %vm326_vm1, %v1153_v18  ;;  %v1280_v18 = vld [vmem:[%s4530_s6 + $0x30] sm:$0xff] }
 0xb07   :  { %1456 = vmatpush.msra.mxu2 %v1280_v18 }
 0xb0c   :  { %v1139_v21 = vpop.permute.xlu0 %1138 }
 0xb0d   :  { %1141 = vst.msk [vmem:[#allocation6] sm:$0xff] %vm326_vm1, %v1139_v21  ;;  %v1281_v21 = vld [vmem:[%s4530_s6 + $0x38] sm:$0xff] }
 0xb0e   :  { %1497 = vmatpush.msra.mxu3 %v1281_v21 }
 0xb14   :  { %v1238_v22 = vld [vmem:[#allocation6] sm:$0xff] }
 0xb15   :  { %1240 = vrot.lane.b32.xlu1 %v1238_v22, %s3247_s20  ;;  %v1302_v22 = vld [vmem:[%s4529_s7 + $0x20] sm:$0xff] }
 0xb16   :  { %1351 = vmatpush.msrb.mxu0 %v1302_v22 }
 0xb87   :  { %v1241_v34 = vpop.permute.xlu1 %1240 }
 0xb89   :  { %v1174_v28 = vpop.f32.mrf.mxu2  ;;  %v1194_v35 = vpop.f32.mrf.mxu3 }
 0xb8a   :  { %v1197_v29 = vadd.f32 %v1174_v28, %v308_v25  ;;  %v1198_v38 = vadd.f32 %v1194_v35, %v309_v36  ;;  %v1278_v25 = vld [vmem:[%s4530_s6 + $0x20] sm:$0xff]  ;;  %v1279_v28 = vld [vmem:[%s4530_s6 + $0x28] sm:$0xff] }
 0xb8b   :  { %1457 = vmatpush.msra.mxu2 %v1278_v25  ;;  %1498 = vmatpush.msra.mxu3 %v1279_v28  ;;  %v1299_v35 = vld [vmem:[%s4529_s7 + $0x8] sm:$0xff]  ;;  %v1274_v36 = vld [vmem:[%s4530_s6] sm:$0xff] }
 0xb8c   :  { %v2914_v30 = vmul.f32 -1.442695, %v1197_v29  ;;  %v2915_v16 = vmul.f32 -1.442695, %v1198_v38  ;;  %v1300_v29 = vld [vmem:[%s4529_s7 + $0x10] sm:$0xff] }
 0xb8d   :  { %1352 = vmatpush.msrb.mxu0 %v1300_v29 }
 0xb8e   :  { %3090 = vpow2.f32 %v2914_v30  ;;  %v1301_v30 = vld [vmem:[%s4529_s7 + $0x18] sm:$0xff] }
 0xb8f   :  { %1393 = vmatpush.msrb.mxu1 %v1301_v30  ;;  %1353 = vmatpush.msrb.mxu0 %v1298_v32 }
 0xb91   :  { %1394 = vmatpush.msrb.mxu1 %v1299_v35 }
 0xb94   :  { %v3091_v31 = vpop.eup %3090 }
 0xb95   :  { %v1202_v2 = vadd.f32 1.0, %v3091_v31  ;;  %v1276_v31 = vld [vmem:[%s4530_s6 + $0x10] sm:$0xff] }
 0xb96   :  { %1458 = vmatpush.msra.mxu2 %v1276_v31 }
 0xb97   :  { %3092 = vrcp.f32 %v1202_v2  ;;  %v1214_v63 = vand.u32 2147483648, %v1202_v2  ;;  %v1212_v26 = vand.u32 2147483647, %v1202_v2  ;;  %vm1208_vm7 = vweird.f32 %v1202_v2 }
 0xb98   :  { %3094 = vtanh.f32 %v1198_v38  ;;  %v3943_v38 = vld [vmem:[%s4531_s8 + $0x70] sm:$0xff]  ;;  %1459 = vmatpush.msra.mxu2 %v1274_v36 }
 0xb99   :  { %v1215_v10 = vor.u32 1.1754944e-38, %v1214_v63  ;;  %vm1213_vm9 = vcmp.eq.f32.partialorder %v1212_v26, 8.507059e+37  ;;  %3096 = vpow2.f32 %v2915_v16  ;;  %1596 = vmatpush.msra.mxu0 %v3943_v38  ;;  %v3960_v63 = vld [vmem:[%s4531_s8 + $0x50] sm:$0xff]  ;;  %v1291_v16 = vld [vmem:[#allocation4 + $0x8] sm:$0xff] }
 0xb9a   :  { %1709 = vmatpush.msrb.mxu2 %v3943_v38 }
 0xb9d   :  { %v3093_v37 = vpop.eup %3092 }
 0xb9e   :  { %v1204_v39 = vmul.f32 %v3093_v37, %v1202_v2  ;;  %vm1209_vm6 = vweird.f32 %v3093_v37  ;;  %v3095_v61 = vpop.eup %3094  ;;  %v1277_v2 = vld [vmem:[%s4530_s6 + $0x18] sm:$0xff] }
 0xb9f   :  { %vm1210_vm8 = vmor %vm1208_vm7, %vm1209_vm6  ;;  %v3097_v13 = vpop.eup %3096  ;;  %1499 = vmatpush.msra.mxu3 %v1277_v2 }
 0xba0   :  { %v1205_v54 = vsub.f32 1.0, %v1204_v39  ;;  %v1222_v19 = vadd.f32 1.0, %v3097_v13  ;;  %v3950_v39 = vld [vmem:[%s4531_s8 + $0x60] sm:$0xff] }
 0xba1   :  { %1597 = vmatpush.msra.mxu0 %v3950_v39  ;;  %1710 = vmatpush.msrb.mxu2 %v3950_v39  ;;  %v4017_v13 = vld [vmem:[%s4531_s8 + $0x20] sm:$0xff] }
 0xba2   :  { %v1206_v3 = vmul.f32 %v3093_v37, %v1205_v54  ;;  %3098 = vrcp.f32 %v1222_v19  ;;  %v1234_v46 = vand.u32 2147483648, %v1222_v19  ;;  %vm1228_vm12 = vweird.f32 %v1222_v19 }
 0xba3   :  { %v1232_v49 = vand.u32 2147483647, %v1222_v19  ;;  %1598 = vmatpush.msra.mxu0 %v3960_v63  ;;  %1711 = vmatpush.msrb.mxu2 %v3960_v63 }
 0xba4   :  { %v1207_v9 = vadd.f32 %v3093_v37, %v1206_v3  ;;  %v1235_v56 = vor.u32 1.1754944e-38, %v1234_v46  ;;  %v3965_v3 = vld [vmem:[%s4531_s8 + $0x78] sm:$0xff]  ;;  %v4070_v46 = vld [vmem:[%s4531_s8 + $0x8] sm:$0xff] }
 0xba5   :  { %vm1233_vm14 = vcmp.eq.f32.partialorder %v1232_v49, 8.507059e+37  ;;  %1616 = vmatpush.msra.mxu1 %v3965_v3  ;;  %v1270_v49 = vld [vmem:[#allocation3 + $0x20] sm:$0xff] }
 0xba6   :  { %v1211_v11 = vsel %vm1210_vm8, %v3093_v37, %v1207_v9  ;;  %v1275_v37 = vld [vmem:[%s4530_s6 + $0x8] sm:$0xff]  ;;  %v3978_v9 = vld [vmem:[%s4531_s8 + $0x40] sm:$0xff] }
 0xba7   :  { %v1216_v48 = vsel %vm1213_vm9, %v1215_v10, %v1211_v11  ;;  %1500 = vmatpush.msra.mxu3 %v1275_v37  ;;  %v3983_v10 = vld [vmem:[%s4531_s8 + $0x68] sm:$0xff]  ;;  %1599 = vmatpush.msra.mxu0 %v3978_v9 }
 0xba8   :  { %v1244_v43 = vmul.f32 %v3095_v61, %v1216_v48  ;;  %v3099_v42 = vpop.eup %3098  ;;  %v1243_v40 = vmul.f32 %v1241_v34, %v1216_v48  ;;  %1617 = vmatpush.msra.mxu1 %v3983_v10  ;;  %1712 = vmatpush.msrb.mxu2 %v3978_v9  ;;  %v3999_v48 = vld [vmem:[%s4531_s8 + $0x30] sm:$0xff]  ;;  %v4040_v34 = vld [vmem:[%s4531_s8 + $0x38] sm:$0xff] }
 0xba9   :  { %v1224_v20 = vmul.f32 %v3099_v42, %v1222_v19  ;;  %vm1229_vm11 = vweird.f32 %v3099_v42  ;;  %1729 = vmatpush.msrb.mxu3 %v3965_v3  ;;  %1600 = vmatpush.msra.mxu0 %v3999_v48  ;;  %v4022_v19 = vld [vmem:[%s4531_s8 + $0x48] sm:$0xff] }
 0xbaa   :  { %1246 = vrot.lane.b32.xlu2 %v1244_v43, %s3247_s20  ;;  %vm1230_vm13 = vmor %vm1228_vm12, %vm1229_vm11  ;;  %1713 = vmatpush.msrb.mxu2 %v3999_v48  ;;  %v1267_v43 = vld [vmem:[#allocation3 + $0x8] sm:$0xff] }
 0xbab   :  { %v1225_v24 = vsub.f32 1.0, %v1224_v20  ;;  %1730 = vmatpush.msrb.mxu3 %v3983_v10  ;;  %1601 = vmatpush.msra.mxu0 %v4017_v13  ;;  %v1292_v20 = vld [vmem:[#allocation4 + $0x10] sm:$0xff] }
 0xbac   :  { %1714 = vmatpush.msrb.mxu2 %v4017_v13 }
 0xbad   :  { %v1226_v52 = vmul.f32 %v3099_v42, %v1225_v24  ;;  %v4035_v24 = vld [vmem:[%s4531_s8 + $0x10] sm:$0xff] }
 0xbae   :  { %1602 = vmatpush.msra.mxu0 %v4035_v24  ;;  %1715 = vmatpush.msrb.mxu2 %v4035_v24 }
 0xbaf   :  { %v1227_v45 = vadd.f32 %v3099_v42, %v1226_v52  ;;  %v1269_v52 = vld [vmem:[#allocation3 + $0x18] sm:$0xff] }
 0xbb1   :  { %v1231_v50 = vsel %vm1230_vm13, %v3099_v42, %v1227_v45  ;;  %v1268_v42 = vld [vmem:[#allocation3 + $0x10] sm:$0xff]  ;;  %v4063_v45 = vld [vmem:[%s4531_s8 + $0x18] sm:$0xff] }
 0xbb2   :  { %v1236_v57 = vsel %vm1233_vm14, %v1235_v56, %v1231_v50  ;;  %v1294_v50 = vld [vmem:[#allocation4 + $0x20] sm:$0xff]  ;;  %v1271_v56 = vld [vmem:[#allocation3 + $0x28] sm:$0xff] }
 0xc04   :  { %v1247_v23 = vpop.permute.xlu2 %1246 }
 0xc05   :  { %v1249_v44 = vadd.f32 %v1247_v23, %v1243_v40  ;;  %v1293_v40 = vld [vmem:[#allocation4 + $0x18] sm:$0xff]  ;;  %v4053_v23 = vld [vmem:[%s4531_s8] sm:$0xff] }
 0xc06   :  { %1603 = vmatpush.msra.mxu0 %v4053_v23  ;;  %1716 = vmatpush.msrb.mxu2 %v4053_v23 }
 0xc07   :  { %3100 = vtanh.f32 %v1249_v44  ;;  %1253 = vrot.lane.b32.xlu1 %v1249_v44, %s3247_s20  ;;  %v4058_v44 = vld [vmem:[%s4531_s8 + $0x28] sm:$0xff] }
 0xc0d   :  { %v3101_v51 = vpop.eup %3100 }
 0xc0e   :  { %v1251_v53 = vmul.f32 %v3101_v51, %v1236_v57  ;;  %v1295_v51 = vld [vmem:[#allocation4 + $0x28] sm:$0xff]  ;;  %v1272_v57 = vld [vmem:[#allocation3 + $0x30] sm:$0xff] }
 0xc10   :  { %1258 = vrot.lane.b32.xlu0 %v1251_v53, %s3247_s20  ;;  %v1296_v53 = vld [vmem:[#allocation4 + $0x30] sm:$0xff] }
 0xc79   :  { %v1254_v54 = vpop.permute.xlu1 %1253 }
 0xc7a   :  { %1256 = vst.msk [vmem:[#allocation6] sm:$0xff] %vm326_vm1, %v1254_v54 }
 0xc7b   :  { %1565 = vst.msk [vmem:[#allocation6] sm:$0xff] %vm326_vm1, %v3246_v15 }
 0xc82   :  { %v1259_v26 = vpop.permute.xlu0 %1258  ;;  %v1669_v12 = vld [vmem:[#allocation6] sm:$0xff] }
 0xc83   :  { %1261 = vst.msk [vmem:[#allocation5] sm:$0xff] %vm326_vm1, %v1259_v26  ;;  %1671 = vrot.lane.b32.xlu2 %v1669_v12, %s3247_s20 }
 0xc84   :  { %1262 = vst.msk [vmem:[#allocation3 + $0x38] sm:$0xff] %vm75_vm0, %v1259_v26 }
 0xc85   :  { %1263 = vst.msk [vmem:[#allocation3] sm:$0xff] %vm457_vm10, %v1259_v26 }
 0xc86   :  { %1264 = vst.msk [vmem:[#allocation4] sm:$0xff] %vm75_vm0, %v1259_v26 }
 0xc87   :  { %1265 = vst.msk [vmem:[#allocation4 + $0x38] sm:$0xff] %vm457_vm10, %v1259_v26 }
 0xc88   :  { %1564 = vst.msk [vmem:[#allocation5] sm:$0xff] %vm326_vm1, %v3246_v15  ;;  %v4004_v15 = vld [vmem:[%s4531_s8 + $0x58] sm:$0xff] }
 0xc89   :  { %1618 = vmatpush.msra.mxu1 %v4004_v15  ;;  %1731 = vmatpush.msrb.mxu3 %v4004_v15 }
 0xc8b   :  { %1619 = vmatpush.msra.mxu1 %v4022_v19  ;;  %1732 = vmatpush.msrb.mxu3 %v4022_v19  ;;  %v1273_v59 = vld [vmem:[#allocation3 + $0x38] sm:$0xff] }
 0xc8c   :  { %v1266_v11 = vld [vmem:[#allocation3] sm:$0xff] }
 0xc8d   :  { %v1290_v61 = vld [vmem:[#allocation4] sm:$0xff]  ;;  %2932 = vmatmul.msk.f32.vlgmr.msra.gmra.mxu2 %vm326_vm1, %v1266_v11  ;;  %2940 = vmatmul.msk.f32.vlgmr.msra.gmra.mxu3 %vm326_vm1, %v1266_v11 }
 0xc8e   :  { %2916 = vmatmul.msk.f32.vlgmr.msrb.gmra.mxu0 %vm326_vm1, %v1290_v61  ;;  %2924 = vmatmul.msk.f32.vlgmr.msrb.gmra.mxu1 %vm326_vm1, %v1290_v61  ;;  %v1297_v62 = vld [vmem:[#allocation4 + $0x38] sm:$0xff] }
 0xc8f   :  { %1620 = vmatpush.msra.mxu1 %v4040_v34  ;;  %1733 = vmatpush.msrb.mxu3 %v4040_v34  ;;  %v1584_v55 = vld [vmem:[#allocation5] sm:$0xff] }
 0xc90   :  { %1822 = vmatpush.msrb.mxu0 %v3943_v38  ;;  %1935 = vmatpush.msra.mxu2 %v3943_v38 }
 0xc91   :  { %1621 = vmatpush.msra.mxu1 %v4058_v44  ;;  %1734 = vmatpush.msrb.mxu3 %v4058_v44 }
 0xc92   :  { %1823 = vmatpush.msrb.mxu0 %v3950_v39  ;;  %1936 = vmatpush.msra.mxu2 %v3950_v39 }
 0xc93   :  { %1622 = vmatpush.msra.mxu1 %v4063_v45  ;;  %1735 = vmatpush.msrb.mxu3 %v4063_v45 }
 0xc94   :  { %1824 = vmatpush.msrb.mxu0 %v3960_v63  ;;  %1937 = vmatpush.msra.mxu2 %v3960_v63 }
 0xc95   :  { %2933 = vmatmul.msk.f32.gmra.mxu2 %vm326_vm1, %v1267_v43  ;;  %2941 = vmatmul.msk.f32.gmra.mxu3 %vm326_vm1, %v1267_v43 }
 0xc96   :  { %2917 = vmatmul.msk.f32.gmra.mxu0 %vm326_vm1, %v1291_v16  ;;  %2925 = vmatmul.msk.f32.gmra.mxu1 %vm326_vm1, %v1291_v16 }
 0xc97   :  { %1623 = vmatpush.msra.mxu1 %v4070_v46  ;;  %1736 = vmatpush.msrb.mxu3 %v4070_v46 }
 0xc98   :  { %1825 = vmatpush.msrb.mxu0 %v3978_v9  ;;  %1938 = vmatpush.msra.mxu2 %v3978_v9 }
 0xc99   :  { %1842 = vmatpush.msrb.mxu1 %v3965_v3  ;;  %1955 = vmatpush.msra.mxu3 %v3965_v3 }
 0xc9a   :  { %1826 = vmatpush.msrb.mxu0 %v3999_v48  ;;  %1939 = vmatpush.msra.mxu2 %v3999_v48 }
 0xc9b   :  { %1843 = vmatpush.msrb.mxu1 %v3983_v10  ;;  %1956 = vmatpush.msra.mxu3 %v3983_v10 }
 0xc9c   :  { %1827 = vmatpush.msrb.mxu0 %v4017_v13  ;;  %1940 = vmatpush.msra.mxu2 %v4017_v13 }
 0xc9d   :  { %2934 = vmatmul.msk.f32.gmra.mxu2 %vm326_vm1, %v1268_v42  ;;  %2942 = vmatmul.msk.f32.gmra.mxu3 %vm326_vm1, %v1268_v42 }
 0xc9e   :  { %2918 = vmatmul.msk.f32.gmra.mxu0 %vm326_vm1, %v1292_v20  ;;  %2926 = vmatmul.msk.f32.gmra.mxu1 %vm326_vm1, %v1292_v20 }
 0xc9f   :  { %1844 = vmatpush.msrb.mxu1 %v4004_v15  ;;  %1957 = vmatpush.msra.mxu3 %v4004_v15 }
 0xca0   :  { %1828 = vmatpush.msrb.mxu0 %v4035_v24  ;;  %1941 = vmatpush.msra.mxu2 %v4035_v24 }
 0xca1   :  { %1845 = vmatpush.msrb.mxu1 %v4022_v19  ;;  %1958 = vmatpush.msra.mxu3 %v4022_v19 }
 0xca2   :  { %1829 = vmatpush.msrb.mxu0 %v4053_v23  ;;  %1942 = vmatpush.msra.mxu2 %v4053_v23 }
 0xca3   :  { %1846 = vmatpush.msrb.mxu1 %v4040_v34  ;;  %1959 = vmatpush.msra.mxu3 %v4040_v34 }
 0xca5   :  { %2935 = vmatmul.msk.f32.gmra.mxu2 %vm326_vm1, %v1269_v52  ;;  %2943 = vmatmul.msk.f32.gmra.mxu3 %vm326_vm1, %v1269_v52 }
 0xca6   :  { %2919 = vmatmul.msk.f32.gmra.mxu0 %vm326_vm1, %v1293_v40  ;;  %2927 = vmatmul.msk.f32.gmra.mxu1 %vm326_vm1, %v1293_v40 }
 0xca7   :  { %1847 = vmatpush.msrb.mxu1 %v4058_v44  ;;  %1960 = vmatpush.msra.mxu3 %v4058_v44 }
 0xca9   :  { %1848 = vmatpush.msrb.mxu1 %v4063_v45  ;;  %1961 = vmatpush.msra.mxu3 %v4063_v45 }
 0xcab   :  { %1849 = vmatpush.msrb.mxu1 %v4070_v46  ;;  %1962 = vmatpush.msra.mxu3 %v4070_v46 }
 0xcad   :  { %2936 = vmatmul.msk.f32.gmra.mxu2 %vm326_vm1, %v1270_v49  ;;  %2944 = vmatmul.msk.f32.gmra.mxu3 %vm326_vm1, %v1270_v49 }
 0xcae   :  { %2920 = vmatmul.msk.f32.gmra.mxu0 %vm326_vm1, %v1294_v50  ;;  %2928 = vmatmul.msk.f32.gmra.mxu1 %vm326_vm1, %v1294_v50 }
 0xcb5   :  { %2937 = vmatmul.msk.f32.gmra.mxu2 %vm326_vm1, %v1271_v56  ;;  %2945 = vmatmul.msk.f32.gmra.mxu3 %vm326_vm1, %v1271_v56 }
 0xcb6   :  { %2921 = vmatmul.msk.f32.gmra.mxu0 %vm326_vm1, %v1295_v51  ;;  %2929 = vmatmul.msk.f32.gmra.mxu1 %vm326_vm1, %v1295_v51 }
 0xcbd   :  { %2938 = vmatmul.msk.f32.gmra.mxu2 %vm326_vm1, %v1272_v57  ;;  %2946 = vmatmul.msk.f32.gmra.mxu3 %vm326_vm1, %v1272_v57 }
 0xcbe   :  { %2922 = vmatmul.msk.f32.gmra.mxu0 %vm326_vm1, %v1296_v53  ;;  %2930 = vmatmul.msk.f32.gmra.mxu1 %vm326_vm1, %v1296_v53 }
 0xcc5   :  { %2939 = vmatmul.msk.f32.gmra.mxu2 %vm326_vm1, %v1273_v59  ;;  %2947 = vmatmul.msk.f32.gmra.mxu3 %vm326_vm1, %v1273_v59 }
 0xcc6   :  { %2923 = vmatmul.msk.f32.gmra.mxu0 %vm326_vm1, %v1297_v62  ;;  %2931 = vmatmul.msk.f32.gmra.mxu1 %vm326_vm1, %v1297_v62 }
 0xcce   :  { %2948 = vmatmul.msk.f32.vlgmr.msra.gmra.mxu0 %vm326_vm1, %v1584_v55  ;;  %2949 = vmatmul.msk.f32.vlgmr.msra.gmra.mxu1 %vm326_vm1, %v1584_v55 }
 0xccf   :  { %2048 = vmatpush.msra.mxu0 %v3943_v38  ;;  %2068 = vmatpush.msra.mxu1 %v3965_v3 }
 0xcd1   :  { %2049 = vmatpush.msra.mxu0 %v3950_v39  ;;  %2069 = vmatpush.msra.mxu1 %v3983_v10 }
 0xcd3   :  { %2050 = vmatpush.msra.mxu0 %v3960_v63  ;;  %2070 = vmatpush.msra.mxu1 %v4004_v15 }
 0xcd5   :  { %2051 = vmatpush.msra.mxu0 %v3978_v9  ;;  %2071 = vmatpush.msra.mxu1 %v4022_v19 }
 0xcd7   :  { %2052 = vmatpush.msra.mxu0 %v3999_v48  ;;  %2072 = vmatpush.msra.mxu1 %v4040_v34 }
 0xcd9   :  { %2053 = vmatpush.msra.mxu0 %v4017_v13  ;;  %2073 = vmatpush.msra.mxu1 %v4058_v44 }
 0xcdb   :  { %2054 = vmatpush.msra.mxu0 %v4035_v24  ;;  %2074 = vmatpush.msra.mxu1 %v4063_v45 }
 0xcdd   :  { %2055 = vmatpush.msra.mxu0 %v4053_v23  ;;  %2075 = vmatpush.msra.mxu1 %v4070_v46 }
 0xd0b   :  { %v1355_v1 = vpop.f32.mrf.mxu0  ;;  %v4145_v4 = vpop.f32.mrf.mxu1 }
 0xd10   :  { %v1461_v5 = vpop.f32.mrf.mxu2  ;;  %v4147_v6 = vpop.f32.mrf.mxu3 }
 0xd13   :  { %v1358_v41 = vpop.f32.mrf.mxu0  ;;  %v1399_v60 = vpop.f32.mrf.mxu1 }
 0xd18   :  { %v1464_v58 = vpop.f32.mrf.mxu2  ;;  %v1505_v7 = vpop.f32.mrf.mxu3 }
 0xd19   :  { %v1465_v47 = vadd.f32 %v1464_v58, %v1358_v41  ;;  %v1506_v33 = vadd.f32 %v1505_v7, %v1399_v60 }
 0xd1b   :  { %v1361_v17 = vpop.f32.mrf.mxu0  ;;  %v1402_v18 = vpop.f32.mrf.mxu1  ;;  %v4152_v21 = vadd.f32 %v1528_v0, %v1465_v47  ;;  %v4154_v22 = vadd.f32 %v1529_v14, %v1506_v33 }
 0xd20   :  { %v1467_v27 = vpop.f32.mrf.mxu2  ;;  %v1508_v25 = vpop.f32.mrf.mxu3 }
 0xd21   :  { %v1468_v28 = vadd.f32 %v1467_v27, %v1361_v17  ;;  %v1509_v29 = vadd.f32 %v1508_v25, %v1402_v18  ;;  %v1462_v18 = vadd.f32 %v1461_v5, %v1355_v1 }
 0xd23   :  { %v1364_v30 = vpop.f32.mrf.mxu0  ;;  %v1405_v31 = vpop.f32.mrf.mxu1  ;;  %v4156_v2 = vadd.f32 %v1528_v0, %v1468_v28  ;;  %v4158_v32 = vadd.f32 %v1529_v14, %v1509_v29 }
 0xd28   :  { %v1470_v35 = vpop.f32.mrf.mxu2  ;;  %v1511_v36 = vpop.f32.mrf.mxu3 }
 0xd29   :  { %v1471_v37 = vadd.f32 %v1470_v35, %v1364_v30  ;;  %v1512_v54 = vadd.f32 %v1511_v36, %v1405_v31  ;;  %v1532_v31 = vadd.f32 %v1528_v0, %v1462_v18  ;;  %v1672_v18 = vpop.permute.xlu2 %1671 }
 0xd2b   :  { %v1367_v26 = vpop.f32.mrf.mxu0  ;;  %v1408_v11 = vpop.f32.mrf.mxu1  ;;  %v4160_v61 = vadd.f32 %v1528_v0, %v1471_v37  ;;  %v4162_v43 = vadd.f32 %v1529_v14, %v1512_v54 }
 0xd30   :  { %v1473_v16 = vpop.f32.mrf.mxu2  ;;  %v1514_v42 = vpop.f32.mrf.mxu3 }
 0xd31   :  { %v1474_v20 = vadd.f32 %v1473_v16, %v1367_v26  ;;  %v1515_v52 = vadd.f32 %v1514_v42, %v1408_v11  ;;  %v1503_v42 = vadd.f32 %v4147_v6, %v4145_v4 }
 0xd33   :  { %v1370_v40 = vpop.f32.mrf.mxu0  ;;  %v1411_v49 = vpop.f32.mrf.mxu1  ;;  %v4164_v50 = vadd.f32 %v1528_v0, %v1474_v20  ;;  %v4166_v56 = vadd.f32 %v1529_v14, %v1515_v52  ;;  %v1533_v5 = vadd.f32 %v1529_v14, %v1503_v42 }
 0xd38   :  { %v1476_v51 = vpop.f32.mrf.mxu2  ;;  %v1517_v57 = vpop.f32.mrf.mxu3 }
 0xd39   :  { %v1477_v53 = vadd.f32 %v1476_v51, %v1370_v40  ;;  %v1518_v59 = vadd.f32 %v1517_v57, %v1411_v49 }
 0xd3b   :  { %v1373_v62 = vpop.f32.mrf.mxu0  ;;  %v4168_v55 = vadd.f32 %v1528_v0, %v1477_v53  ;;  %v4170_v12 = vadd.f32 %v1529_v14, %v1518_v59  ;;  %v1414_v41 = vpop.f32.mrf.mxu1 }
 0xd40   :  { %v1479_v60 = vpop.f32.mrf.mxu2  ;;  %v1520_v8 = vpop.f32.mrf.mxu3 }
 0xd41   :  { %v1480_v58 = vadd.f32 %v1479_v60, %v1373_v62  ;;  %v1521_v7 = vadd.f32 %v1520_v8, %v1414_v41 }
 0xd43   :  { %v1376_v47 = vpop.f32.mrf.mxu0  ;;  %v4172_v33 = vadd.f32 %v1528_v0, %v1480_v58  ;;  %v4174_v17 = vadd.f32 %v1529_v14, %v1521_v7  ;;  %v1417_v27 = vpop.f32.mrf.mxu1 }
 0xd48   :  { %v1482_v25 = vpop.f32.mrf.mxu2  ;;  %v1523_v28 = vpop.f32.mrf.mxu3 }
 0xd49   :  { %v1483_v29 = vadd.f32 %v1482_v25, %v1376_v47  ;;  %v1524_v30 = vadd.f32 %v1523_v28, %v1417_v27 }
 0xd4b   :  { %v1605_v35 = vpop.f32.mrf.mxu0  ;;  %v4176_v36 = vadd.f32 %v1528_v0, %v1483_v29  ;;  %v4178_v37 = vadd.f32 %v1529_v14, %v1524_v30  ;;  %v1625_v1 = vpop.f32.mrf.mxu1 }
 0xd4c   :  { %v1628_v54 = vadd.f32 %v1605_v35, %v1532_v31  ;;  %v1629_v52 = vadd.f32 %v1625_v1, %v1533_v5 }
 0xd4e   :  { %v2950_v26 = vmul.f32 -1.442695, %v1628_v54  ;;  %v2951_v14 = vmul.f32 -1.442695, %v1629_v52 }
 0xd50   :  { %3102 = vpow2.f32 %v2950_v26 }
 0xd56   :  { %v3103_v11 = vpop.eup %3102 }
 0xd57   :  { %v1633_v16 = vadd.f32 1.0, %v3103_v11 }
 0xd59   :  { %3104 = vrcp.f32 %v1633_v16  ;;  %v1645_v0 = vand.u32 2147483648, %v1633_v16  ;;  %v1643_v57 = vand.u32 2147483647, %v1633_v16  ;;  %vm1639_vm2 = vweird.f32 %v1633_v16 }
 0xd5a   :  { %3106 = vtanh.f32 %v1629_v52 }
 0xd5b   :  { %v1646_v59 = vor.u32 1.1754944e-38, %v1645_v0  ;;  %vm1644_vm4 = vcmp.eq.f32.partialorder %v1643_v57, 8.507059e+37  ;;  %3108 = vpow2.f32 %v2951_v14 }
 0xd5f   :  { %v3105_v20 = vpop.eup %3104 }
 0xd60   :  { %v1635_v40 = vmul.f32 %v3105_v20, %v1633_v16  ;;  %vm1640_vm15 = vweird.f32 %v3105_v20  ;;  %v3107_v41 = vpop.eup %3106 }
 0xd61   :  { %vm1641_vm3 = vmor %vm1639_vm2, %vm1640_vm15  ;;  %v3109_v60 = vpop.eup %3108 }
 0xd62   :  { %v1636_v49 = vsub.f32 1.0, %v1635_v40  ;;  %v1653_v8 = vadd.f32 1.0, %v3109_v60 }
 0xd64   :  { %v1637_v51 = vmul.f32 %v3105_v20, %v1636_v49  ;;  %3110 = vrcp.f32 %v1653_v8  ;;  %v1665_v31 = vand.u32 2147483648, %v1653_v8  ;;  %vm1659_vm6 = vweird.f32 %v1653_v8 }
 0xd65   :  { %v1663_v35 = vand.u32 2147483647, %v1653_v8 }
 0xd66   :  { %v1638_v53 = vadd.f32 %v3105_v20, %v1637_v51  ;;  %v1666_v26 = vor.u32 1.1754944e-38, %v1665_v31 }
 0xd67   :  { %vm1664_vm8 = vcmp.eq.f32.partialorder %v1663_v35, 8.507059e+37 }
 0xd68   :  { %v1642_v62 = vsel %vm1641_vm3, %v3105_v20, %v1638_v53 }
 0xd69   :  { %v1647_v4 = vsel %vm1644_vm4, %v1646_v59, %v1642_v62 }
 0xd6a   :  { %v1675_v6 = vmul.f32 %v3107_v41, %v1647_v4  ;;  %v3111_v58 = vpop.eup %3110  ;;  %v1674_v25 = vmul.f32 %v1672_v18, %v1647_v4 }
 0xd6b   :  { %v1655_v7 = vmul.f32 %v3111_v58, %v1653_v8  ;;  %vm1660_vm5 = vweird.f32 %v3111_v58 }
 0xd6c   :  { %1677 = vrot.lane.b32.xlu0 %v1675_v6, %s3247_s20  ;;  %vm1661_vm7 = vmor %vm1659_vm6, %vm1660_vm5 }
 0xd6d   :  { %v1656_v47 = vsub.f32 1.0, %v1655_v7 }
 0xd6f   :  { %v1657_v27 = vmul.f32 %v3111_v58, %v1656_v47 }
 0xd71   :  { %v1658_v30 = vadd.f32 %v3111_v58, %v1657_v27 }
 0xd73   :  { %v1662_v54 = vsel %vm1661_vm7, %v3111_v58, %v1658_v30 }
 0xd74   :  { %v1667_v16 = vsel %vm1664_vm8, %v1666_v26, %v1662_v54 }
 0xdde   :  { %v1678_v28 = vpop.permute.xlu0 %1677 }
 0xddf   :  { %v1680_v29 = vadd.f32 %v1678_v28, %v1674_v25 }
 0xde1   :  { %3112 = vtanh.f32 %v1680_v29  ;;  %1684 = vrot.lane.b32.xlu2 %v1680_v29, %s3247_s20 }
 0xde7   :  { %v3113_v11 = vpop.eup %3112 }
 0xde8   :  { %v1682_v42 = vmul.f32 %v3113_v11, %v1667_v16 }
 0xdea   :  { %1689 = vrot.lane.b32.xlu1 %v1682_v42, %s3247_s20 }
 0xe3b   :  { %v1685_v1 = vpop.permute.xlu2 %1684 }
 0xe3c   :  { %1687 = vst.msk [vmem:[#allocation6] sm:$0xff] %vm326_vm1, %v1685_v1 }
 0xe43   :  { %v1782_v5 = vld [vmem:[#allocation6] sm:$0xff] }
 0xe44   :  { %1784 = vrot.lane.b32.xlu0 %v1782_v5, %s3247_s20 }
 0xe5c   :  { %v1690_v20 = vpop.permute.xlu1 %1689 }
 0xe5d   :  { %1692 = vst.msk [vmem:[#allocation5] sm:$0xff] %vm326_vm1, %v1690_v20 }
 0xe5e   :  { %1693 = vst.msk [vmem:[%s4533_s12] sm:$0xff] %vm75_vm0, %v1690_v20 }
 0xe5f   :  { %1694 = vst.msk [vmem:[%s4533_s12 + $0x38] sm:$0xff] %vm457_vm10, %v1690_v20 }
 0xe64   :  { %v1697_v52 = vld [vmem:[#allocation5] sm:$0xff] }
 0xe65   :  { %2952 = vmatmul.msk.f32.vlgmr.msrb.gmra.mxu2 %vm326_vm1, %v1697_v52  ;;  %2953 = vmatmul.msk.f32.vlgmr.msrb.gmra.mxu3 %vm326_vm1, %v1697_v52 }
 0xe66   :  { %2161 = vmatpush.msrb.mxu2 %v3943_v38  ;;  %2181 = vmatpush.msrb.mxu3 %v3965_v3 }
 0xe68   :  { %2162 = vmatpush.msrb.mxu2 %v3950_v39  ;;  %2182 = vmatpush.msrb.mxu3 %v3983_v10 }
 0xe6a   :  { %2163 = vmatpush.msrb.mxu2 %v3960_v63  ;;  %2183 = vmatpush.msrb.mxu3 %v4004_v15 }
 0xe6c   :  { %2164 = vmatpush.msrb.mxu2 %v3978_v9  ;;  %2184 = vmatpush.msrb.mxu3 %v4022_v19 }
 0xe6e   :  { %2165 = vmatpush.msrb.mxu2 %v3999_v48  ;;  %2185 = vmatpush.msrb.mxu3 %v4040_v34 }
 0xe70   :  { %2166 = vmatpush.msrb.mxu2 %v4017_v13  ;;  %2186 = vmatpush.msrb.mxu3 %v4058_v44 }
 0xe72   :  { %2167 = vmatpush.msrb.mxu2 %v4035_v24  ;;  %2187 = vmatpush.msrb.mxu3 %v4063_v45 }
 0xe74   :  { %2168 = vmatpush.msrb.mxu2 %v4053_v23  ;;  %2188 = vmatpush.msrb.mxu3 %v4070_v46 }
 0xeb6   :  { %v1785_v31 = vpop.permute.xlu0 %1784 }
 0xee8   :  { %v1718_v40 = vpop.f32.mrf.mxu2  ;;  %v1738_v53 = vpop.f32.mrf.mxu3 }
 0xee9   :  { %v1741_v49 = vadd.f32 %v1718_v40, %v4152_v21  ;;  %v1742_v62 = vadd.f32 %v1738_v53, %v4154_v22 }
 0xeeb   :  { %v2954_v0 = vmul.f32 -1.442695, %v1741_v49  ;;  %v2955_v27 = vmul.f32 -1.442695, %v1742_v62 }
 0xeed   :  { %3114 = vpow2.f32 %v2954_v0 }
 0xef3   :  { %v3115_v51 = vpop.eup %3114 }
 0xef4   :  { %v1746_v57 = vadd.f32 1.0, %v3115_v51 }
 0xef6   :  { %3116 = vrcp.f32 %v1746_v57  ;;  %v1758_v6 = vand.u32 2147483648, %v1746_v57  ;;  %v1756_v60 = vand.u32 2147483647, %v1746_v57  ;;  %vm1752_vm11 = vweird.f32 %v1746_v57 }
 0xef7   :  { %3118 = vtanh.f32 %v1742_v62 }
 0xef8   :  { %v1759_v21 = vor.u32 1.1754944e-38, %v1758_v6  ;;  %vm1757_vm13 = vcmp.eq.f32.partialorder %v1756_v60, 8.507059e+37  ;;  %3120 = vpow2.f32 %v2955_v27 }
 0xefc   :  { %v3117_v59 = vpop.eup %3116 }
 0xefd   :  { %v1748_v41 = vmul.f32 %v3117_v59, %v1746_v57  ;;  %vm1753_vm9 = vweird.f32 %v3117_v59  ;;  %v3119_v7 = vpop.eup %3118 }
 0xefe   :  { %vm1754_vm12 = vmor %vm1752_vm11, %vm1753_vm9  ;;  %v3121_v22 = vpop.eup %3120 }
 0xeff   :  { %v1749_v4 = vsub.f32 1.0, %v1748_v41  ;;  %v1766_v25 = vadd.f32 1.0, %v3121_v22 }
 0xf01   :  { %v1750_v14 = vmul.f32 %v3117_v59, %v1749_v4  ;;  %3122 = vrcp.f32 %v1766_v25  ;;  %v1778_v42 = vand.u32 2147483648, %v1766_v25  ;;  %vm1772_vm15 = vweird.f32 %v1766_v25 }
 0xf02   :  { %v1776_v1 = vand.u32 2147483647, %v1766_v25 }
 0xf03   :  { %v1751_v8 = vadd.f32 %v3117_v59, %v1750_v14  ;;  %v1779_v20 = vor.u32 1.1754944e-38, %v1778_v42 }
 0xf04   :  { %vm1777_vm3 = vcmp.eq.f32.partialorder %v1776_v1, 8.507059e+37 }
 0xf05   :  { %v1755_v58 = vsel %vm1754_vm12, %v3117_v59, %v1751_v8 }
 0xf06   :  { %v1760_v47 = vsel %vm1757_vm13, %v1759_v21, %v1755_v58 }
 0xf07   :  { %v1788_v18 = vmul.f32 %v3119_v7, %v1760_v47  ;;  %v3123_v28 = vpop.eup %3122  ;;  %v1787_v54 = vmul.f32 %v1785_v31, %v1760_v47 }
 0xf08   :  { %v1768_v29 = vmul.f32 %v3123_v28, %v1766_v25  ;;  %vm1773_vm14 = vweird.f32 %v3123_v28 }
 0xf09   :  { %1790 = vrot.lane.b32.xlu1 %v1788_v18, %s3247_s20  ;;  %vm1774_vm2 = vmor %vm1772_vm15, %vm1773_vm14 }
 0xf0a   :  { %v1769_v30 = vsub.f32 1.0, %v1768_v29 }
 0xf0c   :  { %v1770_v35 = vmul.f32 %v3123_v28, %v1769_v30 }
 0xf0e   :  { %v1771_v16 = vadd.f32 %v3123_v28, %v1770_v35 }
 0xf10   :  { %v1775_v5 = vsel %vm1774_vm2, %v3123_v28, %v1771_v16 }
 0xf11   :  { %v1780_v40 = vsel %vm1777_vm3, %v1779_v20, %v1775_v5 }
 0xf7b   :  { %v1791_v26 = vpop.permute.xlu1 %1790 }
 0xf7c   :  { %v1793_v11 = vadd.f32 %v1791_v26, %v1787_v54 }
 0xf7e   :  { %3124 = vtanh.f32 %v1793_v11  ;;  %1797 = vrot.lane.b32.xlu0 %v1793_v11, %s3247_s20 }
 0xf84   :  { %v3125_v52 = vpop.eup %3124 }
 0xf85   :  { %v1795_v49 = vmul.f32 %v3125_v52, %v1780_v40 }
 0xf87   :  { %1802 = vrot.lane.b32.xlu2 %v1795_v49, %s3247_s20 }
 0xfe1   :  { %v1803_v0 = vpop.permute.xlu2 %1802 }
 0xfe2   :  { %1805 = vst.msk [vmem:[#allocation5] sm:$0xff] %vm326_vm1, %v1803_v0 }
 0xfe3   :  { %1806 = vst.msk [vmem:[%s4533_s12 + $0x8] sm:$0xff] %vm75_vm0, %v1803_v0 }
 0xfe4   :  { %1807 = vst.msk [vmem:[%s4533_s12 + $0x30] sm:$0xff] %vm457_vm10, %v1803_v0 }
 0xfe9   :  { %v1810_v51 = vld [vmem:[#allocation5] sm:$0xff] }
 0xfea   :  { %2956 = vmatmul.msk.f32.vlgmr.msrb.gmra.mxu0 %vm326_vm1, %v1810_v51  ;;  %2957 = vmatmul.msk.f32.vlgmr.msrb.gmra.mxu1 %vm326_vm1, %v1810_v51 }
 0xfeb   :  { %2274 = vmatpush.msrb.mxu0 %v3943_v38  ;;  %2294 = vmatpush.msrb.mxu1 %v3965_v3 }
 0xfed   :  { %2275 = vmatpush.msrb.mxu0 %v3950_v39  ;;  %2295 = vmatpush.msrb.mxu1 %v3983_v10 }
 0xfef   :  { %2276 = vmatpush.msrb.mxu0 %v3960_v63  ;;  %2296 = vmatpush.msrb.mxu1 %v4004_v15 }
 0xff0   :  { %v1798_v57 = vpop.permute.xlu0 %1797 }
 0xff1   :  { %1800 = vst.msk [vmem:[#allocation6] sm:$0xff] %vm326_vm1, %v1798_v57  ;;  %2277 = vmatpush.msrb.mxu0 %v3978_v9  ;;  %2297 = vmatpush.msrb.mxu1 %v4022_v19 }
 0xff3   :  { %2278 = vmatpush.msrb.mxu0 %v3999_v48  ;;  %2298 = vmatpush.msrb.mxu1 %v4040_v34 }
 0xff5   :  { %2279 = vmatpush.msrb.mxu0 %v4017_v13  ;;  %2299 = vmatpush.msrb.mxu1 %v4058_v44 }
 0xff7   :  { %2280 = vmatpush.msrb.mxu0 %v4035_v24  ;;  %2300 = vmatpush.msrb.mxu1 %v4063_v45 }
 0xff8   :  { %v1895_v53 = vld [vmem:[#allocation6] sm:$0xff] }
 0xff9   :  { %1897 = vrot.lane.b32.xlu1 %v1895_v53, %s3247_s20  ;;  %2281 = vmatpush.msrb.mxu0 %v4053_v23 }
 0xffa   :  { %2301 = vmatpush.msrb.mxu1 %v4070_v46 }
0x1067   :  { %v1831_v59 = vpop.f32.mrf.mxu0  ;;  %v1851_v14 = vpop.f32.mrf.mxu1 }
0x1068   :  { %v1854_v62 = vadd.f32 %v1831_v59, %v4156_v2  ;;  %v1855_v8 = vadd.f32 %v1851_v14, %v4158_v32 }
0x106a   :  { %v2958_v41 = vmul.f32 -1.442695, %v1854_v62  ;;  %v2959_v30 = vmul.f32 -1.442695, %v1855_v8 }
0x106b   :  { %v1898_v11 = vpop.permute.xlu1 %1897 }
0x106c   :  { %3126 = vpow2.f32 %v2958_v41 }
0x1072   :  { %v3127_v4 = vpop.eup %3126 }
0x1073   :  { %v1859_v6 = vadd.f32 1.0, %v3127_v4 }
0x1075   :  { %3128 = vrcp.f32 %v1859_v6  ;;  %v1871_v7 = vand.u32 2147483648, %v1859_v6  ;;  %v1869_v18 = vand.u32 2147483647, %v1859_v6  ;;  %vm1865_vm5 = vweird.f32 %v1859_v6 }
0x1076   :  { %3130 = vtanh.f32 %v1855_v8 }
0x1077   :  { %v1872_v2 = vor.u32 1.1754944e-38, %v1871_v7  ;;  %vm1870_vm7 = vcmp.eq.f32.partialorder %v1869_v18, 8.507059e+37  ;;  %3132 = vpow2.f32 %v2959_v30 }
0x107b   :  { %v3129_v60 = vpop.eup %3128 }
0x107c   :  { %v1861_v21 = vmul.f32 %v3129_v60, %v1859_v6  ;;  %vm1866_vm4 = vweird.f32 %v3129_v60  ;;  %v3131_v25 = vpop.eup %3130 }
0x107d   :  { %vm1867_vm6 = vmor %vm1865_vm5, %vm1866_vm4  ;;  %v3133_v32 = vpop.eup %3132 }
0x107e   :  { %v1862_v58 = vsub.f32 1.0, %v1861_v21  ;;  %v1879_v31 = vadd.f32 1.0, %v3133_v32 }
0x1080   :  { %v1863_v47 = vmul.f32 %v3129_v60, %v1862_v58  ;;  %3134 = vrcp.f32 %v1879_v31  ;;  %v1891_v52 = vand.u32 2147483648, %v1879_v31  ;;  %vm1885_vm9 = vweird.f32 %v1879_v31 }
0x1081   :  { %v1889_v40 = vand.u32 2147483647, %v1879_v31 }
0x1082   :  { %v1864_v27 = vadd.f32 %v3129_v60, %v1863_v47  ;;  %v1892_v0 = vor.u32 1.1754944e-38, %v1891_v52 }
0x1083   :  { %vm1890_vm12 = vcmp.eq.f32.partialorder %v1889_v40, 8.507059e+37 }
0x1084   :  { %v1868_v22 = vsel %vm1867_vm6, %v3129_v60, %v1864_v27 }
0x1085   :  { %v1873_v28 = vsel %vm1870_vm7, %v1872_v2, %v1868_v22 }
0x1086   :  { %v1901_v29 = vmul.f32 %v3131_v25, %v1873_v28  ;;  %v3135_v35 = vpop.eup %3134  ;;  %v1900_v42 = vmul.f32 %v1898_v11, %v1873_v28 }
0x1087   :  { %v1881_v54 = vmul.f32 %v3135_v35, %v1879_v31  ;;  %vm1886_vm8 = vweird.f32 %v3135_v35 }
0x1088   :  { %1903 = vrot.lane.b32.xlu2 %v1901_v29, %s3247_s20  ;;  %vm1887_vm11 = vmor %vm1885_vm9, %vm1886_vm8 }
0x1089   :  { %v1882_v26 = vsub.f32 1.0, %v1881_v54 }
0x108b   :  { %v1883_v16 = vmul.f32 %v3135_v35, %v1882_v26 }
0x108d   :  { %v1884_v20 = vadd.f32 %v3135_v35, %v1883_v16 }
0x108f   :  { %v1888_v49 = vsel %vm1887_vm11, %v3135_v35, %v1884_v20 }
0x1090   :  { %v1893_v57 = vsel %vm1890_vm12, %v1892_v0, %v1888_v49 }
0x10e2   :  { %v1904_v1 = vpop.permute.xlu2 %1903 }
0x10e3   :  { %v1906_v5 = vadd.f32 %v1904_v1, %v1900_v42 }
0x10e5   :  { %3136 = vtanh.f32 %v1906_v5  ;;  %1910 = vrot.lane.b32.xlu1 %v1906_v5, %s3247_s20 }
0x10eb   :  { %v3137_v51 = vpop.eup %3136 }
0x10ec   :  { %v1908_v53 = vmul.f32 %v3137_v51, %v1893_v57 }
0x10ee   :  { %1915 = vrot.lane.b32.xlu0 %v1908_v53, %s3247_s20 }
0x1157   :  { %v1911_v59 = vpop.permute.xlu1 %1910 }
0x1158   :  { %1913 = vst.msk [vmem:[#allocation6] sm:$0xff] %vm326_vm1, %v1911_v59 }
0x115f   :  { %v2008_v62 = vld [vmem:[#allocation6] sm:$0xff] }
0x1160   :  { %2010 = vrot.lane.b32.xlu2 %v2008_v62, %s3247_s20  ;;  %v1916_v41 = vpop.permute.xlu0 %1915 }
0x1161   :  { %1918 = vst.msk [vmem:[#allocation5] sm:$0xff] %vm326_vm1, %v1916_v41 }
0x1162   :  { %1919 = vst.msk [vmem:[%s4533_s12 + $0x10] sm:$0xff] %vm75_vm0, %v1916_v41 }
0x1163   :  { %1920 = vst.msk [vmem:[%s4533_s12 + $0x28] sm:$0xff] %vm457_vm10, %v1916_v41 }
0x1168   :  { %v1923_v4 = vld [vmem:[#allocation5] sm:$0xff] }
0x1169   :  { %2960 = vmatmul.msk.f32.vlgmr.msra.gmra.mxu2 %vm326_vm1, %v1923_v4  ;;  %2961 = vmatmul.msk.f32.vlgmr.msra.gmra.mxu3 %vm326_vm1, %v1923_v4 }
0x116a   :  { %2387 = vmatpush.msra.mxu2 %v3943_v38  ;;  %2407 = vmatpush.msra.mxu3 %v3965_v3 }
0x116c   :  { %2388 = vmatpush.msra.mxu2 %v3950_v39  ;;  %2408 = vmatpush.msra.mxu3 %v3983_v10 }
0x116e   :  { %2389 = vmatpush.msra.mxu2 %v3960_v63  ;;  %2409 = vmatpush.msra.mxu3 %v4004_v15 }
0x1170   :  { %2390 = vmatpush.msra.mxu2 %v3978_v9  ;;  %2410 = vmatpush.msra.mxu3 %v4022_v19 }
0x1172   :  { %2391 = vmatpush.msra.mxu2 %v3999_v48  ;;  %2411 = vmatpush.msra.mxu3 %v4040_v34 }
0x1174   :  { %2392 = vmatpush.msra.mxu2 %v4017_v13  ;;  %2412 = vmatpush.msra.mxu3 %v4058_v44 }
0x1176   :  { %2393 = vmatpush.msra.mxu2 %v4035_v24  ;;  %2413 = vmatpush.msra.mxu3 %v4063_v45 }
0x1178   :  { %2394 = vmatpush.msra.mxu2 %v4053_v23  ;;  %2414 = vmatpush.msra.mxu3 %v4070_v46 }
0x11ba   :  { %v2011_v47 = vpop.permute.xlu2 %2010 }
0x11ec   :  { %v1944_v38 = vpop.f32.mrf.mxu2  ;;  %v1964_v10 = vpop.f32.mrf.mxu3 }
0x11ed   :  { %v1967_v39 = vadd.f32 %v1944_v38, %v4160_v61  ;;  %v1968_v15 = vadd.f32 %v1964_v10, %v4162_v43 }
0x11ef   :  { %v2962_v63 = vmul.f32 -1.442695, %v1967_v39  ;;  %v2963_v60 = vmul.f32 -1.442695, %v1968_v15 }
0x11f1   :  { %3138 = vpow2.f32 %v2962_v63 }
0x11f7   :  { %v3139_v3 = vpop.eup %3138 }
0x11f8   :  { %v1972_v9 = vadd.f32 1.0, %v3139_v3 }
0x11fa   :  { %3140 = vrcp.f32 %v1972_v9  ;;  %v1984_v24 = vand.u32 2147483648, %v1972_v9  ;;  %v1982_v23 = vand.u32 2147483647, %v1972_v9  ;;  %vm1978_vm14 = vweird.f32 %v1972_v9 }
0x11fb   :  { %3142 = vtanh.f32 %v1968_v15 }
0x11fc   :  { %v1985_v45 = vor.u32 1.1754944e-38, %v1984_v24  ;;  %vm1983_vm2 = vcmp.eq.f32.partialorder %v1982_v23, 8.507059e+37  ;;  %3144 = vpow2.f32 %v2963_v60 }
0x1200   :  { %v3141_v48 = vpop.eup %3140 }
0x1201   :  { %v1974_v13 = vmul.f32 %v3141_v48, %v1972_v9  ;;  %vm1979_vm13 = vweird.f32 %v3141_v48  ;;  %v3143_v61 = vpop.eup %3142 }
0x1202   :  { %vm1980_vm15 = vmor %vm1978_vm14, %vm1979_vm13  ;;  %v3145_v43 = vpop.eup %3144 }
0x1203   :  { %v1975_v19 = vsub.f32 1.0, %v1974_v13  ;;  %v1992_v8 = vadd.f32 1.0, %v3145_v43 }
0x1205   :  { %v1976_v34 = vmul.f32 %v3141_v48, %v1975_v19  ;;  %3146 = vrcp.f32 %v1992_v8  ;;  %v2004_v28 = vand.u32 2147483648, %v1992_v8  ;;  %vm1998_vm4 = vweird.f32 %v1992_v8 }
0x1206   :  { %v2002_v29 = vand.u32 2147483647, %v1992_v8 }
0x1207   :  { %v1977_v44 = vadd.f32 %v3141_v48, %v1976_v34  ;;  %v2005_v32 = vor.u32 1.1754944e-38, %v2004_v28 }
0x1208   :  { %vm2003_vm6 = vcmp.eq.f32.partialorder %v2002_v29, 8.507059e+37 }
0x1209   :  { %v1981_v46 = vsel %vm1980_vm15, %v3141_v48, %v1977_v44 }
0x120a   :  { %v1986_v6 = vsel %vm1983_vm2, %v1985_v45, %v1981_v46 }
0x120b   :  { %v2014_v14 = vmul.f32 %v3143_v61, %v1986_v6  ;;  %v3147_v21 = vpop.eup %3146  ;;  %v2013_v27 = vmul.f32 %v2011_v47, %v1986_v6 }
0x120c   :  { %v1994_v58 = vmul.f32 %v3147_v21, %v1992_v8  ;;  %vm1999_vm3 = vweird.f32 %v3147_v21 }
0x120d   :  { %2016 = vrot.lane.b32.xlu0 %v2014_v14, %s3247_s20  ;;  %vm2000_vm5 = vmor %vm1998_vm4, %vm1999_vm3 }
0x120e   :  { %v1995_v7 = vsub.f32 1.0, %v1994_v58 }
0x1210   :  { %v1996_v18 = vmul.f32 %v3147_v21, %v1995_v7 }
0x1212   :  { %v1997_v25 = vadd.f32 %v3147_v21, %v1996_v18 }
0x1214   :  { %v2001_v30 = vsel %vm2000_vm5, %v3147_v21, %v1997_v25 }
0x1215   :  { %v2006_v35 = vsel %vm2003_vm6, %v2005_v32, %v2001_v30 }
0x127f   :  { %v2017_v2 = vpop.permute.xlu0 %2016 }
0x1280   :  { %v2019_v22 = vadd.f32 %v2017_v2, %v2013_v27 }
0x1282   :  { %3148 = vtanh.f32 %v2019_v22  ;;  %2023 = vrot.lane.b32.xlu2 %v2019_v22, %s3247_s20 }
0x1288   :  { %v3149_v31 = vpop.eup %3148 }
0x1289   :  { %v2021_v54 = vmul.f32 %v3149_v31, %v2006_v35 }
0x128b   :  { %2028 = vrot.lane.b32.xlu1 %v2021_v54, %s3247_s20 }
0x12dc   :  { %v2024_v26 = vpop.permute.xlu2 %2023 }
0x12dd   :  { %2026 = vst.msk [vmem:[#allocation6] sm:$0xff] %vm326_vm1, %v2024_v26 }
0x12e4   :  { %v2121_v11 = vld [vmem:[#allocation6] sm:$0xff] }
0x12e5   :  { %2123 = vrot.lane.b32.xlu0 %v2121_v11, %s3247_s20 }
0x12fd   :  { %v2029_v16 = vpop.permute.xlu1 %2028 }
0x12fe   :  { %2031 = vst.msk [vmem:[#allocation5] sm:$0xff] %vm326_vm1, %v2029_v16 }
0x12ff   :  { %2032 = vst.msk [vmem:[%s4533_s12 + $0x18] sm:$0xff] %vm75_vm0, %v2029_v16 }
0x1300   :  { %2033 = vst.msk [vmem:[%s4533_s12 + $0x20] sm:$0xff] %vm457_vm10, %v2029_v16 }
0x1305   :  { %v2036_v42 = vld [vmem:[#allocation5] sm:$0xff] }
0x1306   :  { %2964 = vmatmul.msk.f32.vlgmr.msra.gmra.mxu0 %vm326_vm1, %v2036_v42  ;;  %2965 = vmatmul.msk.f32.vlgmr.msra.gmra.mxu1 %vm326_vm1, %v2036_v42 }
0x1357   :  { %v2124_v19 = vpop.permute.xlu0 %2123 }
0x1383   :  { %v2057_v1 = vpop.f32.mrf.mxu0  ;;  %v2077_v49 = vpop.f32.mrf.mxu1 }
0x1384   :  { %v2080_v5 = vadd.f32 %v2057_v1, %v4164_v50  ;;  %v2081_v51 = vadd.f32 %v2077_v49, %v4166_v56 }
0x1386   :  { %v2966_v20 = vmul.f32 -1.442695, %v2080_v5  ;;  %v2967_v9 = vmul.f32 -1.442695, %v2081_v51 }
0x1388   :  { %3150 = vpow2.f32 %v2966_v20 }
0x138e   :  { %v3151_v52 = vpop.eup %3150 }
0x138f   :  { %v2085_v40 = vadd.f32 1.0, %v3151_v52 }
0x1391   :  { %3152 = vrcp.f32 %v2085_v40  ;;  %v2097_v59 = vand.u32 2147483648, %v2085_v40  ;;  %v2095_v41 = vand.u32 2147483647, %v2085_v40  ;;  %vm2091_vm8 = vweird.f32 %v2085_v40 }
0x1392   :  { %3154 = vtanh.f32 %v2081_v51 }
0x1393   :  { %v2098_v50 = vor.u32 1.1754944e-38, %v2097_v59  ;;  %vm2096_vm11 = vcmp.eq.f32.partialorder %v2095_v41, 8.507059e+37  ;;  %3156 = vpow2.f32 %v2967_v9 }
0x1397   :  { %v3153_v0 = vpop.eup %3152 }
0x1398   :  { %v2087_v57 = vmul.f32 %v3153_v0, %v2085_v40  ;;  %vm2092_vm7 = vweird.f32 %v3153_v0  ;;  %v3155_v39 = vpop.eup %3154 }
0x1399   :  { %vm2093_vm9 = vmor %vm2091_vm8, %vm2092_vm7  ;;  %v3157_v56 = vpop.eup %3156 }
0x139a   :  { %v2088_v53 = vsub.f32 1.0, %v2087_v57  ;;  %v2105_v10 = vadd.f32 1.0, %v3157_v56 }
0x139c   :  { %v2089_v62 = vmul.f32 %v3153_v0, %v2088_v53  ;;  %3158 = vrcp.f32 %v2105_v10  ;;  %v2117_v46 = vand.u32 2147483648, %v2105_v10  ;;  %vm2111_vm13 = vweird.f32 %v2105_v10 }
0x139d   :  { %v2115_v61 = vand.u32 2147483647, %v2105_v10 }
0x139e   :  { %v2090_v4 = vadd.f32 %v3153_v0, %v2089_v62  ;;  %v2118_v14 = vor.u32 1.1754944e-38, %v2117_v46 }
0x139f   :  { %vm2116_vm15 = vcmp.eq.f32.partialorder %v2115_v61, 8.507059e+37 }
0x13a0   :  { %v2094_v38 = vsel %vm2093_vm9, %v3153_v0, %v2090_v4 }
0x13a1   :  { %v2099_v63 = vsel %vm2096_vm11, %v2098_v50, %v2094_v38 }
0x13a2   :  { %v2127_v3 = vmul.f32 %v3155_v39, %v2099_v63  ;;  %v3159_v48 = vpop.eup %3158  ;;  %v2126_v34 = vmul.f32 %v2124_v19, %v2099_v63 }
0x13a3   :  { %v2107_v15 = vmul.f32 %v3159_v48, %v2105_v10  ;;  %vm2112_vm12 = vweird.f32 %v3159_v48 }
0x13a4   :  { %2129 = vrot.lane.b32.xlu1 %v2127_v3, %s3247_s20  ;;  %vm2113_vm14 = vmor %vm2111_vm13, %vm2112_vm12 }
0x13a5   :  { %v2108_v13 = vsub.f32 1.0, %v2107_v15 }
0x13a7   :  { %v2109_v24 = vmul.f32 %v3159_v48, %v2108_v13 }
0x13a9   :  { %v2110_v45 = vadd.f32 %v3159_v48, %v2109_v24 }
0x13ab   :  { %v2114_v6 = vsel %vm2113_vm14, %v3159_v48, %v2110_v45 }
0x13ac   :  { %v2119_v43 = vsel %vm2116_vm15, %v2118_v14, %v2114_v6 }
0x1416   :  { %v2130_v23 = vpop.permute.xlu1 %2129 }
0x1417   :  { %v2132_v44 = vadd.f32 %v2130_v23, %v2126_v34 }
0x1419   :  { %3160 = vtanh.f32 %v2132_v44  ;;  %2136 = vrot.lane.b32.xlu0 %v2132_v44, %s3247_s20 }
0x141f   :  { %v3161_v60 = vpop.eup %3160 }
0x1420   :  { %v2134_v8 = vmul.f32 %v3161_v60, %v2119_v43 }
0x1422   :  { %2141 = vrot.lane.b32.xlu2 %v2134_v8, %s3247_s20 }
0x147c   :  { %v2142_v21 = vpop.permute.xlu2 %2141 }
0x147d   :  { %2144 = vst.msk [vmem:[#allocation5] sm:$0xff] %vm326_vm1, %v2142_v21 }
0x147e   :  { %2145 = vst.msk [vmem:[%s4533_s12 + $0x20] sm:$0xff] %vm75_vm0, %v2142_v21 }
0x147f   :  { %2146 = vst.msk [vmem:[%s4533_s12 + $0x18] sm:$0xff] %vm457_vm10, %v2142_v21 }
0x1484   :  { %v2149_v58 = vld [vmem:[#allocation5] sm:$0xff] }
0x1485   :  { %2968 = vmatmul.msk.f32.vlgmr.msrb.gmra.mxu2 %vm326_vm1, %v2149_v58  ;;  %2969 = vmatmul.msk.f32.vlgmr.msrb.gmra.mxu3 %vm326_vm1, %v2149_v58 }
0x148b   :  { %v2137_v7 = vpop.permute.xlu0 %2136 }
0x148c   :  { %2139 = vst.msk [vmem:[#allocation6] sm:$0xff] %vm326_vm1, %v2137_v7 }
0x1493   :  { %v2234_v47 = vld [vmem:[#allocation6] sm:$0xff] }
0x1494   :  { %2236 = vrot.lane.b32.xlu1 %v2234_v47, %s3247_s20 }
0x1506   :  { %v2237_v51 = vpop.permute.xlu1 %2236 }
0x1508   :  { %v2170_v18 = vpop.f32.mrf.mxu2  ;;  %v2190_v28 = vpop.f32.mrf.mxu3 }
0x1509   :  { %v2193_v27 = vadd.f32 %v2170_v18, %v4168_v55  ;;  %v2194_v30 = vadd.f32 %v2190_v28, %v4170_v12 }
0x150b   :  { %v2970_v2 = vmul.f32 -1.442695, %v2193_v27  ;;  %v2971_v20 = vmul.f32 -1.442695, %v2194_v30 }
0x150d   :  { %3162 = vpow2.f32 %v2970_v2 }
0x1513   :  { %v3163_v22 = vpop.eup %3162 }
0x1514   :  { %v2198_v25 = vadd.f32 1.0, %v3163_v22 }
0x1516   :  { %3164 = vrcp.f32 %v2198_v25  ;;  %v2210_v35 = vand.u32 2147483648, %v2198_v25  ;;  %v2208_v26 = vand.u32 2147483647, %v2198_v25  ;;  %vm2204_vm3 = vweird.f32 %v2198_v25 }
0x1517   :  { %3166 = vtanh.f32 %v2194_v30 }
0x1518   :  { %v2211_v55 = vor.u32 1.1754944e-38, %v2210_v35  ;;  %vm2209_vm5 = vcmp.eq.f32.partialorder %v2208_v26, 8.507059e+37  ;;  %3168 = vpow2.f32 %v2971_v20 }
0x151c   :  { %v3165_v29 = vpop.eup %3164 }
0x151d   :  { %v2200_v32 = vmul.f32 %v3165_v29, %v2198_v25  ;;  %vm2205_vm2 = vweird.f32 %v3165_v29  ;;  %v3167_v42 = vpop.eup %3166 }
0x151e   :  { %vm2206_vm4 = vmor %vm2204_vm3, %vm2205_vm2  ;;  %v3169_v12 = vpop.eup %3168 }
0x151f   :  { %v2201_v31 = vsub.f32 1.0, %v2200_v32  ;;  %v2218_v52 = vadd.f32 1.0, %v3169_v12 }
0x1521   :  { %v2202_v54 = vmul.f32 %v3165_v29, %v2201_v31  ;;  %3170 = vrcp.f32 %v2218_v52  ;;  %v2230_v4 = vand.u32 2147483648, %v2218_v52  ;;  %vm2224_vm7 = vweird.f32 %v2218_v52 }
0x1522   :  { %v2228_v50 = vand.u32 2147483647, %v2218_v52 }
0x1523   :  { %v2203_v11 = vadd.f32 %v3165_v29, %v2202_v54  ;;  %v2231_v39 = vor.u32 1.1754944e-38, %v2230_v4 }
0x1524   :  { %vm2229_vm9 = vcmp.eq.f32.partialorder %v2228_v50, 8.507059e+37 }
0x1525   :  { %v2207_v16 = vsel %vm2206_vm4, %v3165_v29, %v2203_v11 }
0x1526   :  { %v2212_v1 = vsel %vm2209_vm5, %v2211_v55, %v2207_v16 }
0x1527   :  { %v2240_v5 = vmul.f32 %v3167_v42, %v2212_v1  ;;  %v3171_v40 = vpop.eup %3170  ;;  %v2239_v53 = vmul.f32 %v2237_v51, %v2212_v1 }
0x1528   :  { %v2220_v49 = vmul.f32 %v3171_v40, %v2218_v52  ;;  %vm2225_vm6 = vweird.f32 %v3171_v40 }
0x1529   :  { %2242 = vrot.lane.b32.xlu2 %v2240_v5, %s3247_s20  ;;  %vm2226_vm8 = vmor %vm2224_vm7, %vm2225_vm6 }
0x152a   :  { %v2221_v0 = vsub.f32 1.0, %v2220_v49 }
0x152c   :  { %v2222_v57 = vmul.f32 %v3171_v40, %v2221_v0 }
0x152e   :  { %v2223_v41 = vadd.f32 %v3171_v40, %v2222_v57 }
0x1530   :  { %v2227_v38 = vsel %vm2226_vm8, %v3171_v40, %v2223_v41 }
0x1531   :  { %v2232_v3 = vsel %vm2229_vm9, %v2231_v39, %v2227_v38 }
0x1583   :  { %v2243_v59 = vpop.permute.xlu2 %2242 }
0x1584   :  { %v2245_v62 = vadd.f32 %v2243_v59, %v2239_v53 }
0x1586   :  { %3172 = vtanh.f32 %v2245_v62  ;;  %2249 = vrot.lane.b32.xlu1 %v2245_v62, %s3247_s20 }
0x158c   :  { %v3173_v63 = vpop.eup %3172 }
0x158d   :  { %v2247_v9 = vmul.f32 %v3173_v63, %v2232_v3 }
0x158f   :  { %2254 = vrot.lane.b32.xlu0 %v2247_v9, %s3247_s20 }
0x15f8   :  { %v2250_v56 = vpop.permute.xlu1 %2249 }
0x15f9   :  { %2252 = vst.msk [vmem:[#allocation6] sm:$0xff] %vm326_vm1, %v2250_v56 }
0x1600   :  { %v2347_v10 = vld [vmem:[#allocation6] sm:$0xff] }
0x1601   :  { %2349 = vrot.lane.b32.xlu2 %v2347_v10, %s3247_s20  ;;  %v2255_v48 = vpop.permute.xlu0 %2254 }
0x1602   :  { %2257 = vst.msk [vmem:[#allocation5] sm:$0xff] %vm326_vm1, %v2255_v48 }
0x1603   :  { %2258 = vst.msk [vmem:[%s4533_s12 + $0x28] sm:$0xff] %vm75_vm0, %v2255_v48 }
0x1604   :  { %2259 = vst.msk [vmem:[%s4533_s12 + $0x10] sm:$0xff] %vm457_vm10, %v2255_v48 }
0x1609   :  { %v2262_v15 = vld [vmem:[#allocation5] sm:$0xff] }
0x160a   :  { %2972 = vmatmul.msk.f32.vlgmr.msrb.gmra.mxu0 %vm326_vm1, %v2262_v15  ;;  %2973 = vmatmul.msk.f32.vlgmr.msrb.gmra.mxu1 %vm326_vm1, %v2262_v15 }
0x165b   :  { %v2350_v28 = vpop.permute.xlu2 %2349 }
0x1687   :  { %v2283_v13 = vpop.f32.mrf.mxu0  ;;  %v2303_v44 = vpop.f32.mrf.mxu1 }
0x1688   :  { %v2306_v19 = vadd.f32 %v2283_v13, %v4172_v33  ;;  %v2307_v46 = vadd.f32 %v2303_v44, %v4174_v17  ;;  %v2501_v13 = vld [vmem:[%s4534_s10 + $0x38] sm:$0xff] }
0x1689   :  { %2534 = vmatpush.msra.mxu0 %v2501_v13 }
0x168a   :  { %v2974_v24 = vmul.f32 -1.442695, %v2306_v19  ;;  %v2975_v18 = vmul.f32 -1.442695, %v2307_v46  ;;  %v2500_v19 = vld [vmem:[%s4534_s10 + $0x30] sm:$0xff] }
0x168b   :  { %2535 = vmatpush.msra.mxu0 %v2500_v19 }
0x168c   :  { %3174 = vpow2.f32 %v2974_v24  ;;  %v2499_v24 = vld [vmem:[%s4534_s10 + $0x28] sm:$0xff] }
0x168d   :  { %2536 = vmatpush.msra.mxu0 %v2499_v24 }
0x1692   :  { %v3175_v34 = vpop.eup %3174 }
0x1693   :  { %v2311_v23 = vadd.f32 1.0, %v3175_v34  ;;  %v2498_v34 = vld [vmem:[%s4534_s10 + $0x20] sm:$0xff] }
0x1694   :  { %2537 = vmatpush.msra.mxu0 %v2498_v34 }
0x1695   :  { %3176 = vrcp.f32 %v2311_v23  ;;  %v2323_v14 = vand.u32 2147483648, %v2311_v23  ;;  %v2321_v43 = vand.u32 2147483647, %v2311_v23  ;;  %vm2317_vm12 = vweird.f32 %v2311_v23 }
0x1696   :  { %3178 = vtanh.f32 %v2307_v46 }
0x1697   :  { %v2324_v33 = vor.u32 1.1754944e-38, %v2323_v14  ;;  %vm2322_vm14 = vcmp.eq.f32.partialorder %v2321_v43, 8.507059e+37  ;;  %3180 = vpow2.f32 %v2975_v18 }
0x169b   :  { %v3177_v45 = vpop.eup %3176 }
0x169c   :  { %v2313_v61 = vmul.f32 %v3177_v45, %v2311_v23  ;;  %vm2318_vm11 = vweird.f32 %v3177_v45  ;;  %v3179_v58 = vpop.eup %3178 }
0x169d   :  { %vm2319_vm13 = vmor %vm2317_vm12, %vm2318_vm11  ;;  %v3181_v17 = vpop.eup %3180 }
0x169e   :  { %v2314_v6 = vsub.f32 1.0, %v2313_v61  ;;  %v2331_v27 = vadd.f32 1.0, %v3181_v17  ;;  %v2497_v17 = vld [vmem:[%s4534_s10 + $0x18] sm:$0xff] }
0x169f   :  { %2538 = vmatpush.msra.mxu0 %v2497_v17 }
0x16a0   :  { %v2315_v60 = vmul.f32 %v3177_v45, %v2314_v6  ;;  %3182 = vrcp.f32 %v2331_v27  ;;  %v2343_v54 = vand.u32 2147483648, %v2331_v27  ;;  %vm2337_vm2 = vweird.f32 %v2331_v27 }
0x16a1   :  { %v2341_v26 = vand.u32 2147483647, %v2331_v27 }
0x16a2   :  { %v2316_v8 = vadd.f32 %v3177_v45, %v2315_v60  ;;  %v2344_v55 = vor.u32 1.1754944e-38, %v2343_v54 }
0x16a3   :  { %vm2342_vm4 = vcmp.eq.f32.partialorder %v2341_v26, 8.507059e+37 }
0x16a4   :  { %v2320_v21 = vsel %vm2319_vm13, %v3177_v45, %v2316_v8 }
0x16a5   :  { %v2325_v7 = vsel %vm2322_vm14, %v2324_v33, %v2320_v21 }
0x16a6   :  { %v2353_v47 = vmul.f32 %v3179_v58, %v2325_v7  ;;  %v3183_v2 = vpop.eup %3182  ;;  %v2352_v30 = vmul.f32 %v2350_v28, %v2325_v7 }
0x16a7   :  { %v2333_v22 = vmul.f32 %v3183_v2, %v2331_v27  ;;  %vm2338_vm15 = vweird.f32 %v3183_v2  ;;  %v2496_v27 = vld [vmem:[%s4534_s10 + $0x10] sm:$0xff] }
0x16a8   :  { %2355 = vrot.lane.b32.xlu0 %v2353_v47, %s3247_s20  ;;  %vm2339_vm3 = vmor %vm2337_vm2, %vm2338_vm15  ;;  %2539 = vmatpush.msra.mxu0 %v2496_v27 }
0x16a9   :  { %v2334_v25 = vsub.f32 1.0, %v2333_v22  ;;  %v2494_v22 = vld [vmem:[%s4534_s10] sm:$0xff] }
0x16ab   :  { %v2335_v29 = vmul.f32 %v3183_v2, %v2334_v25 }
0x16ad   :  { %v2336_v35 = vadd.f32 %v3183_v2, %v2335_v29 }
0x16af   :  { %v2340_v11 = vsel %vm2339_vm3, %v3183_v2, %v2336_v35  ;;  %v2495_v2 = vld [vmem:[%s4534_s10 + $0x8] sm:$0xff] }
0x16b0   :  { %v2345_v42 = vsel %vm2342_vm4, %v2344_v55, %v2340_v11  ;;  %2540 = vmatpush.msra.mxu0 %v2495_v2  ;;  %v2491_v35 = vld [vmem:[%s4533_s12 + $0x28] sm:$0xff]  ;;  %v2575_v55 = vld [vmem:[%s4535_s11] sm:$0xff] }
0x16b1   :  { %v2576_v11 = vld [vmem:[%s4535_s11 + $0x8] sm:$0xff] }
0x16b2   :  { %2541 = vmatpush.msra.mxu0 %v2494_v22  ;;  %2616 = vmatpush.msra.mxu1 %v2576_v11 }
0x16b4   :  { %2617 = vmatpush.msra.mxu1 %v2575_v55 }
0x171a   :  { %v2356_v32 = vpop.permute.xlu0 %2355 }
0x171b   :  { %v2358_v31 = vadd.f32 %v2356_v32, %v2352_v30  ;;  %v2488_v30 = vld [vmem:[%s4533_s12 + $0x10] sm:$0xff]  ;;  %v2489_v32 = vld [vmem:[%s4533_s12 + $0x18] sm:$0xff] }
0x171d   :  { %3184 = vtanh.f32 %v2358_v31  ;;  %2362 = vrot.lane.b32.xlu2 %v2358_v31, %s3247_s20  ;;  %v2490_v31 = vld [vmem:[%s4533_s12 + $0x20] sm:$0xff] }
0x1723   :  { %v3185_v16 = vpop.eup %3184 }
0x1724   :  { %v2360_v1 = vmul.f32 %v3185_v16, %v2345_v42 }
0x1726   :  { %2367 = vrot.lane.b32.xlu1 %v2360_v1, %s3247_s20 }
0x1777   :  { %v2363_v5 = vpop.permute.xlu2 %2362 }
0x1778   :  { %2365 = vst.msk [vmem:[#allocation6] sm:$0xff] %vm326_vm1, %v2363_v5 }
0x177f   :  { %v2460_v20 = vld [vmem:[#allocation6] sm:$0xff] }
0x1780   :  { %2462 = vrot.lane.b32.xlu0 %v2460_v20, %s3247_s20 }
0x1798   :  { %v2368_v12 = vpop.permute.xlu1 %2367 }
0x1799   :  { %2370 = vst.msk [vmem:[#allocation5] sm:$0xff] %vm326_vm1, %v2368_v12 }
0x179a   :  { %2371 = vst.msk [vmem:[%s4533_s12 + $0x30] sm:$0xff] %vm75_vm0, %v2368_v12 }
0x179b   :  { %2372 = vst.msk [vmem:[%s4533_s12 + $0x8] sm:$0xff] %vm457_vm10, %v2368_v12 }
0x17a0   :  { %v2375_v52 = vld [vmem:[#allocation5] sm:$0xff] }
0x17a1   :  { %2976 = vmatmul.msk.f32.vlgmr.msra.gmra.mxu2 %vm326_vm1, %v2375_v52  ;;  %2977 = vmatmul.msk.f32.vlgmr.msra.gmra.mxu3 %vm326_vm1, %v2375_v52  ;;  %v2492_v54 = vld [vmem:[%s4533_s12 + $0x30] sm:$0xff] }
0x17a2   :  { %v2487_v29 = vld [vmem:[%s4533_s12 + $0x8] sm:$0xff] }
0x17f2   :  { %v2463_v46 = vpop.permute.xlu0 %2462 }
0x1824   :  { %v2396_v40 = vpop.f32.mrf.mxu2  ;;  %v2416_v53 = vpop.f32.mrf.mxu3 }
0x1825   :  { %v2419_v49 = vadd.f32 %v2396_v40, %v4176_v36  ;;  %v2420_v62 = vadd.f32 %v2416_v53, %v4178_v37 }
0x1827   :  { %v2978_v0 = vmul.f32 -1.442695, %v2419_v49  ;;  %v2979_v48 = vmul.f32 -1.442695, %v2420_v62 }
0x1829   :  { %3186 = vpow2.f32 %v2978_v0 }
0x182f   :  { %v3187_v51 = vpop.eup %3186 }
0x1830   :  { %v2424_v57 = vadd.f32 1.0, %v3187_v51 }
0x1832   :  { %3188 = vrcp.f32 %v2424_v57  ;;  %v2436_v50 = vand.u32 2147483648, %v2424_v57  ;;  %v2434_v39 = vand.u32 2147483647, %v2424_v57  ;;  %vm2430_vm6 = vweird.f32 %v2424_v57 }
0x1833   :  { %3190 = vtanh.f32 %v2420_v62 }
0x1834   :  { %v2437_v36 = vor.u32 1.1754944e-38, %v2436_v50  ;;  %vm2435_vm8 = vcmp.eq.f32.partialorder %v2434_v39, 8.507059e+37  ;;  %3192 = vpow2.f32 %v2979_v48 }
0x1838   :  { %v3189_v59 = vpop.eup %3188 }
0x1839   :  { %v2426_v41 = vmul.f32 %v3189_v59, %v2424_v57  ;;  %vm2431_vm5 = vweird.f32 %v3189_v59  ;;  %v3191_v9 = vpop.eup %3190 }
0x183a   :  { %vm2432_vm7 = vmor %vm2430_vm6, %vm2431_vm5  ;;  %v3193_v37 = vpop.eup %3192 }
0x183b   :  { %v2427_v4 = vsub.f32 1.0, %v2426_v41  ;;  %v2444_v15 = vadd.f32 1.0, %v3193_v37 }
0x183d   :  { %v2428_v38 = vmul.f32 %v3189_v59, %v2427_v4  ;;  %3194 = vrcp.f32 %v2444_v15  ;;  %v2456_v8 = vand.u32 2147483648, %v2444_v15  ;;  %vm2450_vm11 = vweird.f32 %v2444_v15 }
0x183e   :  { %v2454_v33 = vand.u32 2147483647, %v2444_v15 }
0x183f   :  { %v2429_v63 = vadd.f32 %v3189_v59, %v2428_v38  ;;  %v2457_v58 = vor.u32 1.1754944e-38, %v2456_v8 }
0x1840   :  { %vm2455_vm13 = vcmp.eq.f32.partialorder %v2454_v33, 8.507059e+37 }
0x1841   :  { %v2433_v3 = vsel %vm2432_vm7, %v3189_v59, %v2429_v63 }
0x1842   :  { %v2438_v56 = vsel %vm2435_vm8, %v2437_v36, %v2433_v3 }
0x1843   :  { %v2466_v10 = vmul.f32 %v3191_v9, %v2438_v56  ;;  %v3195_v23 = vpop.eup %3194  ;;  %v2465_v6 = vmul.f32 %v2463_v46, %v2438_v56 }
0x1844   :  { %v2446_v44 = vmul.f32 %v3195_v23, %v2444_v15  ;;  %vm2451_vm9 = vweird.f32 %v3195_v23 }
0x1845   :  { %2468 = vrot.lane.b32.xlu1 %v2466_v10, %s3247_s20  ;;  %vm2452_vm12 = vmor %vm2450_vm11, %vm2451_vm9 }
0x1846   :  { %v2447_v45 = vsub.f32 1.0, %v2446_v44 }
0x1848   :  { %v2448_v61 = vmul.f32 %v3195_v23, %v2447_v45 }
0x184a   :  { %v2449_v43 = vadd.f32 %v3195_v23, %v2448_v61 }
0x184c   :  { %v2453_v21 = vsel %vm2452_vm12, %v3195_v23, %v2449_v43 }
0x184d   :  { %v2458_v47 = vsel %vm2455_vm13, %v2457_v58, %v2453_v21 }
0x18b7   :  { %v2469_v14 = vpop.permute.xlu1 %2468 }
0x18b8   :  { %v4369_v60 = vadd.f32 %v2469_v14, %v2465_v6 }
0x18ba   :  { %3196 = vtanh.f32 %v4369_v60 }
0x18c0   :  { %v3197_v7 = vpop.eup %3196 }
0x18c1   :  { %v2473_v18 = vmul.f32 %v3197_v7, %v2458_v47 }
0x18c3   :  { %2480 = vrot.lane.b32.xlu2 %v2473_v18, %s3247_s20 }
0x191d   :  { %v2481_v25 = vpop.permute.xlu2 %2480 }
0x191e   :  { %2483 = vst.msk [vmem:[#allocation5] sm:$0xff] %vm326_vm1, %v2481_v25 }
0x191f   :  { %2484 = vst.msk [vmem:[%s4533_s12 + $0x38] sm:$0xff] %vm75_vm0, %v2481_v25  ;;  %vm2577_vm0 = vcmask 130048  }
0x1920   :  { %2485 = vst.msk [vmem:[%s4533_s12] sm:$0xff] %vm457_vm10, %v2481_v25  ;;  %vm2643_vm10 = vcmask 31744  }
0x1926   :  { %v2493_v26 = vld [vmem:[%s4533_s12 + $0x38] sm:$0xff] }
0x1927   :  { %v2486_v28 = vld [vmem:[%s4533_s12] sm:$0xff] }
0x1928   :  { %2980 = vmatmul.msk.f32.vlgmr.msra.gmra.mxu0 %vm326_vm1, %v2486_v28 }
0x1930   :  { %2981 = vmatmul.msk.f32.gmra.mxu0 %vm326_vm1, %v2487_v29 }
0x1938   :  { %2982 = vmatmul.msk.f32.gmra.mxu0 %vm326_vm1, %v2488_v30 }
0x1940   :  { %2983 = vmatmul.msk.f32.gmra.mxu0 %vm326_vm1, %v2489_v32 }
0x1948   :  { %2984 = vmatmul.msk.f32.gmra.mxu0 %vm326_vm1, %v2490_v31 }
0x1950   :  { %2985 = vmatmul.msk.f32.gmra.mxu0 %vm326_vm1, %v2491_v35 }
0x1958   :  { %2986 = vmatmul.msk.f32.gmra.mxu0 %vm326_vm1, %v2492_v54 }
0x1960   :  { %2987 = vmatmul.msk.f32.gmra.mxu0 %vm326_vm1, %v2493_v26 }
0x19a5   :  { %v2543_v16 = vpop.f32.mrf.mxu0 }
0x19a6   :  { %3198 = vtanh.f32 %v2543_v16 }
0x19ac   :  { %v3199_v42 = vpop.eup %3198 }
0x19ad   :  { %v2546_v1 = vpop.f32.mrf.mxu0  ;;  %2988 = vmatmul.msk.f32.vlgmr.msra.gmra.mxu1 %vm2577_vm0, %v3199_v42 }
0x19ae   :  { %3200 = vtanh.f32 %v2546_v1 }
0x19b4   :  { %v3201_v5 = vpop.eup %3200 }
0x19b5   :  { %v2549_v20 = vpop.f32.mrf.mxu0  ;;  %2989 = vmatmul.msk.f32.gmra.mxu1 %vm2577_vm0, %v3201_v5 }
0x19b6   :  { %3202 = vtanh.f32 %v2549_v20 }
0x19bc   :  { %v3203_v12 = vpop.eup %3202 }
0x19bd   :  { %v2552_v52 = vpop.f32.mrf.mxu0  ;;  %2990 = vmatmul.msk.f32.gmra.mxu1 %vm2577_vm0, %v3203_v12 }
0x19be   :  { %3204 = vtanh.f32 %v2552_v52 }
0x19c4   :  { %v3205_v40 = vpop.eup %3204 }
0x19c5   :  { %v2555_v49 = vpop.f32.mrf.mxu0  ;;  %2991 = vmatmul.msk.f32.gmra.mxu1 %vm2577_vm0, %v3205_v40 }
0x19c6   :  { %3206 = vtanh.f32 %v2555_v49 }
0x19cc   :  { %v3207_v0 = vpop.eup %3206 }
0x19cd   :  { %v2558_v51 = vpop.f32.mrf.mxu0  ;;  %2992 = vmatmul.msk.f32.gmra.mxu1 %vm2577_vm0, %v3207_v0 }
0x19ce   :  { %3208 = vtanh.f32 %v2558_v51 }
0x19d4   :  { %v3209_v57 = vpop.eup %3208 }
0x19d5   :  { %v2561_v53 = vpop.f32.mrf.mxu0  ;;  %2993 = vmatmul.msk.f32.gmra.mxu1 %vm2577_vm0, %v3209_v57 }
0x19d6   :  { %3210 = vtanh.f32 %v2561_v53 }
0x19dc   :  { %v3211_v59 = vpop.eup %3210 }
0x19dd   :  { %v2564_v62 = vpop.f32.mrf.mxu0  ;;  %2994 = vmatmul.msk.f32.gmra.mxu1 %vm2577_vm0, %v3211_v59 }
0x19de   :  { %3212 = vtanh.f32 %v2564_v62 }
0x19e4   :  { %v3213_v41 = vpop.eup %3212 }
0x19e5   :  { %2995 = vmatmul.msk.f32.gmra.mxu1 %vm2577_vm0, %v3213_v41 }
0x1a2a   :  { %v2619_v4 = vpop.f32.mrf.mxu1 }
0x1a2b   :  { %v2644_v50 = vsel %vm2643_vm10, %v2619_v4, -inf }
0x1a2c   :  { %2645 = vmax.xlane.f32.xlu0 %v2644_v50 }
0x1a32   :  { %v2622_v38 = vpop.f32.mrf.mxu1 }
0x1a33   :  { %v2647_v39 = vsel %vm2643_vm10, %v2622_v38, -inf }
0x1a34   :  { %2648 = vmax.xlane.f32.xlu1 %v2647_v39 }
0x1a3a   :  { %v2625_v63 = vpop.f32.mrf.mxu1 }
0x1a3b   :  { %v2650_v36 = vsel %vm2643_vm10, %v2625_v63, -inf }
0x1a3c   :  { %2651 = vmax.xlane.f32.xlu2 %v2650_v36 }
0x1a42   :  { %v2628_v3 = vpop.f32.mrf.mxu1 }
0x1a43   :  { %v2653_v9 = vsel %vm2643_vm10, %v2628_v3, -inf }
0x1a44   :  { %2654 = vmax.xlane.f32.xlu2 %v2653_v9 }
0x1a4a   :  { %v2631_v56 = vpop.f32.mrf.mxu1 }
0x1a4b   :  { %v2656_v10 = vsel %vm2643_vm10, %v2631_v56, -inf }
0x1a4c   :  { %2657 = vmax.xlane.f32.xlu0 %v2656_v10 }
0x1a52   :  { %v2634_v48 = vpop.f32.mrf.mxu1 }
0x1a53   :  { %v2659_v37 = vsel %vm2643_vm10, %v2634_v48, -inf }
0x1a54   :  { %2660 = vmax.xlane.f32.xlu1 %v2659_v37 }
0x1a5a   :  { %v2637_v15 = vpop.f32.mrf.mxu1 }
0x1a5b   :  { %v2662_v13 = vsel %vm2643_vm10, %v2637_v15, -inf }
0x1a5c   :  { %2663 = vmax.xlane.f32.xlu2 %v2662_v13 }
0x1a62   :  { %v2640_v19 = vpop.f32.mrf.mxu1 }
0x1a63   :  { %v2665_v24 = vsel %vm2643_vm10, %v2640_v19, -inf }
0x1a64   :  { %2666 = vmax.xlane.f32.xlu0 %v2665_v24 }
0x1a9f   :  { %v2646_v34 = vpop.xlane.xlu0 %2645 }
0x1aa0   :  { %v2668_v23 = vsub.f32 %v2619_v4, %v2646_v34 }
0x1aa2   :  { %v2676_v44 = vmul.f32 1.442695, %v2668_v23 }
0x1aa4   :  { %3214 = vpow2.f32 %v2676_v44 }
0x1aa7   :  { %v2649_v45 = vpop.xlane.xlu1 %2648 }
0x1aa8   :  { %v2669_v46 = vsub.f32 %v2622_v38, %v2649_v45 }
0x1aaa   :  { %v4448_v61 = vpop.eup %3214  ;;  %v2678_v6 = vmul.f32 1.442695, %v2669_v46 }
0x1aab   :  { %v2692_v14 = vsel %vm2643_vm10, %v4448_v61, 0.0 }
0x1aac   :  { %3216 = vpow2.f32 %v2678_v6  ;;  %2693 = vadd.xlane.f32.xlu1 %v2692_v14 }
0x1aaf   :  { %v2652_v43 = vpop.xlane.xlu2 %2651 }
0x1ab0   :  { %v2670_v8 = vsub.f32 %v2625_v63, %v2652_v43 }
0x1ab2   :  { %v4452_v33 = vpop.eup %3216  ;;  %v2680_v21 = vmul.f32 1.442695, %v2670_v8 }
0x1ab3   :  { %v2695_v58 = vsel %vm2643_vm10, %v4452_v33, 0.0 }
0x1ab4   :  { %3218 = vpow2.f32 %v2680_v21  ;;  %2696 = vadd.xlane.f32.xlu2 %v2695_v58 }
0x1ab7   :  { %v2655_v7 = vpop.xlane.xlu2 %2654 }
0x1ab8   :  { %v2671_v47 = vsub.f32 %v2628_v3, %v2655_v7 }
0x1aba   :  { %v4456_v18 = vpop.eup %3218  ;;  %v2682_v17 = vmul.f32 1.442695, %v2671_v47 }
0x1abb   :  { %v2698_v27 = vsel %vm2643_vm10, %v4456_v18, 0.0 }
0x1abc   :  { %3220 = vpow2.f32 %v2682_v17  ;;  %2699 = vadd.xlane.f32.xlu0 %v2698_v27 }
0x1abf   :  { %v2658_v2 = vpop.xlane.xlu0 %2657 }
0x1ac0   :  { %v2672_v22 = vsub.f32 %v2631_v56, %v2658_v2 }
0x1ac2   :  { %v4460_v25 = vpop.eup %3220  ;;  %v2684_v28 = vmul.f32 1.442695, %v2672_v22 }
0x1ac3   :  { %v2701_v29 = vsel %vm2643_vm10, %v4460_v25, 0.0 }
0x1ac4   :  { %3222 = vpow2.f32 %v2684_v28  ;;  %2702 = vadd.xlane.f32.xlu1 %v2701_v29 }
0x1ac7   :  { %v2661_v30 = vpop.xlane.xlu1 %2660 }
0x1ac8   :  { %v2673_v32 = vsub.f32 %v2634_v48, %v2661_v30 }
0x1aca   :  { %v4464_v31 = vpop.eup %3222  ;;  %v2686_v35 = vmul.f32 1.442695, %v2673_v32 }
0x1acb   :  { %v2704_v54 = vsel %vm2643_vm10, %v4464_v31, 0.0 }
0x1acc   :  { %3224 = vpow2.f32 %v2686_v35  ;;  %2705 = vadd.xlane.f32.xlu2 %v2704_v54 }
0x1acf   :  { %v2664_v26 = vpop.xlane.xlu2 %2663 }
0x1ad0   :  { %v2674_v11 = vsub.f32 %v2637_v15, %v2664_v26 }
0x1ad2   :  { %v4468_v55 = vpop.eup %3224  ;;  %v2688_v16 = vmul.f32 1.442695, %v2674_v11 }
0x1ad3   :  { %v2707_v42 = vsel %vm2643_vm10, %v4468_v55, 0.0 }
0x1ad4   :  { %3226 = vpow2.f32 %v2688_v16  ;;  %2708 = vadd.xlane.f32.xlu0 %v2707_v42 }
0x1ad7   :  { %v2667_v1 = vpop.xlane.xlu0 %2666 }
0x1ad8   :  { %v2675_v5 = vsub.f32 %v2640_v19, %v2667_v1 }
0x1ada   :  { %v4472_v20 = vpop.eup %3226  ;;  %v2690_v12 = vmul.f32 1.442695, %v2675_v5 }
0x1adb   :  { %v2710_v52 = vsel %vm2643_vm10, %v4472_v20, 0.0 }
0x1adc   :  { %3228 = vpow2.f32 %v2690_v12  ;;  %2711 = vadd.xlane.f32.xlu1 %v2710_v52 }
0x1ae2   :  { %v4476_v40 = vpop.eup %3228 }
0x1ae3   :  { %v2713_v49 = vsel %vm2643_vm10, %v4476_v40, 0.0 }
0x1ae4   :  { %2714 = vadd.xlane.f32.xlu2 %v2713_v49 }
0x1ae8   :  { %2475 = vrot.lane.b32.xlu0 %v4369_v60, %s3247_s20 }
0x1b1f   :  { %v2694_v0 = vpop.xlane.xlu1 %2693 }
0x1b20   :  { %3230 = vrcp.f32 %v2694_v0  ;;  %v2727_v62 = vand.u32 2147483648, %v2694_v0  ;;  %v2725_v4 = vand.u32 2147483647, %v2694_v0  ;;  %vm2721_vm15 = vweird.f32 %v2694_v0 }
0x1b22   :  { %v2728_v39 = vor.u32 1.1754944e-38, %v2727_v62  ;;  %vm2726_vm3 = vcmp.eq.f32.partialorder %v2725_v4, 8.507059e+37 }
0x1b26   :  { %v3231_v51 = vpop.eup %3230 }
0x1b27   :  { %v2717_v57 = vmul.f32 %v3231_v51, %v2694_v0  ;;  %v2697_v53 = vpop.xlane.xlu2 %2696  ;;  %vm2722_vm14 = vweird.f32 %v3231_v51 }
0x1b28   :  { %3232 = vrcp.f32 %v2697_v53  ;;  %vm2723_vm2 = vmor %vm2721_vm15, %vm2722_vm14  ;;  %v2742_v10 = vand.u32 2147483648, %v2697_v53  ;;  %v2740_v37 = vand.u32 2147483647, %v2697_v53  ;;  %vm2736_vm5 = vweird.f32 %v2697_v53 }
0x1b29   :  { %v2718_v59 = vsub.f32 1.0, %v2717_v57 }
0x1b2a   :  { %v2743_v19 = vor.u32 1.1754944e-38, %v2742_v10  ;;  %vm2741_vm7 = vcmp.eq.f32.partialorder %v2740_v37, 8.507059e+37 }
0x1b2b   :  { %v2719_v41 = vmul.f32 %v3231_v51, %v2718_v59 }
0x1b2d   :  { %v2720_v50 = vadd.f32 %v3231_v51, %v2719_v41 }
0x1b2e   :  { %v3233_v38 = vpop.eup %3232 }
0x1b2f   :  { %v2724_v63 = vsel %vm2723_vm2, %v3231_v51, %v2720_v50  ;;  %v2732_v36 = vmul.f32 %v3233_v38, %v2697_v53  ;;  %v2700_v60 = vpop.xlane.xlu0 %2699  ;;  %vm2737_vm4 = vweird.f32 %v3233_v38 }
0x1b30   :  { %v2729_v3 = vsel %vm2726_vm3, %v2728_v39, %v2724_v63  ;;  %3234 = vrcp.f32 %v2700_v60  ;;  %vm2738_vm6 = vmor %vm2736_vm5, %vm2737_vm4  ;;  %v2755_v14 = vand.u32 2147483647, %v2700_v60  ;;  %vm2751_vm9 = vweird.f32 %v2700_v60 }
0x1b31   :  { %v2730_v9 = vmul.f32 %v4448_v61, %v2729_v3  ;;  %v2733_v56 = vsub.f32 1.0, %v2732_v36  ;;  %v2757_v61 = vand.u32 2147483648, %v2700_v60 }
0x1b32   :  { %vm2756_vm12 = vcmp.eq.f32.partialorder %v2755_v14, 8.507059e+37 }
0x1b33   :  { %2836 = vst.msk [vmem:[%s4536_s13] sm:$0xff] %vm2643_vm10, %v2730_v9  ;;  %v2734_v48 = vmul.f32 %v3233_v38, %v2733_v56  ;;  %v2758_v21 = vor.u32 1.1754944e-38, %v2757_v61 }
0x1b35   :  { %v2735_v15 = vadd.f32 %v3233_v38, %v2734_v48 }
0x1b36   :  { %v3235_v13 = vpop.eup %3234 }
0x1b37   :  { %v2739_v24 = vsel %vm2738_vm6, %v3233_v38, %v2735_v15  ;;  %v2747_v34 = vmul.f32 %v3235_v13, %v2700_v60  ;;  %v2703_v23 = vpop.xlane.xlu1 %2702  ;;  %vm2752_vm8 = vweird.f32 %v3235_v13 }
0x1b38   :  { %v2744_v44 = vsel %vm2741_vm7, %v2743_v19, %v2739_v24  ;;  %3236 = vrcp.f32 %v2703_v23  ;;  %vm2753_vm11 = vmor %vm2751_vm9, %vm2752_vm8  ;;  %v2772_v2 = vand.u32 2147483648, %v2703_v23  ;;  %v2770_v28 = vand.u32 2147483647, %v2703_v23 }
0x1b39   :  { %v2745_v45 = vmul.f32 %v4452_v33, %v2744_v44  ;;  %v2748_v46 = vsub.f32 1.0, %v2747_v34  ;;  %vm2766_vm0 = vweird.f32 %v2703_v23 }
0x1b3a   :  { %v2773_v32 = vor.u32 1.1754944e-38, %v2772_v2  ;;  %vm2771_vm15 = vcmp.eq.f32.partialorder %v2770_v28, 8.507059e+37 }
0x1b3b   :  { %2837 = vst.msk [vmem:[%s4536_s13 + $0x8] sm:$0xff] %vm2643_vm10, %v2745_v45  ;;  %v2749_v6 = vmul.f32 %v3235_v13, %v2748_v46 }
0x1b3d   :  { %v2750_v43 = vadd.f32 %v3235_v13, %v2749_v6 }
0x1b3e   :  { %v3237_v8 = vpop.eup %3236 }
0x1b3f   :  { %v2754_v58 = vsel %vm2753_vm11, %v3235_v13, %v2750_v43  ;;  %v2762_v7 = vmul.f32 %v3237_v8, %v2703_v23  ;;  %v2706_v47 = vpop.xlane.xlu2 %2705  ;;  %vm2767_vm13 = vweird.f32 %v3237_v8 }
0x1b40   :  { %v2759_v33 = vsel %vm2756_vm12, %v2758_v21, %v2754_v58  ;;  %3238 = vrcp.f32 %v2706_v47  ;;  %vm2768_vm14 = vmor %vm2766_vm0, %vm2767_vm13  ;;  %v2787_v42 = vand.u32 2147483648, %v2706_v47  ;;  %v2785_v5 = vand.u32 2147483647, %v2706_v47 }
0x1b41   :  { %v2760_v17 = vmul.f32 %v4456_v18, %v2759_v33  ;;  %v2763_v27 = vsub.f32 1.0, %v2762_v7  ;;  %vm2781_vm3 = vweird.f32 %v2706_v47 }
0x1b42   :  { %v2788_v49 = vor.u32 1.1754944e-38, %v2787_v42  ;;  %vm2786_vm5 = vcmp.eq.f32.partialorder %v2785_v5, 8.507059e+37 }
0x1b43   :  { %2838 = vst.msk [vmem:[%s4536_s13 + $0x10] sm:$0xff] %vm2643_vm10, %v2760_v17  ;;  %v2764_v22 = vmul.f32 %v3237_v8, %v2763_v27 }
0x1b45   :  { %v2765_v29 = vadd.f32 %v3237_v8, %v2764_v22 }
0x1b46   :  { %v3239_v30 = vpop.eup %3238 }
0x1b47   :  { %v2769_v35 = vsel %vm2768_vm14, %v3237_v8, %v2765_v29  ;;  %v2777_v54 = vmul.f32 %v3239_v30, %v2706_v47  ;;  %v2709_v26 = vpop.xlane.xlu0 %2708  ;;  %vm2782_vm2 = vweird.f32 %v3239_v30 }
0x1b48   :  { %v2774_v18 = vsel %vm2771_vm15, %v2773_v32, %v2769_v35  ;;  %3240 = vrcp.f32 %v2709_v26  ;;  %vm2783_vm4 = vmor %vm2781_vm3, %vm2782_vm2  ;;  %v2802_v62 = vand.u32 2147483648, %v2709_v26  ;;  %v2800_v4 = vand.u32 2147483647, %v2709_v26 }
0x1b49   :  { %v2775_v11 = vmul.f32 %v4460_v25, %v2774_v18  ;;  %v2778_v16 = vsub.f32 1.0, %v2777_v54  ;;  %vm2796_vm7 = vweird.f32 %v2709_v26 }
0x1b4a   :  { %v2803_v39 = vor.u32 1.1754944e-38, %v2802_v62  ;;  %vm2801_vm9 = vcmp.eq.f32.partialorder %v2800_v4, 8.507059e+37 }
0x1b4b   :  { %2839 = vst.msk [vmem:[%s4536_s13 + $0x18] sm:$0xff] %vm2643_vm10, %v2775_v11  ;;  %v2779_v1 = vmul.f32 %v3239_v30, %v2778_v16 }
0x1b4d   :  { %v2780_v12 = vadd.f32 %v3239_v30, %v2779_v1 }
0x1b4e   :  { %v3241_v52 = vpop.eup %3240 }
0x1b4f   :  { %v2784_v0 = vsel %vm2783_vm4, %v3239_v30, %v2780_v12  ;;  %v2792_v51 = vmul.f32 %v3241_v52, %v2709_v26  ;;  %v2712_v57 = vpop.xlane.xlu1 %2711  ;;  %vm2797_vm6 = vweird.f32 %v3241_v52 }
0x1b50   :  { %v2789_v25 = vsel %vm2786_vm5, %v2788_v49, %v2784_v0  ;;  %3242 = vrcp.f32 %v2712_v57  ;;  %vm2798_vm8 = vmor %vm2796_vm7, %vm2797_vm6  ;;  %v2817_v56 = vand.u32 2147483648, %v2712_v57  ;;  %v2815_v37 = vand.u32 2147483647, %v2712_v57 }
0x1b51   :  { %v2790_v53 = vmul.f32 %v4464_v31, %v2789_v25  ;;  %v2793_v59 = vsub.f32 1.0, %v2792_v51  ;;  %vm2811_vm12 = vweird.f32 %v2712_v57 }
0x1b52   :  { %v2818_v19 = vor.u32 1.1754944e-38, %v2817_v56  ;;  %vm2816_vm0 = vcmp.eq.f32.partialorder %v2815_v37, 8.507059e+37 }
0x1b53   :  { %2840 = vst.msk [vmem:[%s4536_s13 + $0x20] sm:$0xff] %vm2643_vm10, %v2790_v53  ;;  %v2794_v41 = vmul.f32 %v3241_v52, %v2793_v59 }
0x1b55   :  { %v2795_v50 = vadd.f32 %v3241_v52, %v2794_v41 }
0x1b56   :  { %v3243_v38 = vpop.eup %3242 }
0x1b57   :  { %v2799_v63 = vsel %vm2798_vm8, %v3241_v52, %v2795_v50  ;;  %v2807_v36 = vmul.f32 %v3243_v38, %v2712_v57  ;;  %v2715_v60 = vpop.xlane.xlu2 %2714  ;;  %vm2812_vm11 = vweird.f32 %v3243_v38 }
0x1b58   :  { %v2804_v31 = vsel %vm2801_vm9, %v2803_v39, %v2799_v63  ;;  %3244 = vrcp.f32 %v2715_v60  ;;  %vm2813_vm13 = vmor %vm2811_vm12, %vm2812_vm11  ;;  %v2832_v45 = vand.u32 2147483648, %v2715_v60  ;;  %v2830_v61 = vand.u32 2147483647, %v2715_v60 }
0x1b59   :  { %v2805_v3 = vmul.f32 %v4468_v55, %v2804_v31  ;;  %v2808_v9 = vsub.f32 1.0, %v2807_v36  ;;  %vm2826_vm14 = vweird.f32 %v2715_v60 }
0x1b5a   :  { %v2476_v10 = vpop.permute.xlu0 %2475  ;;  %v2833_v14 = vor.u32 1.1754944e-38, %v2832_v45  ;;  %vm2831_vm2 = vcmp.eq.f32.partialorder %v2830_v61, 8.507059e+37 }
0x1b5b   :  { %2841 = vst.msk [vmem:[%s4536_s13 + $0x28] sm:$0xff] %vm2643_vm10, %v2805_v3  ;;  %v2809_v48 = vmul.f32 %v3243_v38, %v2808_v9 }
0x1b5c   :  { %2478 = vst.msk [vmem:[#allocation6] sm:$0xff] %vm326_vm1, %v2476_v10 }
0x1b5d   :  { %v2810_v15 = vadd.f32 %v3243_v38, %v2809_v48 }
0x1b5e   :  { %v3245_v13 = vpop.eup %3244 }
0x1b5f   :  { %v2814_v24 = vsel %vm2813_vm13, %v3243_v38, %v2810_v15  ;;  %v2822_v55 = vmul.f32 %v3245_v13, %v2715_v60  ;;  %vm2827_vm1 = vweird.f32 %v3245_v13 }
0x1b60   :  { %v2819_v34 = vsel %vm2816_vm0, %v2818_v19, %v2814_v24  ;;  %vm2828_vm15 = vmor %vm2826_vm14, %vm2827_vm1 }
0x1b61   :  { %v2820_v23 = vmul.f32 %v4472_v20, %v2819_v34  ;;  %v2823_v44 = vsub.f32 1.0, %v2822_v55 }
0x1b63   :  { %2842 = vst.msk [vmem:[%s4536_s13 + $0x30] sm:$0xff] %vm2643_vm10, %v2820_v23  ;;  %v2824_v46 = vmul.f32 %v3245_v13, %v2823_v44 }
0x1b65   :  { %v2825_v6 = vadd.f32 %v3245_v13, %v2824_v46 }
0x1b67   :  { %v2829_v43 = vsel %vm2828_vm15, %v3245_v13, %v2825_v6 }
0x1b68   :  { %v2834_v8 = vsel %vm2831_vm2, %v2833_v14, %v2829_v43 }
0x1b69   :  { %v2835_v21 = vmul.f32 %v4476_v40, %v2834_v8 }
0x1b6b   :  { %2843 = vst.msk [vmem:[%s4536_s13 + $0x38] sm:$0xff] %vm2643_vm10, %v2835_v21 }

</bundles_post_ra>
